<compile_context>
chip_gen: v7x
topology: tpu7x:2x2x1
jax: 0.10.0
libtpu: 0.0.40
codegen_flags: <defaults>
</compile_context>

<pallas_src>
import functools

import jax
import jax.numpy as jnp
import numpy as np
from jax.experimental import pallas as pl
from jax.experimental.pallas import tpu as pltpu

EPS = 1e-5


# --------------------------- in-kernel helpers --------------------------------

def _conv3x3_same(pad_ref, interior, w_col_ref):
    """3x3 'same' conv via in-VMEM im2col + a single deep-K MXU matmul.

    pad_ref  : f32 VMEM scratch (NB, H+2, W+2, C) realizing the zero halo
               (the padded intermediate never round-trips through HBM).
    interior : (NB, H, W, C) f32 value.
    w_col_ref: (9*C, Cout) ref holding the im2col-reshaped weight in the matmul
               compute dtype (bf16 on v6e/v7x fast path, f32 for exact path).
    Returns (NB*H*W, Cout) float32.
    """
    NB, Hp, Wp, C = pad_ref.shape
    H, W = Hp - 2, Wp - 2
    rows = NB * H * W

    # Zero halo + interior write, entirely in VMEM.
    pad_ref[...] = jnp.zeros_like(pad_ref)
    pad_ref[:, 1:H + 1, 1:W + 1, :] = interior
    xp = pad_ref[...]

    # im2col: 9 taps concatenated along lanes -> K = 9*C, filling the MXU
    # systolic depth instead of 9 shallow K=C matmuls.
    taps = [xp[:, dy:dy + H, dx:dx + W, :].reshape(rows, C)
            for dy in range(3) for dx in range(3)]
    patches = jnp.concatenate(taps, axis=-1)                   # (rows, 9*C)

    return jnp.dot(patches.astype(w_col_ref.dtype), w_col_ref[...],
                   preferred_element_type=jnp.float32)


def _accum_channel_stats(stats_ref, y):
    """One-pass per-channel sum / sum-of-squares, accumulated across the grid."""
    s = jnp.sum(y, axis=0, keepdims=True)                      # (1, C) f32
    ss = jnp.sum(y * y, axis=0, keepdims=True)                 # (1, C) f32
    upd = jnp.concatenate([s, ss], axis=0)                     # (2, C)

    @pl.when(pl.program_id(0) == 0)
    def _():
        stats_ref[...] = jnp.zeros_like(stats_ref)

    stats_ref[...] += upd


# ------------------------------- kernels ---------------------------------------

def _stats1_kernel(x_ref, w1_ref, stats_ref, xpad_s):
    # pass 1: conv1 -> per-channel sum/sumsq for bn1 batch statistics.
    y1 = _conv3x3_same(xpad_s, x_ref[...], w1_ref)
    _accum_channel_stats(stats_ref, y1)


def _stats2_kernel(x_ref, w1_ref, w2_ref, a1_ref, c1_ref, stats_ref,
                   xpad_s, midpad_s):
    # pass 2: conv1 -> fused bn1 scale/shift -> relu -> grouped conv2
    # (block-diagonal dense) -> per-channel sum/sumsq for bn2.
    # The bn1 output stays in VMEM (midpad_s); no HBM intermediate.
    NB, Hp, Wp, C2 = midpad_s.shape
    H, W = Hp - 2, Wp - 2
    y1 = _conv3x3_same(xpad_s, x_ref[...], w1_ref)
    mid = jnp.maximum(y1 * a1_ref[...] + c1_ref[...], 0.0)     # fused bn1 + relu
    y2 = _conv3x3_same(midpad_s, mid.reshape(NB, H, W, C2), w2_ref)
    _accum_channel_stats(stats_ref, y2)


def _final_kernel(x_ref, w1_ref, w2_ref, a1_ref, c1_ref, a2_ref, c2_ref,
                  o_ref, xpad_s, midpad_s):
    # pass 3: recompute conv1/conv2 for this tile (both intermediates stay in
    # VMEM), apply fused bn2 scale/shift, residual add, relu -> single output
    # write. All elementwise / BN math in f32 (v5e-safe).
    NB, Hp, Wp, C2 = midpad_s.shape
    H, W = Hp - 2, Wp - 2
    rows = NB * H * W
    xv = x_ref[...]                                            # f32, also the residual
    y1 = _conv3x3_same(xpad_s, xv, w1_ref)
    mid = jnp.maximum(y1 * a1_ref[...] + c1_ref[...], 0.0)
    y2 = _conv3x3_same(midpad_s, mid.reshape(NB, H, W, C2), w2_ref)
    out = y2 * a2_ref[...] + c2_ref[...] + xv.reshape(rows, C2)
    o_ref[...] = jnp.maximum(out, 0.0)


# ------------------------------- wrapper ----------------------------------------

def basic_block_forward_nhwc(x_nhwc, w1_col, w2_col, g1, b1, g2, b2,
                             *, compute_dtype=jnp.bfloat16, batch_tile=1):
    """ResNeXt BasicBlock forward, NHWC in / NHWC out (channels on lanes)."""
    N, H, W, Cin = x_nhwc.shape
    C2 = w1_col.shape[-1]
    assert w1_col.shape == (9 * Cin, C2)
    assert w2_col.shape == (9 * C2, C2)
    assert Cin == C2, "no-downsample residual requires inplanes == planes*2"
    assert N % batch_tile == 0
    NB = batch_tile
    NT = N // NB
    rows = NB * H * W
    count = float(N * H * W)

    x = x_nhwc.astype(jnp.float32)
    w1c = w1_col.astype(compute_dtype)
    w2c = w2_col.astype(compute_dtype)

    # --- specs shared by the three passes ---------------------------------------
    x_spec = pl.BlockSpec((NB, H, W, Cin), lambda b: (b, 0, 0, 0))
    w1_spec = pl.BlockSpec((9 * Cin, C2), lambda b: (0, 0))
    w2_spec = pl.BlockSpec((9 * C2, C2), lambda b: (0, 0))
    vec_spec = pl.BlockSpec((1, C2), lambda b: (0, 0))
    stats_spec = pl.BlockSpec((2, C2), lambda b: (0, 0))       # resident accumulator
    out_spec = pl.BlockSpec((rows, C2), lambda b: (b, 0))

    xpad_scr = pltpu.VMEM((NB, H + 2, W + 2, Cin), jnp.float32)
    midpad_scr = pltpu.VMEM((NB, H + 2, W + 2, C2), jnp.float32)

    # VMEM budget from the actual per-tile working set (double-buffered blocks +
    # halo scratch + im2col temporaries) with headroom, capped for v7x (64 MiB).
    blk = 4 * (NB * H * W * Cin + rows * C2 + 6 * C2) + 4 * (9 * Cin * C2 + 9 * C2 * C2)
    scr = 4 * NB * (H + 2) * (W + 2) * (Cin + C2)
    tmp = 4 * rows * 9 * max(Cin, C2) * 2
    vmem_limit = int(min(96 * 2 ** 20,
                         max(32 * 2 ** 20, 2 * blk + scr + tmp + (8 << 20))))

    def cparams(sem):
        return pltpu.CompilerParams(dimension_semantics=(sem,),
                                    vmem_limit_bytes=vmem_limit)

    def scale_shift(stats, gamma, beta):
        # Fused BN apply: y_hat = y * a + c  with  a = g*rsqrt(var+eps),
        # c = b - mean*a.  (biased batch variance, training-mode BN)
        mean = stats[0] / count
        var = stats[1] / count - mean * mean
        a = gamma * jax.lax.rsqrt(var + EPS)
        c = beta - mean * a
        return a.reshape(1, C2), c.reshape(1, C2)

    stats_shape = jax.ShapeDtypeStruct((2, C2), jnp.float32)

    # pass 1: bn1 batch statistics.
    stats1 = pl.pallas_call(
        _stats1_kernel,
        out_shape=stats_shape,
        grid_spec=pltpu.PrefetchScalarGridSpec(
            num_scalar_prefetch=0, grid=(NT,),
            in_specs=[x_spec, w1_spec],
            out_specs=stats_spec,
            scratch_shapes=[xpad_scr]),
        compiler_params=cparams("arbitrary"),
    )(x, w1c)
    a1, c1 = scale_shift(stats1, g1, b1)

    # pass 2: bn2 batch statistics (bn1 output stays in VMEM).
    stats2 = pl.pallas_call(
        _stats2_kernel,
        out_shape=stats_shape,
        grid_spec=pltpu.PrefetchScalarGridSpec(
            num_scalar_prefetch=0, grid=(NT,),
            in_specs=[x_spec, w1_spec, w2_spec, vec_spec, vec_spec],
            out_specs=stats_spec,
            scratch_shapes=[xpad_scr, midpad_scr]),
        compiler_params=cparams("arbitrary"),
    )(x, w1c, w2c, a1, c1)
    a2, c2 = scale_shift(stats2, g2, b2)

    # pass 3: final normalized output (independent tiles -> parallel / megacore).
    out_flat = pl.pallas_call(
        _final_kernel,
        out_shape=jax.ShapeDtypeStruct((N * H * W, C2), jnp.float32),
        grid_spec=pltpu.PrefetchScalarGridSpec(
            num_scalar_prefetch=0, grid=(NT,),
            in_specs=[x_spec, w1_spec, w2_spec,
                      vec_spec, vec_spec, vec_spec, vec_spec],
            out_specs=out_spec,
            scratch_shapes=[xpad_scr, midpad_scr]),
        compiler_params=cparams("parallel"),
    )(x, w1c, w2c, a1, c1, a2, c2)

    return out_flat.reshape(N, H, W, C2)


# ---------------------- params / reference / main --------------------------------

def grouped_to_dense(w_oihw, groups):
    """(Cout, Cin/groups, 3, 3) grouped weight -> dense block-diagonal
    (3, 3, Cin, Cout) HWIO weight (exact; off-diagonal blocks are zero)."""
    Cout, cin_pg, kh, kw = w_oihw.shape
    cout_pg = Cout // groups
    cin_total = cin_pg * groups
    dense = jnp.zeros((kh, kw, cin_total, Cout), jnp.float32)
    for g in range(groups):
        blk = w_oihw[g * cout_pg:(g + 1) * cout_pg]        # (cout_pg, cin_pg, 3, 3)
        blk = jnp.transpose(blk, (2, 3, 1, 0))             # (3, 3, cin_pg, cout_pg)
        dense = dense.at[:, :,
                         g * cin_pg:(g + 1) * cin_pg,
                         g * cout_pg:(g + 1) * cout_pg].set(blk)
    return dense


def init_params(key, inplanes, planes, num_group):
    C2 = planes * 2
    k1, k2, k3, k4, k5, k6 = jax.random.split(key, 6)
    w1_oihw = 0.05 * jax.random.normal(k1, (C2, inplanes, 3, 3), jnp.float32)
    w2_oihw = 0.05 * jax.random.normal(k2, (C2, C2 // num_group, 3, 3), jnp.float32)
    g1 = 1.0 + 0.1 * jax.random.normal(k3, (C2,), jnp.float32)
    b1 = 0.1 * jax.random.normal(k4, (C2,), jnp.float32)
    g2 = 1.0 + 0.1 * jax.random.normal(k5, (C2,), jnp.float32)
    b2 = 0.1 * jax.random.normal(k6, (C2,), jnp.float32)
    return w1_oihw, w2_oihw, g1, b1, g2, b2


def ref_forward(x, w1_oihw, w2_oihw, g1, b1, g2, b2, num_group):
    """Pure-JAX NCHW reference mirroring the PyTorch BasicBlock forward."""
    def bn(t, g, b):
        mean = jnp.mean(t, axis=(0, 2, 3), keepdims=True)
        var = jnp.mean((t - mean) ** 2, axis=(0, 2, 3), keepdims=True)
        return ((t - mean) * jax.lax.rsqrt(var + EPS)
                * g.reshape(1, -1, 1, 1) + b.reshape(1, -1, 1, 1))

    dn = ('NCHW', 'OIHW', 'NCHW')
    out = jax.lax.conv_general_dilated(x, w1_oihw, (1, 1), ((1, 1), (1, 1)),
                                       dimension_numbers=dn)
    out = jax.nn.relu(bn(out, g1, b1))
    out = jax.lax.conv_general_dilated(out, w2_oihw, (1, 1), ((1, 1), (1, 1)),
                                       dimension_numbers=dn,
                                       feature_group_count=num_group)
    out = bn(out, g2, b2) + x
    return jax.nn.relu(out)


if __name__ == "__main__":
    # BasicBlock with downsample=None: stride=1, inplanes == planes*2.
    # planes=64 -> C2=128 matches ResNeXt layer1's non-downsampling blocks and
    # keeps the channel dim lane-dense (multiple of 128).
    N, H, W = 2, 8, 8
    planes, num_group = 64, 32
    inplanes = planes * 2          # 128

    key = jax.random.PRNGKey(0)
    kx, kp = jax.random.split(key)
    x_nchw = jax.random.normal(kx, (N, inplanes, H, W), jnp.float32)
    w1_oihw, w2_oihw, g1, b1, g2, b2 = init_params(kp, inplanes, planes, num_group)

    # im2col weight layouts for the kernels.
    C2 = planes * 2
    w1_col = jnp.transpose(w1_oihw, (2, 3, 1, 0)).reshape(9 * inplanes, C2)
    w2_col = grouped_to_dense(w2_oihw, num_group).reshape(9 * C2, C2)

    # Boundary layout glue only for comparing against the NCHW torch-style ref.
    x_nhwc = jnp.transpose(x_nchw, (0, 2, 3, 1))

    ref = jax.block_until_ready(
        ref_forward(x_nchw, w1_oihw, w2_oihw, g1, b1, g2, b2, num_group))

    # Exact path (f32 matmul inputs) -- tight tolerance.
    fwd_f32 = jax.jit(functools.partial(
        basic_block_forward_nhwc, compute_dtype=jnp.float32, batch_tile=1))
    out_f32 = jax.block_until_ready(fwd_f32(x_nhwc, w1_col, w2_col, g1, b1, g2, b2))
    out_f32 = jnp.transpose(out_f32, (0, 3, 1, 2))
    np.testing.assert_allclose(np.asarray(out_f32), np.asarray(ref),
                               rtol=1e-4, atol=1e-4)

    # Fast path (bf16 matmul inputs, f32 accumulation + f32 BN) -- bf16 tolerance.
    fwd_bf16 = jax.jit(functools.partial(
        basic_block_forward_nhwc, compute_dtype=jnp.bfloat16, batch_tile=1))
    out_bf16 = jax.block_until_ready(fwd_bf16(x_nhwc, w1_col, w2_col, g1, b1, g2, b2))
    out_bf16 = jnp.transpose(out_bf16, (0, 3, 1, 2))
    np.testing.assert_allclose(np.asarray(out_bf16), np.asarray(ref),
                               rtol=5e-2, atol=5e-2)

    print("KERNEL_OK")
</pallas_src>

<mosaic_0001>
module attributes {stable_mosaic.version = 11 : i64} {
  func.func @_stats1_kernel(%arg0: i32, %arg1: memref<1x8x8x128xf32, #tpu.memory_space<vmem>>, %arg2: memref<1152x128xf32, #tpu.memory_space<vmem>>, %arg3: memref<2x128xf32, #tpu.memory_space<vmem>>, %arg4: memref<1x10x10x128xf32, #tpu.memory_space<vmem>>) attributes {dimension_semantics = [#tpu.dimension_semantics<arbitrary>], iteration_bounds = array<i64: 2>, scalar_prefetch = 0 : i64, scratch_operands = 1 : i64, tpu.core_type = #tpu.core_type<tc>, window_params = [{transform_indices = @transform_0, window_bounds = array<i64: 1, 8, 8, 128>}, {pipeline_mode = #tpu.pipeline_mode<synchronous>, transform_indices = @transform_1, window_bounds = array<i64: 1152, 128>}, {pipeline_mode = #tpu.pipeline_mode<synchronous>, transform_indices = @transform_2, window_bounds = array<i64: 2, 128>}]} {
    %c0 = arith.constant 0 : index
    %c0_0 = arith.constant 0 : index
    %c0_1 = arith.constant 0 : index
    %c0_2 = arith.constant 0 : index
    %0 = vector.load %arg1[%c0, %c0_0, %c0_1, %c0_2] : memref<1x8x8x128xf32, #tpu.memory_space<vmem>>, vector<1x8x8x128xf32>
    %cst = arith.constant 0.000000e+00 : f32
    %1 = vector.broadcast %cst : f32 to vector<1x10x10x128xf32>
    %c0_3 = arith.constant 0 : index
    %c0_4 = arith.constant 0 : index
    %c0_5 = arith.constant 0 : index
    %c0_6 = arith.constant 0 : index
    %2 = vector.load %arg4[%c0_3, %c0_4, %c0_5, %c0_6] : memref<1x10x10x128xf32, #tpu.memory_space<vmem>>, vector<1x10x10x128xf32>
    tpu.vector_store %arg4[%c0_3, %c0_4, %c0_5, %c0_6], %1 {strides = array<i32>} : memref<1x10x10x128xf32, #tpu.memory_space<vmem>>, vector<1x10x10x128xf32>,
    %c0_7 = arith.constant 0 : index
    %c1 = arith.constant 1 : index
    %c1_8 = arith.constant 1 : index
    %c0_9 = arith.constant 0 : index
    %3 = vector.load %arg4[%c0_7, %c1, %c1_8, %c0_9] : memref<1x10x10x128xf32, #tpu.memory_space<vmem>>, vector<1x8x8x128xf32>
    tpu.vector_store %arg4[%c0_7, %c1, %c1_8, %c0_9], %0 {strides = array<i32>} : memref<1x10x10x128xf32, #tpu.memory_space<vmem>>, vector<1x8x8x128xf32>,
    %c0_10 = arith.constant 0 : index
    %c0_11 = arith.constant 0 : index
    %c0_12 = arith.constant 0 : index
    %c0_13 = arith.constant 0 : index
    %4 = vector.load %arg4[%c0_10, %c0_11, %c0_12, %c0_13] : memref<1x10x10x128xf32, #tpu.memory_space<vmem>>, vector<1x10x10x128xf32>
    %5 = vector.extract_strided_slice %4 {offsets = [0, 0, 0, 0], sizes = [1, 8, 8, 128], strides = [1, 1, 1, 1]} : vector<1x10x10x128xf32> to vector<1x8x8x128xf32>
    %6 = vector.shape_cast %5 : vector<1x8x8x128xf32> to vector<64x128xf32>
    %7 = vector.extract_strided_slice %4 {offsets = [0, 0, 1, 0], sizes = [1, 8, 8, 128], strides = [1, 1, 1, 1]} : vector<1x10x10x128xf32> to vector<1x8x8x128xf32>
    %8 = vector.shape_cast %7 : vector<1x8x8x128xf32> to vector<64x128xf32>
    %9 = vector.extract_strided_slice %4 {offsets = [0, 0, 2, 0], sizes = [1, 8, 8, 128], strides = [1, 1, 1, 1]} : vector<1x10x10x128xf32> to vector<1x8x8x128xf32>
    %10 = vector.shape_cast %9 : vector<1x8x8x128xf32> to vector<64x128xf32>
    %11 = vector.extract_strided_slice %4 {offsets = [0, 1, 0, 0], sizes = [1, 8, 8, 128], strides = [1, 1, 1, 1]} : vector<1x10x10x128xf32> to vector<1x8x8x128xf32>
    %12 = vector.shape_cast %11 : vector<1x8x8x128xf32> to vector<64x128xf32>
    %13 = vector.extract_strided_slice %4 {offsets = [0, 1, 1, 0], sizes = [1, 8, 8, 128], strides = [1, 1, 1, 1]} : vector<1x10x10x128xf32> to vector<1x8x8x128xf32>
    %14 = vector.shape_cast %13 : vector<1x8x8x128xf32> to vector<64x128xf32>
    %15 = vector.extract_strided_slice %4 {offsets = [0, 1, 2, 0], sizes = [1, 8, 8, 128], strides = [1, 1, 1, 1]} : vector<1x10x10x128xf32> to vector<1x8x8x128xf32>
    %16 = vector.shape_cast %15 : vector<1x8x8x128xf32> to vector<64x128xf32>
    %17 = vector.extract_strided_slice %4 {offsets = [0, 2, 0, 0], sizes = [1, 8, 8, 128], strides = [1, 1, 1, 1]} : vector<1x10x10x128xf32> to vector<1x8x8x128xf32>
    %18 = vector.shape_cast %17 : vector<1x8x8x128xf32> to vector<64x128xf32>
    %19 = vector.extract_strided_slice %4 {offsets = [0, 2, 1, 0], sizes = [1, 8, 8, 128], strides = [1, 1, 1, 1]} : vector<1x10x10x128xf32> to vector<1x8x8x128xf32>
    %20 = vector.shape_cast %19 : vector<1x8x8x128xf32> to vector<64x128xf32>
    %21 = vector.extract_strided_slice %4 {offsets = [0, 2, 2, 0], sizes = [1, 8, 8, 128], strides = [1, 1, 1, 1]} : vector<1x10x10x128xf32> to vector<1x8x8x128xf32>
    %22 = vector.shape_cast %21 : vector<1x8x8x128xf32> to vector<64x128xf32>
    %23 = tpu.concatenate %6, %8, %10, %12, %14, %16, %18, %20, %22 in 1 : vector<64x128xf32>, vector<64x128xf32>, vector<64x128xf32>, vector<64x128xf32>, vector<64x128xf32>, vector<64x128xf32>, vector<64x128xf32>, vector<64x128xf32>, vector<64x128xf32> -> vector<64x1152xf32>
    %c0_14 = arith.constant 0 : index
    %c0_15 = arith.constant 0 : index
    %24 = vector.load %arg2[%c0_14, %c0_15] : memref<1152x128xf32, #tpu.memory_space<vmem>>, vector<1152x128xf32>
    %cst_16 = arith.constant dense<0.000000e+00> : vector<64x128xf32>
    %25 = tpu.matmul %23, %24, %cst_16 {dimension_numbers = #tpu.dot_dimension_numbers<[1], [0], [0], [1], [0, 0, 1, 1], [], []>} : vector<64x1152xf32>, vector<1152x128xf32>, vector<64x128xf32> -> vector<64x128xf32>
    %cst_17 = arith.constant dense<0.000000e+00> : vector<128xf32>
    %26 = vector.multi_reduction <add>, %25, %cst_17 [0] : vector<64x128xf32> to vector<128xf32>
    %27 = vector.shape_cast %26 : vector<128xf32> to vector<1x128xf32>
    %28 = arith.mulf %25, %25 : vector<64x128xf32>
    %cst_18 = arith.constant dense<0.000000e+00> : vector<128xf32>
    %29 = vector.multi_reduction <add>, %28, %cst_18 [0] : vector<64x128xf32> to vector<128xf32>
    %30 = vector.shape_cast %29 : vector<128xf32> to vector<1x128xf32>
    %31 = tpu.concatenate %27, %30 in 0 : vector<1x128xf32>, vector<1x128xf32> -> vector<2x128xf32>
    %c0_i32 = arith.constant 0 : i32
    %32 = arith.cmpi eq, %arg0, %c0_i32 : i32
    %33 = arith.extui %32 : i1 to i32
    %c0_i32_19 = arith.constant 0 : i32
    %34 = arith.cmpi ne, %33, %c0_i32_19 : i32
    scf.if %34 {
      %cst_24 = arith.constant 0.000000e+00 : f32
      %38 = vector.broadcast %cst_24 : f32 to vector<2x128xf32>
      %c0_25 = arith.constant 0 : index
      %c0_26 = arith.constant 0 : index
      %39 = vector.load %arg3[%c0_25, %c0_26] : memref<2x128xf32, #tpu.memory_space<vmem>>, vector<2x128xf32>
      tpu.vector_store %arg3[%c0_25, %c0_26], %38 {strides = array<i32>} : memref<2x128xf32, #tpu.memory_space<vmem>>, vector<2x128xf32>,
    } else {
    }
    %c0_20 = arith.constant 0 : index
    %c0_21 = arith.constant 0 : index
    %35 = vector.load %arg3[%c0_20, %c0_21] : memref<2x128xf32, #tpu.memory_space<vmem>>, vector<2x128xf32>
    %36 = arith.addf %35, %31 : vector<2x128xf32>
    %c0_22 = arith.constant 0 : index
    %c0_23 = arith.constant 0 : index
    %37 = vector.load %arg3[%c0_22, %c0_23] : memref<2x128xf32, #tpu.memory_space<vmem>>, vector<2x128xf32>
    tpu.vector_store %arg3[%c0_22, %c0_23], %36 {strides = array<i32>} : memref<2x128xf32, #tpu.memory_space<vmem>>, vector<2x128xf32>,
    return
  }
  func.func @transform_0(%arg0: i32) -> (i32, i32, i32, i32) {
    %c0_i32 = arith.constant 0 : i32
    %c0_i32_0 = arith.constant 0 : i32
    %c0_i32_1 = arith.constant 0 : i32
    %c0_i32_2 = arith.constant 0 : i32
    return %arg0, %c0_i32, %c0_i32_0, %c0_i32_1 : i32, i32, i32, i32
  }
  func.func @transform_1(%arg0: i32) -> (i32, i32) {
    %c0_i32 = arith.constant 0 : i32
    %c0_i32_0 = arith.constant 0 : i32
    %c0_i32_1 = arith.constant 0 : i32
    return %c0_i32, %c0_i32_0 : i32, i32
  }
  func.func @transform_2(%arg0: i32) -> (i32, i32) {
    %c0_i32 = arith.constant 0 : i32
    %c0_i32_0 = arith.constant 0 : i32
    %c0_i32_1 = arith.constant 0 : i32
    return %c0_i32, %c0_i32_0 : i32, i32
  }
}

module attributes {stable_mosaic.version = 11 : i64} {
  func.func @_final_kernel(%arg0: i32, %arg1: memref<1x8x8x128xf32, #tpu.memory_space<vmem>>, %arg2: memref<1152x128xf32, #tpu.memory_space<vmem>>, %arg3: memref<1152x128xf32, #tpu.memory_space<vmem>>, %arg4: memref<1x128xf32, #tpu.memory_space<vmem>>, %arg5: memref<1x128xf32, #tpu.memory_space<vmem>>, %arg6: memref<1x128xf32, #tpu.memory_space<vmem>>, %arg7: memref<1x128xf32, #tpu.memory_space<vmem>>, %arg8: memref<64x128xf32, #tpu.memory_space<vmem>>, %arg9: memref<1x10x10x128xf32, #tpu.memory_space<vmem>>, %arg10: memref<1x10x10x128xf32, #tpu.memory_space<vmem>>) attributes {dimension_semantics = [#tpu.dimension_semantics<parallel>], iteration_bounds = array<i64: 2>, scalar_prefetch = 0 : i64, scratch_operands = 2 : i64, tpu.core_type = #tpu.core_type<tc>, window_params = [{transform_indices = @transform_0, window_bounds = array<i64: 1, 8, 8, 128>}, {pipeline_mode = #tpu.pipeline_mode<synchronous>, transform_indices = @transform_1, window_bounds = array<i64: 1152, 128>}, {pipeline_mode = #tpu.pipeline_mode<synchronous>, transform_indices = @transform_2, window_bounds = array<i64: 1152, 128>}, {pipeline_mode = #tpu.pipeline_mode<synchronous>, transform_indices = @transform_3, window_bounds = array<i64: 1, 128>}, {pipeline_mode = #tpu.pipeline_mode<synchronous>, transform_indices = @transform_4, window_bounds = array<i64: 1, 128>}, {pipeline_mode = #tpu.pipeline_mode<synchronous>, transform_indices = @transform_5, window_bounds = array<i64: 1, 128>}, {pipeline_mode = #tpu.pipeline_mode<synchronous>, transform_indices = @transform_6, window_bounds = array<i64: 1, 128>}, {transform_indices = @transform_7, window_bounds = array<i64: 64, 128>}]} {
    %c0 = arith.constant 0 : index
    %c0_0 = arith.constant 0 : index
    %c0_1 = arith.constant 0 : index
    %c0_2 = arith.constant 0 : index
    %0 = vector.load %arg1[%c0, %c0_0, %c0_1, %c0_2] : memref<1x8x8x128xf32, #tpu.memory_space<vmem>>, vector<1x8x8x128xf32>
    %cst = arith.constant 0.000000e+00 : f32
    %1 = vector.broadcast %cst : f32 to vector<1x10x10x128xf32>
    %c0_3 = arith.constant 0 : index
    %c0_4 = arith.constant 0 : index
    %c0_5 = arith.constant 0 : index
    %c0_6 = arith.constant 0 : index
    %2 = vector.load %arg9[%c0_3, %c0_4, %c0_5, %c0_6] : memref<1x10x10x128xf32, #tpu.memory_space<vmem>>, vector<1x10x10x128xf32>
    tpu.vector_store %arg9[%c0_3, %c0_4, %c0_5, %c0_6], %1 {strides = array<i32>} : memref<1x10x10x128xf32, #tpu.memory_space<vmem>>, vector<1x10x10x128xf32>,
    %c0_7 = arith.constant 0 : index
    %c1 = arith.constant 1 : index
    %c1_8 = arith.constant 1 : index
    %c0_9 = arith.constant 0 : index
    %3 = vector.load %arg9[%c0_7, %c1, %c1_8, %c0_9] : memref<1x10x10x128xf32, #tpu.memory_space<vmem>>, vector<1x8x8x128xf32>
    tpu.vector_store %arg9[%c0_7, %c1, %c1_8, %c0_9], %0 {strides = array<i32>} : memref<1x10x10x128xf32, #tpu.memory_space<vmem>>, vector<1x8x8x128xf32>,
    %c0_10 = arith.constant 0 : index
    %c0_11 = arith.constant 0 : index
    %c0_12 = arith.constant 0 : index
    %c0_13 = arith.constant 0 : index
    %4 = vector.load %arg9[%c0_10, %c0_11, %c0_12, %c0_13] : memref<1x10x10x128xf32, #tpu.memory_space<vmem>>, vector<1x10x10x128xf32>
    %5 = vector.extract_strided_slice %4 {offsets = [0, 0, 0, 0], sizes = [1, 8, 8, 128], strides = [1, 1, 1, 1]} : vector<1x10x10x128xf32> to vector<1x8x8x128xf32>
    %6 = vector.shape_cast %5 : vector<1x8x8x128xf32> to vector<64x128xf32>
    %7 = vector.extract_strided_slice %4 {offsets = [0, 0, 1, 0], sizes = [1, 8, 8, 128], strides = [1, 1, 1, 1]} : vector<1x10x10x128xf32> to vector<1x8x8x128xf32>
    %8 = vector.shape_cast %7 : vector<1x8x8x128xf32> to vector<64x128xf32>
    %9 = vector.extract_strided_slice %4 {offsets = [0, 0, 2, 0], sizes = [1, 8, 8, 128], strides = [1, 1, 1, 1]} : vector<1x10x10x128xf32> to vector<1x8x8x128xf32>
    %10 = vector.shape_cast %9 : vector<1x8x8x128xf32> to vector<64x128xf32>
    %11 = vector.extract_strided_slice %4 {offsets = [0, 1, 0, 0], sizes = [1, 8, 8, 128], strides = [1, 1, 1, 1]} : vector<1x10x10x128xf32> to vector<1x8x8x128xf32>
    %12 = vector.shape_cast %11 : vector<1x8x8x128xf32> to vector<64x128xf32>
    %13 = vector.extract_strided_slice %4 {offsets = [0, 1, 1, 0], sizes = [1, 8, 8, 128], strides = [1, 1, 1, 1]} : vector<1x10x10x128xf32> to vector<1x8x8x128xf32>
    %14 = vector.shape_cast %13 : vector<1x8x8x128xf32> to vector<64x128xf32>
    %15 = vector.extract_strided_slice %4 {offsets = [0, 1, 2, 0], sizes = [1, 8, 8, 128], strides = [1, 1, 1, 1]} : vector<1x10x10x128xf32> to vector<1x8x8x128xf32>
    %16 = vector.shape_cast %15 : vector<1x8x8x128xf32> to vector<64x128xf32>
    %17 = vector.extract_strided_slice %4 {offsets = [0, 2, 0, 0], sizes = [1, 8, 8, 128], strides = [1, 1, 1, 1]} : vector<1x10x10x128xf32> to vector<1x8x8x128xf32>
    %18 = vector.shape_cast %17 : vector<1x8x8x128xf32> to vector<64x128xf32>
    %19 = vector.extract_strided_slice %4 {offsets = [0, 2, 1, 0], sizes = [1, 8, 8, 128], strides = [1, 1, 1, 1]} : vector<1x10x10x128xf32> to vector<1x8x8x128xf32>
    %20 = vector.shape_cast %19 : vector<1x8x8x128xf32> to vector<64x128xf32>
    %21 = vector.extract_strided_slice %4 {offsets = [0, 2, 2, 0], sizes = [1, 8, 8, 128], strides = [1, 1, 1, 1]} : vector<1x10x10x128xf32> to vector<1x8x8x128xf32>
    %22 = vector.shape_cast %21 : vector<1x8x8x128xf32> to vector<64x128xf32>
    %23 = tpu.concatenate %6, %8, %10, %12, %14, %16, %18, %20, %22 in 1 : vector<64x128xf32>, vector<64x128xf32>, vector<64x128xf32>, vector<64x128xf32>, vector<64x128xf32>, vector<64x128xf32>, vector<64x128xf32>, vector<64x128xf32>, vector<64x128xf32> -> vector<64x1152xf32>
    %c0_14 = arith.constant 0 : index
    %c0_15 = arith.constant 0 : index
    %24 = vector.load %arg2[%c0_14, %c0_15] : memref<1152x128xf32, #tpu.memory_space<vmem>>, vector<1152x128xf32>
    %cst_16 = arith.constant dense<0.000000e+00> : vector<64x128xf32>
    %25 = tpu.matmul %23, %24, %cst_16 {dimension_numbers = #tpu.dot_dimension_numbers<[1], [0], [0], [1], [0, 0, 1, 1], [], []>} : vector<64x1152xf32>, vector<1152x128xf32>, vector<64x128xf32> -> vector<64x128xf32>
    %c0_17 = arith.constant 0 : index
    %c0_18 = arith.constant 0 : index
    %26 = vector.load %arg4[%c0_17, %c0_18] : memref<1x128xf32, #tpu.memory_space<vmem>>, vector<1x128xf32>
    %27 = vector.broadcast %26 : vector<1x128xf32> to vector<64x128xf32>
    %28 = arith.mulf %25, %27 : vector<64x128xf32>
    %c0_19 = arith.constant 0 : index
    %c0_20 = arith.constant 0 : index
    %29 = vector.load %arg5[%c0_19, %c0_20] : memref<1x128xf32, #tpu.memory_space<vmem>>, vector<1x128xf32>
    %30 = vector.broadcast %29 : vector<1x128xf32> to vector<64x128xf32>
    %31 = arith.addf %28, %30 : vector<64x128xf32>
    %cst_21 = arith.constant 0.000000e+00 : f32
    %32 = vector.broadcast %cst_21 : f32 to vector<64x128xf32>
    %33 = arith.maximumf %31, %32 : vector<64x128xf32>
    %34 = vector.shape_cast %33 : vector<64x128xf32> to vector<1x8x8x128xf32>
    %cst_22 = arith.constant 0.000000e+00 : f32
    %35 = vector.broadcast %cst_22 : f32 to vector<1x10x10x128xf32>
    %c0_23 = arith.constant 0 : index
    %c0_24 = arith.constant 0 : index
    %c0_25 = arith.constant 0 : index
    %c0_26 = arith.constant 0 : index
    %36 = vector.load %arg10[%c0_23, %c0_24, %c0_25, %c0_26] : memref<1x10x10x128xf32, #tpu.memory_space<vmem>>, vector<1x10x10x128xf32>
    tpu.vector_store %arg10[%c0_23, %c0_24, %c0_25, %c0_26], %35 {strides = array<i32>} : memref<1x10x10x128xf32, #tpu.memory_space<vmem>>, vector<1x10x10x128xf32>,
    %c0_27 = arith.constant 0 : index
    %c1_28 = arith.constant 1 : index
    %c1_29 = arith.constant 1 : index
    %c0_30 = arith.constant 0 : index
    %37 = vector.load %arg10[%c0_27, %c1_28, %c1_29, %c0_30] : memref<1x10x10x128xf32, #tpu.memory_space<vmem>>, vector<1x8x8x128xf32>
    tpu.vector_store %arg10[%c0_27, %c1_28, %c1_29, %c0_30], %34 {strides = array<i32>} : memref<1x10x10x128xf32, #tpu.memory_space<vmem>>, vector<1x8x8x128xf32>,
    %c0_31 = arith.constant 0 : index
    %c0_32 = arith.constant 0 : index
    %c0_33 = arith.constant 0 : index
    %c0_34 = arith.constant 0 : index
    %38 = vector.load %arg10[%c0_31, %c0_32, %c0_33, %c0_34] : memref<1x10x10x128xf32, #tpu.memory_space<vmem>>, vector<1x10x10x128xf32>
    %39 = vector.extract_strided_slice %38 {offsets = [0, 0, 0, 0], sizes = [1, 8, 8, 128], strides = [1, 1, 1, 1]} : vector<1x10x10x128xf32> to vector<1x8x8x128xf32>
    %40 = vector.shape_cast %39 : vector<1x8x8x128xf32> to vector<64x128xf32>
    %41 = vector.extract_strided_slice %38 {offsets = [0, 0, 1, 0], sizes = [1, 8, 8, 128], strides = [1, 1, 1, 1]} : vector<1x10x10x128xf32> to vector<1x8x8x128xf32>
    %42 = vector.shape_cast %41 : vector<1x8x8x128xf32> to vector<64x128xf32>
    %43 = vector.extract_strided_slice %38 {offsets = [0, 0, 2, 0], sizes = [1, 8, 8, 128], strides = [1, 1, 1, 1]} : vector<1x10x10x128xf32> to vector<1x8x8x128xf32>
    %44 = vector.shape_cast %43 : vector<1x8x8x128xf32> to vector<64x128xf32>
    %45 = vector.extract_strided_slice %38 {offsets = [0, 1, 0, 0], sizes = [1, 8, 8, 128], strides = [1, 1, 1, 1]} : vector<1x10x10x128xf32> to vector<1x8x8x128xf32>
    %46 = vector.shape_cast %45 : vector<1x8x8x128xf32> to vector<64x128xf32>
    %47 = vector.extract_strided_slice %38 {offsets = [0, 1, 1, 0], sizes = [1, 8, 8, 128], strides = [1, 1, 1, 1]} : vector<1x10x10x128xf32> to vector<1x8x8x128xf32>
    %48 = vector.shape_cast %47 : vector<1x8x8x128xf32> to vector<64x128xf32>
    %49 = vector.extract_strided_slice %38 {offsets = [0, 1, 2, 0], sizes = [1, 8, 8, 128], strides = [1, 1, 1, 1]} : vector<1x10x10x128xf32> to vector<1x8x8x128xf32>
    %50 = vector.shape_cast %49 : vector<1x8x8x128xf32> to vector<64x128xf32>
    %51 = vector.extract_strided_slice %38 {offsets = [0, 2, 0, 0], sizes = [1, 8, 8, 128], strides = [1, 1, 1, 1]} : vector<1x10x10x128xf32> to vector<1x8x8x128xf32>
    %52 = vector.shape_cast %51 : vector<1x8x8x128xf32> to vector<64x128xf32>
    %53 = vector.extract_strided_slice %38 {offsets = [0, 2, 1, 0], sizes = [1, 8, 8, 128], strides = [1, 1, 1, 1]} : vector<1x10x10x128xf32> to vector<1x8x8x128xf32>
    %54 = vector.shape_cast %53 : vector<1x8x8x128xf32> to vector<64x128xf32>
    %55 = vector.extract_strided_slice %38 {offsets = [0, 2, 2, 0], sizes = [1, 8, 8, 128], strides = [1, 1, 1, 1]} : vector<1x10x10x128xf32> to vector<1x8x8x128xf32>
    %56 = vector.shape_cast %55 : vector<1x8x8x128xf32> to vector<64x128xf32>
    %57 = tpu.concatenate %40, %42, %44, %46, %48, %50, %52, %54, %56 in 1 : vector<64x128xf32>, vector<64x128xf32>, vector<64x128xf32>, vector<64x128xf32>, vector<64x128xf32>, vector<64x128xf32>, vector<64x128xf32>, vector<64x128xf32>, vector<64x128xf32> -> vector<64x1152xf32>
    %c0_35 = arith.constant 0 : index
    %c0_36 = arith.constant 0 : index
    %58 = vector.load %arg3[%c0_35, %c0_36] : memref<1152x128xf32, #tpu.memory_space<vmem>>, vector<1152x128xf32>
    %cst_37 = arith.constant dense<0.000000e+00> : vector<64x128xf32>
    %59 = tpu.matmul %57, %58, %cst_37 {dimension_numbers = #tpu.dot_dimension_numbers<[1], [0], [0], [1], [0, 0, 1, 1], [], []>} : vector<64x1152xf32>, vector<1152x128xf32>, vector<64x128xf32> -> vector<64x128xf32>
    %c0_38 = arith.constant 0 : index
    %c0_39 = arith.constant 0 : index
    %60 = vector.load %arg6[%c0_38, %c0_39] : memref<1x128xf32, #tpu.memory_space<vmem>>, vector<1x128xf32>
    %61 = vector.broadcast %60 : vector<1x128xf32> to vector<64x128xf32>
    %62 = arith.mulf %59, %61 : vector<64x128xf32>
    %c0_40 = arith.constant 0 : index
    %c0_41 = arith.constant 0 : index
    %63 = vector.load %arg7[%c0_40, %c0_41] : memref<1x128xf32, #tpu.memory_space<vmem>>, vector<1x128xf32>
    %64 = vector.broadcast %63 : vector<1x128xf32> to vector<64x128xf32>
    %65 = arith.addf %62, %64 : vector<64x128xf32>
    %66 = vector.shape_cast %0 : vector<1x8x8x128xf32> to vector<64x128xf32>
    %67 = arith.addf %65, %66 : vector<64x128xf32>
    %cst_42 = arith.constant 0.000000e+00 : f32
    %68 = vector.broadcast %cst_42 : f32 to vector<64x128xf32>
    %69 = arith.maximumf %67, %68 : vector<64x128xf32>
    %c0_43 = arith.constant 0 : index
    %c0_44 = arith.constant 0 : index
    %70 = vector.load %arg8[%c0_43, %c0_44] : memref<64x128xf32, #tpu.memory_space<vmem>>, vector<64x128xf32>
    tpu.vector_store %arg8[%c0_43, %c0_44], %69 {strides = array<i32>} : memref<64x128xf32, #tpu.memory_space<vmem>>, vector<64x128xf32>,
    return
  }
  func.func @transform_0(%arg0: i32) -> (i32, i32, i32, i32) {
    %c0_i32 = arith.constant 0 : i32
    %c0_i32_0 = arith.constant 0 : i32
    %c0_i32_1 = arith.constant 0 : i32
    %c0_i32_2 = arith.constant 0 : i32
    return %arg0, %c0_i32, %c0_i32_0, %c0_i32_1 : i32, i32, i32, i32
  }
  func.func @transform_1(%arg0: i32) -> (i32, i32) {
    %c0_i32 = arith.constant 0 : i32
    %c0_i32_0 = arith.constant 0 : i32
    %c0_i32_1 = arith.constant 0 : i32
    return %c0_i32, %c0_i32_0 : i32, i32
  }
  func.func @transform_2(%arg0: i32) -> (i32, i32) {
    %c0_i32 = arith.constant 0 : i32
    %c0_i32_0 = arith.constant 0 : i32
    %c0_i32_1 = arith.constant 0 : i32
    return %c0_i32, %c0_i32_0 : i32, i32
  }
  func.func @transform_3(%arg0: i32) -> (i32, i32) {
    %c0_i32 = arith.constant 0 : i32
    %c0_i32_0 = arith.constant 0 : i32
    %c0_i32_1 = arith.constant 0 : i32
    return %c0_i32, %c0_i32_0 : i32, i32
  }
  func.func @transform_4(%arg0: i32) -> (i32, i32) {
    %c0_i32 = arith.constant 0 : i32
    %c0_i32_0 = arith.constant 0 : i32
    %c0_i32_1 = arith.constant 0 : i32
    return %c0_i32, %c0_i32_0 : i32, i32
  }
  func.func @transform_5(%arg0: i32) -> (i32, i32) {
    %c0_i32 = arith.constant 0 : i32
    %c0_i32_0 = arith.constant 0 : i32
    %c0_i32_1 = arith.constant 0 : i32
    return %c0_i32, %c0_i32_0 : i32, i32
  }
  func.func @transform_6(%arg0: i32) -> (i32, i32) {
    %c0_i32 = arith.constant 0 : i32
    %c0_i32_0 = arith.constant 0 : i32
    %c0_i32_1 = arith.constant 0 : i32
    return %c0_i32, %c0_i32_0 : i32, i32
  }
  func.func @transform_7(%arg0: i32) -> (i32, i32) {
    %c0_i32 = arith.constant 0 : i32
    %c0_i32_0 = arith.constant 0 : i32
    return %arg0, %c0_i32 : i32, i32
  }
}

module attributes {stable_mosaic.version = 11 : i64} {
  func.func @_stats2_kernel(%arg0: i32, %arg1: memref<1x8x8x128xf32, #tpu.memory_space<vmem>>, %arg2: memref<1152x128xf32, #tpu.memory_space<vmem>>, %arg3: memref<1152x128xf32, #tpu.memory_space<vmem>>, %arg4: memref<1x128xf32, #tpu.memory_space<vmem>>, %arg5: memref<1x128xf32, #tpu.memory_space<vmem>>, %arg6: memref<2x128xf32, #tpu.memory_space<vmem>>, %arg7: memref<1x10x10x128xf32, #tpu.memory_space<vmem>>, %arg8: memref<1x10x10x128xf32, #tpu.memory_space<vmem>>) attributes {dimension_semantics = [#tpu.dimension_semantics<arbitrary>], iteration_bounds = array<i64: 2>, scalar_prefetch = 0 : i64, scratch_operands = 2 : i64, tpu.core_type = #tpu.core_type<tc>, window_params = [{transform_indices = @transform_0, window_bounds = array<i64: 1, 8, 8, 128>}, {pipeline_mode = #tpu.pipeline_mode<synchronous>, transform_indices = @transform_1, window_bounds = array<i64: 1152, 128>}, {pipeline_mode = #tpu.pipeline_mode<synchronous>, transform_indices = @transform_2, window_bounds = array<i64: 1152, 128>}, {pipeline_mode = #tpu.pipeline_mode<synchronous>, transform_indices = @transform_3, window_bounds = array<i64: 1, 128>}, {pipeline_mode = #tpu.pipeline_mode<synchronous>, transform_indices = @transform_4, window_bounds = array<i64: 1, 128>}, {pipeline_mode = #tpu.pipeline_mode<synchronous>, transform_indices = @transform_5, window_bounds = array<i64: 2, 128>}]} {
    %c0 = arith.constant 0 : index
    %c0_0 = arith.constant 0 : index
    %c0_1 = arith.constant 0 : index
    %c0_2 = arith.constant 0 : index
    %0 = vector.load %arg1[%c0, %c0_0, %c0_1, %c0_2] : memref<1x8x8x128xf32, #tpu.memory_space<vmem>>, vector<1x8x8x128xf32>
    %cst = arith.constant 0.000000e+00 : f32
    %1 = vector.broadcast %cst : f32 to vector<1x10x10x128xf32>
    %c0_3 = arith.constant 0 : index
    %c0_4 = arith.constant 0 : index
    %c0_5 = arith.constant 0 : index
    %c0_6 = arith.constant 0 : index
    %2 = vector.load %arg7[%c0_3, %c0_4, %c0_5, %c0_6] : memref<1x10x10x128xf32, #tpu.memory_space<vmem>>, vector<1x10x10x128xf32>
    tpu.vector_store %arg7[%c0_3, %c0_4, %c0_5, %c0_6], %1 {strides = array<i32>} : memref<1x10x10x128xf32, #tpu.memory_space<vmem>>, vector<1x10x10x128xf32>,
    %c0_7 = arith.constant 0 : index
    %c1 = arith.constant 1 : index
    %c1_8 = arith.constant 1 : index
    %c0_9 = arith.constant 0 : index
    %3 = vector.load %arg7[%c0_7, %c1, %c1_8, %c0_9] : memref<1x10x10x128xf32, #tpu.memory_space<vmem>>, vector<1x8x8x128xf32>
    tpu.vector_store %arg7[%c0_7, %c1, %c1_8, %c0_9], %0 {strides = array<i32>} : memref<1x10x10x128xf32, #tpu.memory_space<vmem>>, vector<1x8x8x128xf32>,
    %c0_10 = arith.constant 0 : index
    %c0_11 = arith.constant 0 : index
    %c0_12 = arith.constant 0 : index
    %c0_13 = arith.constant 0 : index
    %4 = vector.load %arg7[%c0_10, %c0_11, %c0_12, %c0_13] : memref<1x10x10x128xf32, #tpu.memory_space<vmem>>, vector<1x10x10x128xf32>
    %5 = vector.extract_strided_slice %4 {offsets = [0, 0, 0, 0], sizes = [1, 8, 8, 128], strides = [1, 1, 1, 1]} : vector<1x10x10x128xf32> to vector<1x8x8x128xf32>
    %6 = vector.shape_cast %5 : vector<1x8x8x128xf32> to vector<64x128xf32>
    %7 = vector.extract_strided_slice %4 {offsets = [0, 0, 1, 0], sizes = [1, 8, 8, 128], strides = [1, 1, 1, 1]} : vector<1x10x10x128xf32> to vector<1x8x8x128xf32>
    %8 = vector.shape_cast %7 : vector<1x8x8x128xf32> to vector<64x128xf32>
    %9 = vector.extract_strided_slice %4 {offsets = [0, 0, 2, 0], sizes = [1, 8, 8, 128], strides = [1, 1, 1, 1]} : vector<1x10x10x128xf32> to vector<1x8x8x128xf32>
    %10 = vector.shape_cast %9 : vector<1x8x8x128xf32> to vector<64x128xf32>
    %11 = vector.extract_strided_slice %4 {offsets = [0, 1, 0, 0], sizes = [1, 8, 8, 128], strides = [1, 1, 1, 1]} : vector<1x10x10x128xf32> to vector<1x8x8x128xf32>
    %12 = vector.shape_cast %11 : vector<1x8x8x128xf32> to vector<64x128xf32>
    %13 = vector.extract_strided_slice %4 {offsets = [0, 1, 1, 0], sizes = [1, 8, 8, 128], strides = [1, 1, 1, 1]} : vector<1x10x10x128xf32> to vector<1x8x8x128xf32>
    %14 = vector.shape_cast %13 : vector<1x8x8x128xf32> to vector<64x128xf32>
    %15 = vector.extract_strided_slice %4 {offsets = [0, 1, 2, 0], sizes = [1, 8, 8, 128], strides = [1, 1, 1, 1]} : vector<1x10x10x128xf32> to vector<1x8x8x128xf32>
    %16 = vector.shape_cast %15 : vector<1x8x8x128xf32> to vector<64x128xf32>
    %17 = vector.extract_strided_slice %4 {offsets = [0, 2, 0, 0], sizes = [1, 8, 8, 128], strides = [1, 1, 1, 1]} : vector<1x10x10x128xf32> to vector<1x8x8x128xf32>
    %18 = vector.shape_cast %17 : vector<1x8x8x128xf32> to vector<64x128xf32>
    %19 = vector.extract_strided_slice %4 {offsets = [0, 2, 1, 0], sizes = [1, 8, 8, 128], strides = [1, 1, 1, 1]} : vector<1x10x10x128xf32> to vector<1x8x8x128xf32>
    %20 = vector.shape_cast %19 : vector<1x8x8x128xf32> to vector<64x128xf32>
    %21 = vector.extract_strided_slice %4 {offsets = [0, 2, 2, 0], sizes = [1, 8, 8, 128], strides = [1, 1, 1, 1]} : vector<1x10x10x128xf32> to vector<1x8x8x128xf32>
    %22 = vector.shape_cast %21 : vector<1x8x8x128xf32> to vector<64x128xf32>
    %23 = tpu.concatenate %6, %8, %10, %12, %14, %16, %18, %20, %22 in 1 : vector<64x128xf32>, vector<64x128xf32>, vector<64x128xf32>, vector<64x128xf32>, vector<64x128xf32>, vector<64x128xf32>, vector<64x128xf32>, vector<64x128xf32>, vector<64x128xf32> -> vector<64x1152xf32>
    %c0_14 = arith.constant 0 : index
    %c0_15 = arith.constant 0 : index
    %24 = vector.load %arg2[%c0_14, %c0_15] : memref<1152x128xf32, #tpu.memory_space<vmem>>, vector<1152x128xf32>
    %cst_16 = arith.constant dense<0.000000e+00> : vector<64x128xf32>
    %25 = tpu.matmul %23, %24, %cst_16 {dimension_numbers = #tpu.dot_dimension_numbers<[1], [0], [0], [1], [0, 0, 1, 1], [], []>} : vector<64x1152xf32>, vector<1152x128xf32>, vector<64x128xf32> -> vector<64x128xf32>
    %c0_17 = arith.constant 0 : index
    %c0_18 = arith.constant 0 : index
    %26 = vector.load %arg4[%c0_17, %c0_18] : memref<1x128xf32, #tpu.memory_space<vmem>>, vector<1x128xf32>
    %27 = vector.broadcast %26 : vector<1x128xf32> to vector<64x128xf32>
    %28 = arith.mulf %25, %27 : vector<64x128xf32>
    %c0_19 = arith.constant 0 : index
    %c0_20 = arith.constant 0 : index
    %29 = vector.load %arg5[%c0_19, %c0_20] : memref<1x128xf32, #tpu.memory_space<vmem>>, vector<1x128xf32>
    %30 = vector.broadcast %29 : vector<1x128xf32> to vector<64x128xf32>
    %31 = arith.addf %28, %30 : vector<64x128xf32>
    %cst_21 = arith.constant 0.000000e+00 : f32
    %32 = vector.broadcast %cst_21 : f32 to vector<64x128xf32>
    %33 = arith.maximumf %31, %32 : vector<64x128xf32>
    %34 = vector.shape_cast %33 : vector<64x128xf32> to vector<1x8x8x128xf32>
    %cst_22 = arith.constant 0.000000e+00 : f32
    %35 = vector.broadcast %cst_22 : f32 to vector<1x10x10x128xf32>
    %c0_23 = arith.constant 0 : index
    %c0_24 = arith.constant 0 : index
    %c0_25 = arith.constant 0 : index
    %c0_26 = arith.constant 0 : index
    %36 = vector.load %arg8[%c0_23, %c0_24, %c0_25, %c0_26] : memref<1x10x10x128xf32, #tpu.memory_space<vmem>>, vector<1x10x10x128xf32>
    tpu.vector_store %arg8[%c0_23, %c0_24, %c0_25, %c0_26], %35 {strides = array<i32>} : memref<1x10x10x128xf32, #tpu.memory_space<vmem>>, vector<1x10x10x128xf32>,
    %c0_27 = arith.constant 0 : index
    %c1_28 = arith.constant 1 : index
    %c1_29 = arith.constant 1 : index
    %c0_30 = arith.constant 0 : index
    %37 = vector.load %arg8[%c0_27, %c1_28, %c1_29, %c0_30] : memref<1x10x10x128xf32, #tpu.memory_space<vmem>>, vector<1x8x8x128xf32>
    tpu.vector_store %arg8[%c0_27, %c1_28, %c1_29, %c0_30], %34 {strides = array<i32>} : memref<1x10x10x128xf32, #tpu.memory_space<vmem>>, vector<1x8x8x128xf32>,
    %c0_31 = arith.constant 0 : index
    %c0_32 = arith.constant 0 : index
    %c0_33 = arith.constant 0 : index
    %c0_34 = arith.constant 0 : index
    %38 = vector.load %arg8[%c0_31, %c0_32, %c0_33, %c0_34] : memref<1x10x10x128xf32, #tpu.memory_space<vmem>>, vector<1x10x10x128xf32>
    %39 = vector.extract_strided_slice %38 {offsets = [0, 0, 0, 0], sizes = [1, 8, 8, 128], strides = [1, 1, 1, 1]} : vector<1x10x10x128xf32> to vector<1x8x8x128xf32>
    %40 = vector.shape_cast %39 : vector<1x8x8x128xf32> to vector<64x128xf32>
    %41 = vector.extract_strided_slice %38 {offsets = [0, 0, 1, 0], sizes = [1, 8, 8, 128], strides = [1, 1, 1, 1]} : vector<1x10x10x128xf32> to vector<1x8x8x128xf32>
    %42 = vector.shape_cast %41 : vector<1x8x8x128xf32> to vector<64x128xf32>
    %43 = vector.extract_strided_slice %38 {offsets = [0, 0, 2, 0], sizes = [1, 8, 8, 128], strides = [1, 1, 1, 1]} : vector<1x10x10x128xf32> to vector<1x8x8x128xf32>
    %44 = vector.shape_cast %43 : vector<1x8x8x128xf32> to vector<64x128xf32>
    %45 = vector.extract_strided_slice %38 {offsets = [0, 1, 0, 0], sizes = [1, 8, 8, 128], strides = [1, 1, 1, 1]} : vector<1x10x10x128xf32> to vector<1x8x8x128xf32>
    %46 = vector.shape_cast %45 : vector<1x8x8x128xf32> to vector<64x128xf32>
    %47 = vector.extract_strided_slice %38 {offsets = [0, 1, 1, 0], sizes = [1, 8, 8, 128], strides = [1, 1, 1, 1]} : vector<1x10x10x128xf32> to vector<1x8x8x128xf32>
    %48 = vector.shape_cast %47 : vector<1x8x8x128xf32> to vector<64x128xf32>
    %49 = vector.extract_strided_slice %38 {offsets = [0, 1, 2, 0], sizes = [1, 8, 8, 128], strides = [1, 1, 1, 1]} : vector<1x10x10x128xf32> to vector<1x8x8x128xf32>
    %50 = vector.shape_cast %49 : vector<1x8x8x128xf32> to vector<64x128xf32>
    %51 = vector.extract_strided_slice %38 {offsets = [0, 2, 0, 0], sizes = [1, 8, 8, 128], strides = [1, 1, 1, 1]} : vector<1x10x10x128xf32> to vector<1x8x8x128xf32>
    %52 = vector.shape_cast %51 : vector<1x8x8x128xf32> to vector<64x128xf32>
    %53 = vector.extract_strided_slice %38 {offsets = [0, 2, 1, 0], sizes = [1, 8, 8, 128], strides = [1, 1, 1, 1]} : vector<1x10x10x128xf32> to vector<1x8x8x128xf32>
    %54 = vector.shape_cast %53 : vector<1x8x8x128xf32> to vector<64x128xf32>
    %55 = vector.extract_strided_slice %38 {offsets = [0, 2, 2, 0], sizes = [1, 8, 8, 128], strides = [1, 1, 1, 1]} : vector<1x10x10x128xf32> to vector<1x8x8x128xf32>
    %56 = vector.shape_cast %55 : vector<1x8x8x128xf32> to vector<64x128xf32>
    %57 = tpu.concatenate %40, %42, %44, %46, %48, %50, %52, %54, %56 in 1 : vector<64x128xf32>, vector<64x128xf32>, vector<64x128xf32>, vector<64x128xf32>, vector<64x128xf32>, vector<64x128xf32>, vector<64x128xf32>, vector<64x128xf32>, vector<64x128xf32> -> vector<64x1152xf32>
    %c0_35 = arith.constant 0 : index
    %c0_36 = arith.constant 0 : index
    %58 = vector.load %arg3[%c0_35, %c0_36] : memref<1152x128xf32, #tpu.memory_space<vmem>>, vector<1152x128xf32>
    %cst_37 = arith.constant dense<0.000000e+00> : vector<64x128xf32>
    %59 = tpu.matmul %57, %58, %cst_37 {dimension_numbers = #tpu.dot_dimension_numbers<[1], [0], [0], [1], [0, 0, 1, 1], [], []>} : vector<64x1152xf32>, vector<1152x128xf32>, vector<64x128xf32> -> vector<64x128xf32>
    %cst_38 = arith.constant dense<0.000000e+00> : vector<128xf32>
    %60 = vector.multi_reduction <add>, %59, %cst_38 [0] : vector<64x128xf32> to vector<128xf32>
    %61 = vector.shape_cast %60 : vector<128xf32> to vector<1x128xf32>
    %62 = arith.mulf %59, %59 : vector<64x128xf32>
    %cst_39 = arith.constant dense<0.000000e+00> : vector<128xf32>
    %63 = vector.multi_reduction <add>, %62, %cst_39 [0] : vector<64x128xf32> to vector<128xf32>
    %64 = vector.shape_cast %63 : vector<128xf32> to vector<1x128xf32>
    %65 = tpu.concatenate %61, %64 in 0 : vector<1x128xf32>, vector<1x128xf32> -> vector<2x128xf32>
    %c0_i32 = arith.constant 0 : i32
    %66 = arith.cmpi eq, %arg0, %c0_i32 : i32
    %67 = arith.extui %66 : i1 to i32
    %c0_i32_40 = arith.constant 0 : i32
    %68 = arith.cmpi ne, %67, %c0_i32_40 : i32
    scf.if %68 {
      %cst_45 = arith.constant 0.000000e+00 : f32
      %72 = vector.broadcast %cst_45 : f32 to vector<2x128xf32>
      %c0_46 = arith.constant 0 : index
      %c0_47 = arith.constant 0 : index
      %73 = vector.load %arg6[%c0_46, %c0_47] : memref<2x128xf32, #tpu.memory_space<vmem>>, vector<2x128xf32>
      tpu.vector_store %arg6[%c0_46, %c0_47], %72 {strides = array<i32>} : memref<2x128xf32, #tpu.memory_space<vmem>>, vector<2x128xf32>,
    } else {
    }
    %c0_41 = arith.constant 0 : index
    %c0_42 = arith.constant 0 : index
    %69 = vector.load %arg6[%c0_41, %c0_42] : memref<2x128xf32, #tpu.memory_space<vmem>>, vector<2x128xf32>
    %70 = arith.addf %69, %65 : vector<2x128xf32>
    %c0_43 = arith.constant 0 : index
    %c0_44 = arith.constant 0 : index
    %71 = vector.load %arg6[%c0_43, %c0_44] : memref<2x128xf32, #tpu.memory_space<vmem>>, vector<2x128xf32>
    tpu.vector_store %arg6[%c0_43, %c0_44], %70 {strides = array<i32>} : memref<2x128xf32, #tpu.memory_space<vmem>>, vector<2x128xf32>,
    return
  }
  func.func @transform_0(%arg0: i32) -> (i32, i32, i32, i32) {
    %c0_i32 = arith.constant 0 : i32
    %c0_i32_0 = arith.constant 0 : i32
    %c0_i32_1 = arith.constant 0 : i32
    %c0_i32_2 = arith.constant 0 : i32
    return %arg0, %c0_i32, %c0_i32_0, %c0_i32_1 : i32, i32, i32, i32
  }
  func.func @transform_1(%arg0: i32) -> (i32, i32) {
    %c0_i32 = arith.constant 0 : i32
    %c0_i32_0 = arith.constant 0 : i32
    %c0_i32_1 = arith.constant 0 : i32
    return %c0_i32, %c0_i32_0 : i32, i32
  }
  func.func @transform_2(%arg0: i32) -> (i32, i32) {
    %c0_i32 = arith.constant 0 : i32
    %c0_i32_0 = arith.constant 0 : i32
    %c0_i32_1 = arith.constant 0 : i32
    return %c0_i32, %c0_i32_0 : i32, i32
  }
  func.func @transform_3(%arg0: i32) -> (i32, i32) {
    %c0_i32 = arith.constant 0 : i32
    %c0_i32_0 = arith.constant 0 : i32
    %c0_i32_1 = arith.constant 0 : i32
    return %c0_i32, %c0_i32_0 : i32, i32
  }
  func.func @transform_4(%arg0: i32) -> (i32, i32) {
    %c0_i32 = arith.constant 0 : i32
    %c0_i32_0 = arith.constant 0 : i32
    %c0_i32_1 = arith.constant 0 : i32
    return %c0_i32, %c0_i32_0 : i32, i32
  }
  func.func @transform_5(%arg0: i32) -> (i32, i32) {
    %c0_i32 = arith.constant 0 : i32
    %c0_i32_0 = arith.constant 0 : i32
    %c0_i32_1 = arith.constant 0 : i32
    return %c0_i32, %c0_i32_0 : i32, i32
  }
}

</mosaic_0001>

<bundles_post_ra>
// kernel: basic_block_forward_nhwc.3
= control target key start
LH: loop header
LB: loop body
LE: loop exit
PB: predicated region body
PF: predicated region fallthrough
CT: control target
= control target key end

     0   :  { %7 = vsyncpa [#allocation4], 0  ;;  %s2111_s0 = inlined_call_operand.hbm [shape: f32[2,8,8,128], index: 0, kind: input, shape index: {}]   ;;  %s2112_s1 = inlined_call_operand.hbm [shape: f32[1152,128], index: 1, kind: input, shape index: {}]   ;;  %s2113_s2 = inlined_call_operand.vmem [shape: f32[2,128], index: 2, kind: output, shape index: {}]  }
   0x1   :  { %9 = vsyncpa [#allocation4 + $0x1], 0 }
   0x2   :  { %10 = vsyncpa [#allocation6], 0  ;;  %s1740_s9 = smov 0   ;;  %s1742_s10 = smov 0  }
   0x3   :  { %s1744_s11 = smov 0   ;;  %s1746_s12 = smov 0  }
   0x4 LB: > { %s1085_s13 = sadd.s32 4294967295, %s1717_s12   ;;  %p36_p0 = scmp.ne.s32.totalorder %s1709_s10, %s1705_s9  ;;  %s1717_s12 = sphi %s1746_s12, %s2131_s12   ;;  %s1713_s11 = sphi %s1744_s11, %s2130_s11   ;;  %s1709_s10 = sphi %s1742_s10, %s2129_s10   ;;  %s1705_s9 = sphi %s1740_s9, %s2128_s9  }
   0x5   : > { %p1760_p1 = scmp.eq.s32.totalorder %s1085_s13, 0  ;;  %p1086_p2 = scmp.ge.s32.totalorder %s1717_s12, 1 }
   0x6   : > { %p89_p3 = scmp.lt.s32.totalorder %s1717_s12, 3  ;;  %p1766_p4 = scmp.ne.s32.totalorder %s1085_s13, 0 }
   0x7   : > { %s2118_s14 = scalar_select %p1760_p1, 1, 0 }
   0x8   : > { %s2119_s15 = scalar_select %p1766_p4, 1, 0 }
   0x9   : > { %p1772_p5 = por %p1760_p1, %p36_p0  ;;  %p1776_p6 = pnand %p1086_p2, %p89_p3 }
   0xa   : > { %s1719_s18 = smov [#allocation5]   ;;  %s1789_s21 = sadd.s32 1, %s1717_s12  }
   0xb   : > { %s2120_s16 = scalar_select %p1772_p5, 1, 0 }
   0xc   : > { %s2121_s17 = scalar_select %p1776_p6, 1, 0 }
   0xd   : > { %s101_s19 = sshll.u32 %s1719_s18, 4  ;;  %p1573_p7 = pneg %p1776_p6  ;;  %s102_s19 = int_to_ptr.vmem [resolvable:$true] %s101_s19 }
   0xe   : > { %s23_s22 = sadd.s32 1, %s1713_s11  ;;  %s20_s23 = ssub.s32 %s1717_s12, %s1789_s21 }
   0xf   : > { %p1784_p8 = pnand %p1573_p7, %p1760_p1  ;;  %s1621_s26 = scalar_lea.hbm %s2112_s1, 18432 }
  0x10   : > { %p1622_p9 = scmp.ne.s32.totalorder %s2112_s1, %s1621_s26  ;;  %p1628_p13 = scmp.lt.u32.totalorder %s1621_s26, %s2112_s1 }
  0x11   : > { %p1623_p10 = pneg %p1784_p8 }
  0x13   : > { %p1624_p11 = pnand %p1623_p10, %p1622_p9 }
  0x15   : > { %p1625_p12 = pneg %p1624_p11 }
  0x17   : > { %p1630_p0 = pnand %p1628_p13, %p1625_p12 }
  0x19   : > { %1633 = shalt.err (!%p1630_p0)
}
  0x1a   : > { %s1634_s3 = scalar_lea.vmem %s102_s19, 18432  ;;  %p1642_p4 = scmp.lt.s32.totalorder %s102_s19, %s102_s19 }
  0x1b   : > { %p1635_p2 = scmp.ne.s32.totalorder %s102_s19, %s1634_s3  ;;  %p1643_p1 = scmp.lt.s32.totalorder %s1634_s3, %s1634_s3 }
  0x1d   : > { %p1637_p3 = pnand %p1635_p2, %p1623_p10  ;;  %p1644_p5 = por %p1643_p1, %p1642_p4 }
  0x1f   : > { %p1638_p7 = pneg %p1637_p3 }
  0x21   : > { %p1645_p6 = pnand %p1644_p5, %p1638_p7 }
  0x23   : > { %1648 = shalt.err (!%p1645_p6)
}
  0x24   : > { %s1720_s4 = smov 128   ;;  %s1721_s5 = smov 8  }
  0x25   : > { %1576 = dma.hbm_to_vmem [thread:$0]  (!%p1784_p8), %s2112_s1, 18432, %s102_s19, [#allocation6], %s1720_s4, %s1720_s4, %s1721_s5  }
  0x26   : > { %p21_p1 = scmp.eq.s32.totalorder %s20_s23, 0  ;;  %p30_p4 = scmp.ne.s32.totalorder %s1713_s11, %s1709_s10 }
  0x27   : > { %p31_p5 = scmp.eq.s32.totalorder %s1717_s12, 0  ;;  %p1582_p6 = scmp.lt.s32.totalorder %s1717_s12, 2 }
  0x28   : > { %s1818_s8 = scalar_select %p21_p1, %s1713_s11, %s23_s22  }
  0x29   : > { %p32_p9 = por %p31_p5, %p30_p4  ;;  %s115_s9 = sand.u32 1, %s1713_s11  }
  0x2a   : > { %s1089_s13 = sshll.u32 %s115_s9, 6  ;;  %s1098_s18 = sshll.u32 %s1717_s12, 10 }
  0x2b   : > { %s1825_s20 = scalar_lea.hbm %s2111_s0, %s1098_s18  ;;  %s119_s19 = scalar_lea.vmem [#allocation3], %s1089_s13 }
  0x2c   : > { %s126_s23 = sshll.u32 %s119_s19, 4  ;;  %p1829_p8 = pnand %p1582_p6, %p32_p9  ;;  %s1827_s23 = int_to_ptr.vmem [resolvable:$true] %s126_s23 }
  0x2d   : > { %s1833_s12 = scalar_lea.sflag [#allocation4], %s115_s9  ;;  %s1649_s26 = scalar_lea.hbm %s1825_s20, 1024 }
  0x2e   : > { %p1650_p10 = scmp.ne.s32.totalorder %s1825_s20, %s1649_s26  ;;  %p1651_p11 = pneg %p1829_p8 }
  0x2f   : > { %s1654_s29 = scalar_lea.hbm %s2111_s0, 2048  ;;  %p1655_p0 = scmp.lt.u32.totalorder %s1825_s20, %s2111_s0 }
  0x30   : > { %p1652_p12 = pnand %p1651_p11, %p1650_p10  ;;  %p1656_p2 = scmp.lt.u32.totalorder %s1654_s29, %s1649_s26 }
  0x31   : > { %p1658_p7 = scmp.lt.u32.totalorder %s1649_s26, %s1825_s20 }
  0x32   : > { %p1653_p13 = pneg %p1652_p12  ;;  %p1657_p3 = por %p1656_p2, %p1655_p0 }
  0x34   : > { %p1659_p1 = por %p1658_p7, %p1657_p3 }
  0x36   : > { %p1660_p4 = pnand %p1659_p1, %p1653_p13 }
  0x38   : > { %1663 = shalt.err (!%p1660_p4)
}
  0x39   : > { %s1664_s6 = scalar_lea.vmem %s1827_s23, 1024  ;;  %s1722_s7 = smov [#allocation3]  }
  0x3a   : > { %p1665_p5 = scmp.ne.s32.totalorder %s1827_s23, %s1664_s6  ;;  %s1669_s9 = sshll.u32 %s1722_s7, 4  ;;  %s1670_s9 = int_to_ptr.vmem [resolvable:$false] %s1669_s9 }
  0x3b   : > { %s1671_s13 = scalar_lea.vmem %s1670_s9, 2048  ;;  %p1672_p10 = scmp.lt.s32.totalorder %s1827_s23, %s1670_s9 }
  0x3c   : > { %p1667_p6 = pnand %p1665_p5, %p1651_p11  ;;  %p1673_p12 = scmp.lt.s32.totalorder %s1671_s13, %s1664_s6 }
  0x3e   : > { %p1668_p9 = pneg %p1667_p6  ;;  %p1674_p0 = por %p1673_p12, %p1672_p10 }
  0x40   : > { %p1675_p2 = pnand %p1674_p0, %p1668_p9 }
  0x42   : > { %1678 = shalt.err (!%p1675_p2)
}
  0x43   : > { %1580 = dma.hbm_to_vmem [thread:$0]  (!%p1829_p8), %s1825_s20, 1024, %s1827_s23, %s1833_s12, %s1720_s4, %s1720_s4, %s1721_s5  }
  0x44   : > { %p2124_p11 = scmp.ne.s32.totalorder %s2121_s17, 0 }
  0x45   : > { %s140_s18 = sand.u32 (!%p2124_p11), 1, %s1709_s10   ;;  %p2125_p13 = scmp.ne.s32.totalorder (!%p2124_p11), %s2120_s16, 0 }
  0x46   : > { %138 = sbr.rel (%p2124_p11) target bundleno = 431 (0x1af), region = 28  ;;  %s1093_s24 = sshll.u32 (!%p2124_p11), %s140_s18, 6 }
  0x47   : > { %s141_s25 = scalar_lea.sflag (!%p2124_p11), [#allocation4], %s140_s18  ;;  %s1867_s19 = scalar_lea.vmem (!%p2124_p11), [#allocation3], %s1093_s24 }
  0x4d   : > { %1696 = dma.done.wait (%p2125_p13), %s141_s25, 1024  }
  0x4e   : > { %1698 = vsyncadd (%p2125_p13), %s141_s25, 4294966272  ;;  %p2126_p3 = scmp.ne.s32.totalorder %s2118_s14, 0 }
  0x50   : > { %1700 = dma.done.wait (%p2126_p3), [#allocation6], 18432  }
  0x51   : > { %1702 = vsyncadd (%p2126_p3), [#allocation6], 4294948864  ;;  %v1723_v0 = vmov 0.0   ;;  %v339_v1 = vld [vmem:[#allocation5 + $0x80] sm:$0xff]  ;;  %v340_v2 = vld [vmem:[#allocation5 + $0x88] sm:$0xff]  ;;  %vm237_vm0 = vcmask 1046528  }
  0x52   : > { %173 = vst [vmem:[#allocation2 + $0x8] sm:$0x3] %v1723_v0  ;;  %174 = vst [vmem:[#allocation2 + $0x10] sm:$0xff] %v1723_v0  ;;  %v371_v3 = vld [vmem:[#allocation5 + $0x180] sm:$0xff]  ;;  %v1391_v4 = vpack.c.bf16 %v340_v2, %v339_v1  ;;  %v372_v5 = vld [vmem:[#allocation5 + $0x188] sm:$0xff]  ;;  %vm270_vm1 = vcmask 1045504  }
  0x53   : > { %175 = vst [vmem:[#allocation2 + $0x18] sm:$0x3] %v1723_v0  ;;  %176 = vst [vmem:[#allocation2 + $0x20] sm:$0xff] %v1723_v0  ;;  %v323_v6 = vld [vmem:[#allocation5] sm:$0xff]  ;;  %v324_v7 = vld [vmem:[#allocation5 + $0x8] sm:$0xff]  ;;  %v1423_v8 = vpack.c.bf16 %v372_v5, %v371_v3  ;;  %vm1026_vm2 = vcmask 1040384  }
  0x54   : > { %177 = vst [vmem:[#allocation2 + $0x28] sm:$0x3] %v1723_v0  ;;  %178 = vst [vmem:[#allocation2 + $0x30] sm:$0xff] %v1723_v0  ;;  %v1393_v9 = vpack.c.bf16 %v324_v7, %v323_v6  ;;  %v355_v10 = vld [vmem:[#allocation5 + $0x100] sm:$0xff]  ;;  %v356_v11 = vld [vmem:[#allocation5 + $0x108] sm:$0xff]  ;;  %1392 = vmatprep.subr.bf16.mxu0 %v1391_v4  ;;  %p2127_p8 = scmp.ne.s32.totalorder %s2119_s15, 0 }
  0x55   : > { %179 = vst [vmem:[#allocation2 + $0x38] sm:$0x3] %v1723_v0  ;;  %180 = vst [vmem:[#allocation2 + $0x40] sm:$0xff] %v1723_v0  ;;  %v341_v12 = vld [vmem:[#allocation5 + $0x90] sm:$0xff]  ;;  %v1425_v13 = vpack.c.bf16 %v356_v11, %v355_v10  ;;  %v342_v14 = vld [vmem:[#allocation5 + $0x98] sm:$0xff]  ;;  %1424 = vmatprep.subr.bf16.mxu1 %v1423_v8 }
  0x56   : > { %181 = vst [vmem:[#allocation2 + $0x48] sm:$0x3] %v1723_v0  ;;  %182 = vst [vmem:[#allocation2 + $0x50] sm:$0xff] %v1723_v0  ;;  %v373_v15 = vld [vmem:[#allocation5 + $0x190] sm:$0xff]  ;;  %v374_v16 = vld [vmem:[#allocation5 + $0x198] sm:$0xff]  ;;  %1394 = vmatpush3.bf16.msra.mxu0 %v1393_v9  ;;  %v1395_v17 = vpack.c.bf16 %v342_v14, %v341_v12 }
  0x57   : > { %183 = vst [vmem:[#allocation2 + $0x58] sm:$0x3] %v1723_v0  ;;  %184 = vst [vmem:[#allocation2 + $0x60] sm:$0xff] %v1723_v0  ;;  %v1427_v18 = vpack.c.bf16 %v374_v16, %v373_v15  ;;  %v325_v19 = vld [vmem:[#allocation5 + $0x10] sm:$0xff]  ;;  %v326_v20 = vld [vmem:[#allocation5 + $0x18] sm:$0xff]  ;;  %1426 = vmatpush3.bf16.msra.mxu1 %v1425_v13  ;;  %v1896_v15 = vrot.slane %v1723_v0, 1 }
  0x58   : > { %185 = vst [vmem:[#allocation2 + $0x68] sm:$0x3] %v1723_v0  ;;  %186 = vst [vmem:[#allocation2 + $0x70] sm:$0xff] %v1723_v0  ;;  %v357_v21 = vld [vmem:[#allocation5 + $0x110] sm:$0xff]  ;;  %v1397_v22 = vpack.c.bf16 %v326_v20, %v325_v19  ;;  %v358_v23 = vld [vmem:[#allocation5 + $0x118] sm:$0xff]  ;;  %1396 = vmatprep.subr.bf16.mxu0 %v1395_v17 }
  0x59   : > { %187 = vst [vmem:[#allocation2 + $0x78] sm:$0x3] %v1723_v0  ;;  %188 = vst [vmem:[#allocation2 + $0x80] sm:$0xff] %v1723_v0  ;;  %v343_v24 = vld [vmem:[#allocation5 + $0xa0] sm:$0xff]  ;;  %v344_v25 = vld [vmem:[#allocation5 + $0xa8] sm:$0xff]  ;;  %1428 = vmatprep.subr.bf16.mxu1 %v1427_v18  ;;  %v1429_v26 = vpack.c.bf16 %v358_v23, %v357_v21 }
  0x5a   : > { %189 = vst [vmem:[#allocation2 + $0x88] sm:$0x3] %v1723_v0  ;;  %191 = vst [vmem:[#allocation2 + $0x98] sm:$0x3] %v1723_v0  ;;  %v1399_v27 = vpack.c.bf16 %v344_v25, %v343_v24  ;;  %v375_v28 = vld [vmem:[#allocation5 + $0x1a0] sm:$0xff]  ;;  %v376_v29 = vld [vmem:[#allocation5 + $0x1a8] sm:$0xff]  ;;  %1398 = vmatpush3.bf16.msra.mxu0 %v1397_v22 }
  0x5b   : > { %v327_v30 = vld [vmem:[#allocation5 + $0x20] sm:$0xff]  ;;  %v1431_v31 = vpack.c.bf16 %v376_v29, %v375_v28  ;;  %v328_v32 = vld [vmem:[#allocation5 + $0x28] sm:$0xff]  ;;  %v345_v36 = vld [vmem:[#allocation5 + $0xb0] sm:$0xff]  ;;  %1430 = vmatpush3.bf16.msra.mxu1 %v1429_v26 }
  0x5c   : > { %v359_v33 = vld [vmem:[#allocation5 + $0x120] sm:$0xff]  ;;  %v360_v34 = vld [vmem:[#allocation5 + $0x128] sm:$0xff]  ;;  %v1401_v35 = vpack.c.bf16 %v328_v32, %v327_v30  ;;  %v346_v37 = vld [vmem:[#allocation5 + $0xb8] sm:$0xff]  ;;  %1400 = vmatprep.subr.bf16.mxu0 %v1399_v27 }
  0x5d   : > { %v377_v38 = vld [vmem:[#allocation5 + $0x1b0] sm:$0xff]  ;;  %v1433_v39 = vpack.c.bf16 %v360_v34, %v359_v33  ;;  %v1403_v40 = vpack.c.bf16 %v346_v37, %v345_v36  ;;  %v378_v41 = vld [vmem:[#allocation5 + $0x1b8] sm:$0xff]  ;;  %1432 = vmatprep.subr.bf16.mxu1 %v1431_v31  ;;  %v347_v47 = vld [vmem:[#allocation5 + $0xc0] sm:$0xff] }
  0x5e   : > { %v329_v42 = vld [vmem:[#allocation5 + $0x30] sm:$0xff]  ;;  %v330_v43 = vld [vmem:[#allocation5 + $0x38] sm:$0xff]  ;;  %v1435_v44 = vpack.c.bf16 %v378_v41, %v377_v38  ;;  %v348_v48 = vld [vmem:[#allocation5 + $0xc8] sm:$0xff]  ;;  %1402 = vmatpush3.bf16.msra.mxu0 %v1401_v35 }
  0x5f   : > { %v361_v45 = vld [vmem:[#allocation5 + $0x130] sm:$0xff]  ;;  %v362_v46 = vld [vmem:[#allocation5 + $0x138] sm:$0xff]  ;;  %v379_v49 = vld [vmem:[#allocation5 + $0x1c0] sm:$0xff]  ;;  %v1405_v51 = vpack.c.bf16 %v330_v43, %v329_v42  ;;  %1434 = vmatpush3.bf16.msra.mxu1 %v1433_v39  ;;  %1404 = vmatprep.subr.bf16.mxu0 %v1403_v40  ;;  %v1407_v53 = vpack.c.bf16 %v348_v48, %v347_v47  ;;  %v1909_v47 = vrot.slane %v1723_v0, 2 }
  0x60   : > { %v380_v50 = vld [vmem:[#allocation5 + $0x1c8] sm:$0xff]  ;;  %v1437_v52 = vpack.c.bf16 %v362_v46, %v361_v45  ;;  %v331_v54 = vld [vmem:[#allocation5 + $0x40] sm:$0xff]  ;;  %1436 = vmatprep.subr.bf16.mxu1 %v1435_v44  ;;  %v349_v59 = vld [vmem:[#allocation5 + $0xd0] sm:$0xff] }
  0x61   : > { %v332_v55 = vld [vmem:[#allocation5 + $0x48] sm:$0xff]  ;;  %v363_v56 = vld [vmem:[#allocation5 + $0x140] sm:$0xff]  ;;  %v1439_v57 = vpack.c.bf16 %v380_v50, %v379_v49  ;;  %v350_v60 = vld [vmem:[#allocation5 + $0xd8] sm:$0xff] }
  0x62   : > { %v364_v58 = vld [vmem:[#allocation5 + $0x148] sm:$0xff]  ;;  %v381_v61 = vld [vmem:[#allocation5 + $0x1d0] sm:$0xff]  ;;  %v382_v62 = vld [vmem:[#allocation5 + $0x1d8] sm:$0xff]  ;;  %1406 = vmatpush3.bf16.msra.mxu0 %v1405_v51  ;;  %v1409_v63 = vpack.c.bf16 %v332_v55, %v331_v54  ;;  %v1411_v2 = vpack.c.bf16 %v350_v60, %v349_v59 }
  0x63   : > { %1438 = vmatpush3.bf16.msra.mxu1 %v1437_v52  ;;  %1408 = vmatprep.subr.bf16.mxu0 %v1407_v53  ;;  %v1441_v1 = vpack.c.bf16 %v364_v58, %v363_v56  ;;  %v333_v3 = vld [vmem:[#allocation5 + $0x50] sm:$0xff]  ;;  %v334_v4 = vld [vmem:[#allocation5 + $0x58] sm:$0xff]  ;;  %v1443_v6 = vpack.c.bf16 %v382_v62, %v381_v61  ;;  %v351_v8 = vld [vmem:[#allocation5 + $0xe0] sm:$0xff] }
  0x64   : > { %v365_v5 = vld [vmem:[#allocation5 + $0x150] sm:$0xff]  ;;  %1440 = vmatprep.subr.bf16.mxu1 %v1439_v57  ;;  %v366_v7 = vld [vmem:[#allocation5 + $0x158] sm:$0xff]  ;;  %v352_v9 = vld [vmem:[#allocation5 + $0xe8] sm:$0xff]  ;;  %v1413_v12 = vpack.c.bf16 %v334_v4, %v333_v3 }
  0x65   : > { %v383_v10 = vld [vmem:[#allocation5 + $0x1e0] sm:$0xff]  ;;  %v384_v11 = vld [vmem:[#allocation5 + $0x1e8] sm:$0xff]  ;;  %v1445_v16 = vpack.c.bf16 %v366_v7, %v365_v5  ;;  %v1415_v17 = vpack.c.bf16 %v352_v9, %v351_v8  ;;  %v353_v23 = vld [vmem:[#allocation5 + $0xf0] sm:$0xff] }
  0x66   : > { %1410 = vmatpush3.bf16.msra.mxu0 %v1409_v63  ;;  %v335_v13 = vld [vmem:[#allocation5 + $0x60] sm:$0xff]  ;;  %v336_v14 = vld [vmem:[#allocation5 + $0x68] sm:$0xff]  ;;  %v1447_v21 = vpack.c.bf16 %v384_v11, %v383_v10  ;;  %v354_v24 = vld [vmem:[#allocation5 + $0xf8] sm:$0xff] }
  0x67   : > { %1442 = vmatpush3.bf16.msra.mxu1 %v1441_v1  ;;  %1412 = vmatprep.subr.bf16.mxu0 %v1411_v2  ;;  %v367_v18 = vld [vmem:[#allocation5 + $0x160] sm:$0xff]  ;;  %v1898_v19 = vld [vmem:[#allocation2 + $0x8] sm:$0x3]  ;;  %v385_v26 = vld [vmem:[#allocation5 + $0x1f0] sm:$0xff]  ;;  %v1417_v28 = vpack.c.bf16 %v336_v14, %v335_v13  ;;  %v1419_v32 = vpack.c.bf16 %v354_v24, %v353_v23 }
  0x68   : > { %v164_v20 = vld [vmem:[%s1867_s19] sm:$0xff]  ;;  %1444 = vmatprep.subr.bf16.mxu1 %v1443_v6  ;;  %v368_v22 = vld [vmem:[#allocation5 + $0x168] sm:$0xff]  ;;  %v239_v25 = vrot.slane %v1898_v19, 1  ;;  %v386_v27 = vld [vmem:[#allocation5 + $0x1f8] sm:$0xff]  ;;  %v272_v48 = vrot.slane %v1898_v19, 2 }
  0x69   : > { %193 = vst [vmem:[#allocation2 + $0x11] sm:$0xff] %v164_v20  ;;  %v165_v30 = vld [vmem:[%s1867_s19 + $0x8] sm:$0xff]  ;;  %v1449_v31 = vpack.c.bf16 %v368_v22, %v367_v18  ;;  %v337_v33 = vld [vmem:[#allocation5 + $0x70] sm:$0xff]  ;;  %v338_v34 = vld [vmem:[#allocation5 + $0x78] sm:$0xff]  ;;  %v1451_v36 = vpack.c.bf16 %v386_v27, %v385_v26 }
  0x6a   : > { %1414 = vmatpush3.bf16.msra.mxu0 %v1413_v12  ;;  %v240_v29 = vsel %vm237_vm0, %v1896_v15, %v239_v25  ;;  %v369_v35 = vld [vmem:[#allocation5 + $0x170] sm:$0xff]  ;;  %194 = vst [vmem:[#allocation2 + $0x21] sm:$0xff] %v165_v30  ;;  %v370_v37 = vld [vmem:[#allocation5 + $0x178] sm:$0xff]  ;;  %v403_v38 = vld [vmem:[#allocation5 + $0x280] sm:$0xff]  ;;  %v1421_v43 = vpack.c.bf16 %v338_v34, %v337_v33  ;;  %v273_v2 = vsel %vm270_vm1, %v1909_v47, %v272_v48 }
  0x6b   : > { %1446 = vmatpush3.bf16.msra.mxu1 %v1445_v16  ;;  %1416 = vmatprep.subr.bf16.mxu0 %v1415_v17  ;;  %v404_v39 = vld [vmem:[#allocation5 + $0x288] sm:$0xff]  ;;  %v435_v40 = vld [vmem:[#allocation5 + $0x380] sm:$0xff]  ;;  %v166_v42 = vld [vmem:[%s1867_s19 + $0x10] sm:$0xff]  ;;  %v1453_v45 = vpack.c.bf16 %v370_v37, %v369_v35 }
  0x6c   : > { %1448 = vmatprep.subr.bf16.mxu1 %v1447_v21  ;;  %531 = vmatprep.mubr.f32.mxu0 %v240_v29  ;;  %v436_v41 = vld [vmem:[#allocation5 + $0x388] sm:$0xff]  ;;  %v387_v44 = vld [vmem:[#allocation5 + $0x200] sm:$0xff]  ;;  %195 = vst [vmem:[#allocation2 + $0x31] sm:$0xff] %v166_v42  ;;  %v1455_v49 = vpack.c.bf16 %v404_v39, %v403_v38  ;;  %v405_v57 = vld [vmem:[#allocation5 + $0x290] sm:$0xff] }
  0x6d   : > { %v388_v50 = vld [vmem:[#allocation5 + $0x208] sm:$0xff]  ;;  %v1487_v52 = vpack.c.bf16 %v436_v41, %v435_v40  ;;  %v419_v53 = vld [vmem:[#allocation5 + $0x300] sm:$0xff]  ;;  %v406_v58 = vld [vmem:[#allocation5 + $0x298] sm:$0xff] }
  0x6e   : > { %1418 = vmatpush3.bf16.msra.mxu0 %v1417_v28  ;;  %v420_v54 = vld [vmem:[#allocation5 + $0x308] sm:$0xff]  ;;  %v437_v59 = vld [vmem:[#allocation5 + $0x390] sm:$0xff]  ;;  %v167_v60 = vld [vmem:[%s1867_s19 + $0x18] sm:$0xff]  ;;  %v1457_v61 = vpack.c.bf16 %v388_v50, %v387_v44  ;;  %v1459_v9 = vpack.c.bf16 %v406_v58, %v405_v57 }
  0x6f   : > { %1450 = vmatpush3.bf16.msra.mxu1 %v1449_v31  ;;  %1420 = vmatprep.subr.bf16.mxu0 %v1419_v32  ;;  %v438_v63 = vld [vmem:[#allocation5 + $0x398] sm:$0xff]  ;;  %196 = vst [vmem:[#allocation2 + $0x41] sm:$0xff] %v167_v60  ;;  %v1489_v3 = vpack.c.bf16 %v420_v54, %v419_v53  ;;  %v389_v6 = vld [vmem:[#allocation5 + $0x210] sm:$0xff]  ;;  %v407_v14 = vld [vmem:[#allocation5 + $0x2a0] sm:$0xff] }
  0x70   : > { %v1906_v46 = vld [vmem:[#allocation2 + $0x10] sm:$0xff]  ;;  %v204_v51 = vld [vmem:[#allocation2 + $0x18] sm:$0x3]  ;;  %1452 = vmatprep.subr.bf16.mxu1 %v1451_v36  ;;  %v1491_v16 = vpack.c.bf16 %v438_v63, %v437_v59  ;;  %v408_v18 = vld [vmem:[#allocation5 + $0x2a8] sm:$0xff] }
  0x71   : > { %636 = vmatprep.mubr.f32.mxu1 %v1906_v46  ;;  %v241_v55 = vrot.slane %v1906_v46, 1  ;;  %v242_v56 = vrot.slane %v204_v51, 1  ;;  %v1915_v62 = vld [vmem:[#allocation2 + $0x20] sm:$0xff]  ;;  %v1917_v1 = vld [vmem:[#allocation2 + $0x28] sm:$0x3]  ;;  %v274_v4 = vrot.slane %v1906_v46, 2  ;;  %v1463_v31 = vpack.c.bf16 %v408_v18, %v407_v14 }
  0x72   : > { %1422 = vmatpush3.bf16.msra.mxu0 %v1421_v43  ;;  %v275_v5 = vrot.slane %v204_v51, 2  ;;  %v390_v7 = vld [vmem:[#allocation5 + $0x218] sm:$0xff]  ;;  %v421_v10 = vld [vmem:[#allocation5 + $0x310] sm:$0xff]  ;;  %v244_v12 = vrot.slane %v1915_v62, 1  ;;  %v245_v13 = vrot.slane %v1917_v1, 1  ;;  %v439_v21 = vld [vmem:[#allocation5 + $0x3a0] sm:$0xff] }
  0x73   : > { %1454 = vmatpush3.bf16.msra.mxu1 %v1453_v45  ;;  %1456 = vmatprep.subr.bf16.mxu0 %v1455_v49  ;;  %v1923_v8 = vsel %vm237_vm0, %v241_v55, %v242_v56  ;;  %v422_v11 = vld [vmem:[#allocation5 + $0x318] sm:$0xff]  ;;  %v1928_v17 = vld [vmem:[#allocation2 + $0x30] sm:$0xff]  ;;  %v1461_v20 = vpack.c.bf16 %v390_v7, %v389_v6  ;;  %v440_v22 = vld [vmem:[#allocation5 + $0x3a8] sm:$0xff]  ;;  %v277_v26 = vrot.slane %v1915_v62, 2  ;;  %v278_v27 = vrot.slane %v1917_v1, 2 }
  0x74   : > { %1488 = vmatprep.subr.bf16.mxu1 %v1487_v52  ;;  %v1930_v19 = vld [vmem:[#allocation2 + $0x38] sm:$0x3]  ;;  %v168_v23 = vld [vmem:[%s1867_s19 + $0x20] sm:$0xff]  ;;  %v1935_v24 = vsel %vm270_vm1, %v274_v4, %v275_v5  ;;  %v1493_v25 = vpack.c.bf16 %v422_v11, %v421_v10  ;;  %v392_v29 = vld [vmem:[#allocation5 + $0x228] sm:$0xff]  ;;  %v1941_v30 = vsel %vm237_vm0, %v244_v12, %v245_v13  ;;  %v247_v34 = vrot.slane %v1928_v17, 1 }
  0x75   : > { %532 = vmatmul.mubr.f32.vlgmr.msra.gmra.mrb[0].mxu0 %v1723_v0  ;;  %v391_v28 = vld [vmem:[#allocation5 + $0x220] sm:$0xff]  ;;  %197 = vst [vmem:[#allocation2 + $0x51] sm:$0xff] %v168_v23  ;;  %v424_v33 = vld [vmem:[#allocation5 + $0x328] sm:$0xff]  ;;  %v248_v35 = vrot.slane %v1930_v19, 1  ;;  %v409_v36 = vld [vmem:[#allocation5 + $0x2b0] sm:$0xff]  ;;  %v1495_v37 = vpack.c.bf16 %v440_v22, %v439_v21  ;;  %v1954_v45 = vsel %vm270_vm1, %v277_v26, %v278_v27  ;;  %v280_v48 = vrot.slane %v1928_v17, 2 }
  0x76   : > { %637 = vmatmul.mubr.f32.vlgmr.msra.gmra.mrb[0].mxu1 %v273_v2  ;;  %1458 = vmatpush3.bf16.msra.mxu0 %v1457_v61  ;;  %v423_v32 = vld [vmem:[#allocation5 + $0x320] sm:$0xff]  ;;  %v410_v39 = vld [vmem:[#allocation5 + $0x2b8] sm:$0xff]  ;;  %v1948_v40 = vld [vmem:[#allocation2 + $0x48] sm:$0x3]  ;;  %v1465_v41 = vpack.c.bf16 %v392_v29, %v391_v28  ;;  %v281_v49 = vrot.slane %v1930_v19, 2 }
  0x77   : > { %1490 = vmatpush3.bf16.msra.mxu1 %v1489_v3  ;;  %536 = vmatprep.mubr.f32.mxu0 %v1923_v8  ;;  %v1946_v38 = vld [vmem:[#allocation2 + $0x40] sm:$0xff]  ;;  %v441_v42 = vld [vmem:[#allocation5 + $0x3b0] sm:$0xff]  ;;  %v442_v43 = vld [vmem:[#allocation5 + $0x3b8] sm:$0xff]  ;;  %v1960_v52 = vsel %vm237_vm0, %v247_v34, %v248_v35  ;;  %v1467_v53 = vpack.c.bf16 %v410_v39, %v409_v36  ;;  %v251_v57 = vrot.slane %v1948_v40, 1 }
  0x78   : > { %641 = vmatprep.mubr.f32.mxu1 %v1915_v62  ;;  %1460 = vmatprep.subr.bf16.mxu0 %v1459_v9  ;;  %v169_v44 = vld [vmem:[%s1867_s19 + $0x28] sm:$0xff]  ;;  %v393_v50 = vld [vmem:[#allocation5 + $0x230] sm:$0xff]  ;;  %v394_v51 = vld [vmem:[#allocation5 + $0x238] sm:$0xff]  ;;  %v250_v56 = vrot.slane %v1946_v38, 1  ;;  %v1499_v59 = vpack.c.bf16 %v442_v43, %v441_v42  ;;  %v1973_v5 = vsel %vm270_vm1, %v280_v48, %v281_v49  ;;  %v283_v7 = vrot.slane %v1946_v38, 2 }
  0x79   : > { %537 = vmatmul.mubr.f32.gmra.mrb[2].mxu0 %v1906_v46  ;;  %1492 = vmatprep.subr.bf16.mxu1 %v1491_v16  ;;  %v1497_v46 = vpack.c.bf16 %v424_v33, %v423_v32  ;;  %198 = vst [vmem:[#allocation2 + $0x61] sm:$0xff] %v169_v44  ;;  %v425_v54 = vld [vmem:[#allocation5 + $0x330] sm:$0xff]  ;;  %v426_v55 = vld [vmem:[#allocation5 + $0x338] sm:$0xff]  ;;  %v411_v58 = vld [vmem:[#allocation5 + $0x2c0] sm:$0xff]  ;;  %v1469_v1 = vpack.c.bf16 %v394_v51, %v393_v50  ;;  %v284_v9 = vrot.slane %v1948_v40, 2 }
  0x7a   : > { %642 = vmatmul.mubr.f32.gmra.mrb[2].mxu1 %v1935_v24  ;;  %1462 = vmatpush3.bf16.msra.mxu0 %v1461_v20  ;;  %v412_v60 = vld [vmem:[#allocation5 + $0x2c8] sm:$0xff]  ;;  %v443_v61 = vld [vmem:[#allocation5 + $0x3c0] sm:$0xff]  ;;  %v170_v63 = vld [vmem:[%s1867_s19 + $0x30] sm:$0xff]  ;;  %v1501_v6 = vpack.c.bf16 %v426_v55, %v425_v54  ;;  %v1979_v12 = vsel %vm237_vm0, %v250_v56, %v251_v57 }
  0x7b   : > { %1494 = vmatpush3.bf16.msra.mxu1 %v1493_v25  ;;  %541 = vmatprep.mubr.f32.mxu0 %v1941_v30  ;;  %v444_v3 = vld [vmem:[#allocation5 + $0x3c8] sm:$0xff]  ;;  %199 = vst [vmem:[#allocation2 + $0x71] sm:$0xff] %v170_v63  ;;  %v395_v10 = vld [vmem:[#allocation5 + $0x240] sm:$0xff]  ;;  %v1471_v13 = vpack.c.bf16 %v412_v60, %v411_v58  ;;  %v413_v20 = vld [vmem:[#allocation5 + $0x2d0] sm:$0xff] }
  0x7c   : > { %646 = vmatprep.mubr.f32.mxu1 %v1928_v17  ;;  %1464 = vmatprep.subr.bf16.mxu0 %v1463_v31  ;;  %v1967_v2 = vld [vmem:[#allocation2 + $0x50] sm:$0xff]  ;;  %v1969_v4 = vld [vmem:[#allocation2 + $0x58] sm:$0x3]  ;;  %v396_v11 = vld [vmem:[#allocation5 + $0x248] sm:$0xff]  ;;  %v1503_v21 = vpack.c.bf16 %v444_v3, %v443_v61  ;;  %v1990_v31 = vsel %vm270_vm1, %v283_v7, %v284_v9 }
  0x7d   : > { %542 = vmatmul.mubr.f32.gmra.mrb[4].mxu0 %v1915_v62  ;;  %1496 = vmatprep.subr.bf16.mxu1 %v1495_v37  ;;  %v427_v14 = vld [vmem:[#allocation5 + $0x340] sm:$0xff]  ;;  %v428_v16 = vld [vmem:[#allocation5 + $0x348] sm:$0xff]  ;;  %v253_v18 = vrot.slane %v1967_v2, 1  ;;  %v254_v19 = vrot.slane %v1969_v4, 1  ;;  %v414_v22 = vld [vmem:[#allocation5 + $0x2d8] sm:$0xff]  ;;  %v1473_v26 = vpack.c.bf16 %v396_v11, %v395_v10  ;;  %v286_v33 = vrot.slane %v1967_v2, 2 }
  0x7e   : > { %647 = vmatmul.mubr.f32.gmra.mrb[4].mxu1 %v1954_v45  ;;  %1466 = vmatpush3.bf16.msra.mxu0 %v1465_v41  ;;  %v445_v23 = vld [vmem:[#allocation5 + $0x3d0] sm:$0xff]  ;;  %v171_v25 = vld [vmem:[%s1867_s19 + $0x38] sm:$0xff]  ;;  %v1505_v32 = vpack.c.bf16 %v428_v16, %v427_v14  ;;  %v287_v34 = vrot.slane %v1969_v4, 2  ;;  %v1475_v39 = vpack.c.bf16 %v414_v22, %v413_v20  ;;  %v415_v44 = vld [vmem:[#allocation5 + $0x2e0] sm:$0xff] }
  0x7f   : > { %1498 = vmatpush3.bf16.msra.mxu1 %v1497_v46  ;;  %546 = vmatprep.mubr.f32.mxu0 %v1960_v52  ;;  %v446_v28 = vld [vmem:[#allocation5 + $0x3d8] sm:$0xff]  ;;  %200 = vst [vmem:[#allocation2 + $0x81] sm:$0xff] %v171_v25  ;;  %v397_v35 = vld [vmem:[#allocation5 + $0x250] sm:$0xff]  ;;  %v1996_v37 = vsel %vm237_vm0, %v253_v18, %v254_v19  ;;  %v416_v49 = vld [vmem:[#allocation5 + $0x2e8] sm:$0xff] }
  0x80   : > { %651 = vmatprep.mubr.f32.mxu1 %v1946_v38  ;;  %1468 = vmatprep.subr.bf16.mxu0 %v1467_v53  ;;  %v1986_v27 = vld [vmem:[#allocation2 + $0x60] sm:$0xff]  ;;  %v214_v29 = vld [vmem:[#allocation2 + $0x68] sm:$0x3]  ;;  %v398_v36 = vld [vmem:[#allocation5 + $0x258] sm:$0xff]  ;;  %v1507_v46 = vpack.c.bf16 %v446_v28, %v445_v23  ;;  %v2007_v55 = vsel %vm270_vm1, %v286_v33, %v287_v34  ;;  %v1479_v63 = vpack.c.bf16 %v416_v49, %v415_v44 }
  0x81   : > { %547 = vmatmul.mubr.f32.gmra.mrb[6].mxu0 %v1928_v17  ;;  %1500 = vmatprep.subr.bf16.mxu1 %v1499_v59  ;;  %v429_v40 = vld [vmem:[#allocation5 + $0x350] sm:$0xff]  ;;  %v430_v41 = vld [vmem:[#allocation5 + $0x358] sm:$0xff]  ;;  %v256_v42 = vrot.slane %v1986_v27, 1  ;;  %v257_v43 = vrot.slane %v214_v29, 1  ;;  %v1477_v51 = vpack.c.bf16 %v398_v36, %v397_v35  ;;  %v447_v53 = vld [vmem:[#allocation5 + $0x3e0] sm:$0xff]  ;;  %v289_v57 = vrot.slane %v1986_v27, 2 }
  0x82   : > { %652 = vmatmul.mubr.f32.gmra.mrb[6].mxu1 %v1973_v5  ;;  %1470 = vmatpush3.bf16.msra.mxu0 %v1469_v1  ;;  %v2000_v48 = vld [vmem:[#allocation2 + $0x70] sm:$0xff]  ;;  %v2002_v50 = vld [vmem:[#allocation2 + $0x78] sm:$0x3]  ;;  %v448_v54 = vld [vmem:[#allocation5 + $0x3e8] sm:$0xff]  ;;  %v1509_v56 = vpack.c.bf16 %v430_v41, %v429_v40  ;;  %v290_v58 = vrot.slane %v214_v29, 2 }
  0x83   : > { %1502 = vmatpush3.bf16.msra.mxu1 %v1501_v6  ;;  %551 = vmatprep.mubr.f32.mxu0 %v1979_v12  ;;  %v399_v59 = vld [vmem:[#allocation5 + $0x260] sm:$0xff]  ;;  %v400_v60 = vld [vmem:[#allocation5 + $0x268] sm:$0xff]  ;;  %v2012_v61 = vsel %vm237_vm0, %v256_v42, %v257_v43  ;;  %v259_v4 = vrot.slane %v2000_v48, 1  ;;  %v260_v6 = vrot.slane %v2002_v50, 1  ;;  %v1511_v7 = vpack.c.bf16 %v448_v54, %v447_v53  ;;  %v417_v9 = vld [vmem:[#allocation5 + $0x2f0] sm:$0xff] }
  0x84   : > { %656 = vmatprep.mubr.f32.mxu1 %v1967_v2  ;;  %1472 = vmatprep.subr.bf16.mxu0 %v1471_v13  ;;  %v431_v1 = vld [vmem:[#allocation5 + $0x360] sm:$0xff]  ;;  %v432_v3 = vld [vmem:[#allocation5 + $0x368] sm:$0xff]  ;;  %v418_v10 = vld [vmem:[#allocation5 + $0x2f8] sm:$0xff]  ;;  %v1481_v11 = vpack.c.bf16 %v400_v60, %v399_v59  ;;  %v2020_v18 = vsel %vm270_vm1, %v289_v57, %v290_v58  ;;  %v292_v20 = vrot.slane %v2000_v48, 2 }
  0x85   : > { %552 = vmatmul.mubr.f32.gmra.mrb[8].mxu0 %v1946_v38  ;;  %1504 = vmatprep.subr.bf16.mxu1 %v1503_v21  ;;  %v449_v13 = vld [vmem:[#allocation5 + $0x3f0] sm:$0xff]  ;;  %v450_v14 = vld [vmem:[#allocation5 + $0x3f8] sm:$0xff]  ;;  %v1513_v19 = vpack.c.bf16 %v432_v3, %v431_v1  ;;  %v293_v21 = vrot.slane %v2002_v50, 2  ;;  %v1483_v28 = vpack.c.bf16 %v418_v10, %v417_v9  ;;  %v451_v34 = vld [vmem:[#allocation5 + $0x400] sm:$0xff] }
  0x86   : > { %657 = vmatmul.mubr.f32.gmra.mrb[8].mxu1 %v1990_v31  ;;  %1474 = vmatpush3.bf16.msra.mxu0 %v1473_v26  ;;  %v401_v16 = vld [vmem:[#allocation5 + $0x270] sm:$0xff]  ;;  %v402_v22 = vld [vmem:[#allocation5 + $0x278] sm:$0xff]  ;;  %v2026_v26 = vsel %vm237_vm0, %v259_v4, %v260_v6  ;;  %v1515_v33 = vpack.c.bf16 %v450_v14, %v449_v13  ;;  %v452_v35 = vld [vmem:[#allocation5 + $0x408] sm:$0xff] }
  0x87   : > { %1506 = vmatpush3.bf16.msra.mxu1 %v1505_v32  ;;  %556 = vmatprep.mubr.f32.mxu0 %v1996_v37  ;;  %v433_v23 = vld [vmem:[#allocation5 + $0x370] sm:$0xff]  ;;  %v434_v25 = vld [vmem:[#allocation5 + $0x378] sm:$0xff]  ;;  %v2029_v32 = vld [vmem:[#allocation2 + $0x80] sm:$0xff]  ;;  %v1485_v40 = vpack.c.bf16 %v402_v22, %v401_v16  ;;  %v2034_v42 = vsel %vm270_vm1, %v292_v20, %v293_v21 }
  0x88   : > { %661 = vmatprep.mubr.f32.mxu1 %v1986_v27  ;;  %1476 = vmatprep.subr.bf16.mxu0 %v1475_v39  ;;  %v220_v29 = vld [vmem:[#allocation2 + $0x98] sm:$0x3]  ;;  %v1517_v41 = vpack.c.bf16 %v434_v25, %v433_v23  ;;  %v453_v49 = vld [vmem:[#allocation5 + $0x410] sm:$0xff]  ;;  %v305_v58 = vrot.slane %v2029_v32, 1  ;;  %v463_v59 = vld [vmem:[#allocation5 + $0x460] sm:$0xff] }
  0x89   : > { %557 = vmatmul.mubr.f32.gmra.mrb[10].mxu0 %v1967_v2  ;;  %1508 = vmatprep.subr.bf16.mxu1 %v1507_v46  ;;  %v316_v36 = vrot.slane %v220_v29, 1  ;;  %v320_v39 = vrot.slane %v220_v29, 2  ;;  %v1519_v46 = vpack.c.bf16 %v452_v35, %v451_v34  ;;  %v454_v50 = vld [vmem:[#allocation5 + $0x418] sm:$0xff]  ;;  %v464_v60 = vld [vmem:[#allocation5 + $0x468] sm:$0xff]  ;;  %v465_v3 = vld [vmem:[#allocation5 + $0x470] sm:$0xff] }
  0x8a   : > { %662 = vmatmul.mubr.f32.gmra.mrb[10].mxu1 %v2007_v55  ;;  %1478 = vmatpush3.bf16.msra.mxu0 %v1477_v51  ;;  %v456_v51 = vld [vmem:[#allocation5 + $0x428] sm:$0xff]  ;;  %v458_v54 = vld [vmem:[#allocation5 + $0x438] sm:$0xff] }
  0x8b   : > { %1510 = vmatpush3.bf16.msra.mxu1 %v1509_v56  ;;  %561 = vmatprep.mubr.f32.mxu0 %v2012_v61  ;;  %v2038_v43 = vsel %vm237_vm0, %v1896_v15, %v316_v36  ;;  %v2042_v44 = vsel %vm270_vm1, %v1909_v47, %v320_v39  ;;  %v1523_v15 = vpack.c.bf16 %v454_v50, %v453_v49  ;;  %v455_v47 = vld [vmem:[#allocation5 + $0x420] sm:$0xff]  ;;  %v460_v56 = vld [vmem:[#allocation5 + $0x448] sm:$0xff]  ;;  %v462_v57 = vld [vmem:[#allocation5 + $0x458] sm:$0xff] }
  0x8c   : > { %666 = vmatprep.mubr.f32.mxu1 %v2000_v48  ;;  %1480 = vmatprep.subr.bf16.mxu0 %v1479_v63  ;;  %v1527_v53 = vpack.c.bf16 %v456_v51, %v455_v47  ;;  %v309_v63 = vrot.slane %v2029_v32, 2  ;;  %v466_v4 = vld [vmem:[#allocation5 + $0x478] sm:$0xff] }
  0x8d   : > { %562 = vmatmul.mubr.f32.gmra.mrb[12].mxu0 %v1986_v27  ;;  %1512 = vmatprep.subr.bf16.mxu1 %v1511_v7  ;;  %v1547_v6 = vpack.c.bf16 %v466_v4, %v465_v3 }
  0x8e   : > { %667 = vmatmul.mubr.f32.gmra.mrb[12].mxu1 %v2020_v18  ;;  %1482 = vmatpush3.bf16.msra.mxu0 %v1481_v11 }
  0x8f   : > { %1514 = vmatpush3.bf16.msra.mxu1 %v1513_v19  ;;  %566 = vmatprep.mubr.f32.mxu0 %v2026_v26 }
  0x90   : > { %671 = vmatprep.mubr.f32.mxu1 %v2029_v32  ;;  %1484 = vmatprep.subr.bf16.mxu0 %v1483_v28 }
  0x91   : > { %567 = vmatmul.mubr.f32.gmra.mrb[14].mxu0 %v2000_v48  ;;  %1516 = vmatprep.subr.bf16.mxu1 %v1515_v33 }
  0x92   : > { %672 = vmatmul.mubr.f32.gmra.mrb[14].mxu1 %v2034_v42  ;;  %1486 = vmatpush3.bf16.msra.mxu0 %v1485_v40 }
  0x93   : > { %1518 = vmatpush3.bf16.msra.mxu1 %v1517_v41  ;;  %741 = vmatprep.mubr.f32.mxu0 %v1935_v24  ;;  %v457_v24 = vld [vmem:[#allocation5 + $0x430] sm:$0xff] }
  0x94   : > { %846 = vmatprep.mubr.f32.mxu1 %v1941_v30  ;;  %1520 = vmatprep.subr.bf16.mxu0 %v1519_v46 }
  0x95   : > { %742 = vmatmul.mubr.f32.vlgmr.msra.gmra.mrb[16].mxu0 %v1923_v8  ;;  %1551 = vmatprep.subr.bf16.mxu1 %v1519_v46  ;;  %v459_v8 = vld [vmem:[#allocation5 + $0x440] sm:$0xff] }
  0x96   : > { %847 = vmatmul.mubr.f32.vlgmr.msra.gmra.mrb[16].mxu1 %v1915_v62  ;;  %1522 = vmatpush3.bf16.msra.mxu0 %v1519_v46  ;;  %v1531_v62 = vpack.c.bf16 %v458_v54, %v457_v24 }
  0x97   : > { %1559 = vmatpush3.bf16.msra.mxu1 %v1519_v46  ;;  %746 = vmatprep.mubr.f32.mxu0 %v1954_v45 }
  0x98   : > { %851 = vmatprep.mubr.f32.mxu1 %v1960_v52  ;;  %1524 = vmatprep.subr.bf16.mxu0 %v1523_v15 }
  0x99   : > { %747 = vmatmul.mubr.f32.gmra.mrb[18].mxu0 %v1941_v30  ;;  %1552 = vmatprep.subr.bf16.mxu1 %v1523_v15  ;;  %v461_v30 = vld [vmem:[#allocation5 + $0x450] sm:$0xff] }
  0x9a   : > { %852 = vmatmul.mubr.f32.gmra.mrb[18].mxu1 %v1928_v17  ;;  %1526 = vmatpush3.bf16.msra.mxu0 %v1523_v15  ;;  %v1535_v17 = vpack.c.bf16 %v460_v56, %v459_v8 }
  0x9b   : > { %1560 = vmatpush3.bf16.msra.mxu1 %v1523_v15  ;;  %751 = vmatprep.mubr.f32.mxu0 %v1973_v5 }
  0x9c   : > { %856 = vmatprep.mubr.f32.mxu1 %v1979_v12  ;;  %1528 = vmatprep.subr.bf16.mxu0 %v1527_v53 }
  0x9d   : > { %752 = vmatmul.mubr.f32.gmra.mrb[20].mxu0 %v1960_v52  ;;  %1553 = vmatprep.subr.bf16.mxu1 %v1527_v53  ;;  %v218_v52 = vld [vmem:[#allocation2 + $0x88] sm:$0x3] }
  0x9e   : > { %857 = vmatmul.mubr.f32.gmra.mrb[20].mxu1 %v1946_v38  ;;  %1530 = vmatpush3.bf16.msra.mxu0 %v1527_v53  ;;  %v1539_v38 = vpack.c.bf16 %v462_v57, %v461_v30  ;;  %v310_v1 = vrot.slane %v218_v52, 2 }
  0x9f   : > { %1561 = vmatpush3.bf16.msra.mxu1 %v1527_v53  ;;  %756 = vmatprep.mubr.f32.mxu0 %v1990_v31 }
  0xa0   : > { %861 = vmatprep.mubr.f32.mxu1 %v1996_v37  ;;  %1532 = vmatprep.subr.bf16.mxu0 %v1531_v62 }
  0xa1   : > { %757 = vmatmul.mubr.f32.gmra.mrb[22].mxu0 %v1979_v12  ;;  %1554 = vmatprep.subr.bf16.mxu1 %v1531_v62  ;;  %v306_v12 = vrot.slane %v218_v52, 1 }
  0xa2   : > { %862 = vmatmul.mubr.f32.gmra.mrb[22].mxu1 %v1967_v2  ;;  %1534 = vmatpush3.bf16.msra.mxu0 %v1531_v62  ;;  %v1543_v2 = vpack.c.bf16 %v464_v60, %v463_v59 }
  0xa3   : > { %1562 = vmatpush3.bf16.msra.mxu1 %v1531_v62  ;;  %761 = vmatprep.mubr.f32.mxu0 %v2007_v55 }
  0xa4   : > { %866 = vmatprep.mubr.f32.mxu1 %v2012_v61  ;;  %1536 = vmatprep.subr.bf16.mxu0 %v1535_v17 }
  0xa5   : > { %762 = vmatmul.mubr.f32.gmra.mrb[24].mxu0 %v1996_v37  ;;  %1555 = vmatprep.subr.bf16.mxu1 %v1535_v17  ;;  %v307_v37 = vsel %vm237_vm0, %v305_v58, %v306_v12 }
  0xa6   : > { %867 = vmatmul.mubr.f32.gmra.mrb[24].mxu1 %v1986_v27  ;;  %1538 = vmatpush3.bf16.msra.mxu0 %v1535_v17  ;;  %v311_v27 = vsel %vm270_vm1, %v309_v63, %v310_v1 }
  0xa7   : > { %1563 = vmatpush3.bf16.msra.mxu1 %v1535_v17  ;;  %766 = vmatprep.mubr.f32.mxu0 %v2020_v18 }
  0xa8   : > { %871 = vmatprep.mubr.f32.mxu1 %v2026_v26  ;;  %1540 = vmatprep.subr.bf16.mxu0 %v1539_v38 }
  0xa9   : > { %767 = vmatmul.mubr.f32.gmra.mrb[26].mxu0 %v2012_v61  ;;  %1556 = vmatprep.subr.bf16.mxu1 %v1539_v38 }
  0xaa   : > { %872 = vmatmul.mubr.f32.gmra.mrb[26].mxu1 %v2000_v48  ;;  %1542 = vmatpush3.bf16.msra.mxu0 %v1539_v38 }
  0xab   : > { %1564 = vmatpush3.bf16.msra.mxu1 %v1539_v38  ;;  %771 = vmatprep.mubr.f32.mxu0 %v2034_v42 }
  0xac   : > { %876 = vmatprep.mubr.f32.mxu1 %v307_v37  ;;  %1544 = vmatprep.subr.bf16.mxu0 %v1543_v2 }
  0xad   : > { %772 = vmatmul.mubr.f32.gmra.mrb[28].mxu0 %v2026_v26  ;;  %1557 = vmatprep.subr.bf16.mxu1 %v1543_v2 }
  0xae   : > { %877 = vmatmul.mubr.f32.gmra.mrb[28].mxu1 %v2029_v32  ;;  %1546 = vmatpush3.bf16.msra.mxu0 %v1543_v2 }
  0xaf   : > { %1565 = vmatpush3.bf16.msra.mxu1 %v1543_v2  ;;  %776 = vmatprep.mubr.f32.mxu0 %v311_v27 }
  0xb0   : > { %881 = vmatprep.mubr.f32.mxu1 %v2038_v43  ;;  %1548 = vmatprep.subr.bf16.mxu0 %v1547_v6 }
  0xb1   : > { %777 = vmatmul.mubr.f32.gmra.mrb[30].mxu0 %v307_v37  ;;  %1558 = vmatprep.subr.bf16.mxu1 %v1547_v6 }
  0xb2   : > { %882 = vmatmul.mubr.f32.gmra.mrb[30].mxu1 %v1723_v0  ;;  %1550 = vmatpush3.bf16.msra.mxu0 %v1547_v6 }
  0xb3   : > { %1566 = vmatpush3.bf16.msra.mxu1 %v1547_v6  ;;  %1379 = vmatprep.mubr.f32.mxu0 %v1954_v45 }
  0xb4   : > { %1385 = vmatprep.mubr.f32.mxu1 %v2020_v18 }
  0xb5   : > { %1380 = vmatmul.mubr.f32.vlgmr.msra.gmra.mrb[32].mxu0 %v1973_v5 }
  0xb6   : > { %1386 = vmatmul.mubr.f32.vlgmr.msra.gmra.mrb[32].mxu1 %v2034_v42  ;;  %1382 = vmatprep.mubr.f32.mxu0 %v1990_v31 }
  0xb7   : > { %1388 = vmatprep.mubr.f32.mxu1 %v311_v27 }
  0xb9   : > { %1383 = vmatmul.mubr.f32.gmra.mrb[34].mxu0 %v2007_v55 }
  0xba   : > { %1389 = vmatmul.mubr.f32.gmra.mrb[34].mxu1 %v2042_v44 }
 0x148   : > { %v1131_v48 = vpop.f32.mrb[0].mxu0 }
 0x149   : > { %v1187_v61 = vpop.f32.mrb[0].mxu1  ;;  %v1132_v0 = vpop.f32.mrb[1].mxu0 }
 0x14a   : > { %v1133_v7 = vadd.f32 %v1132_v0, %v1131_v48  ;;  %v1188_v9 = vpop.f32.mrb[1].mxu1 }
 0x14b   : > { %v1189_v10 = vadd.f32 %v1188_v9, %v1187_v61 }
 0x14c   : > { %v1134_v45 = vpop.f32.mrb[2].mxu0 }
 0x14d   : > { %v639_v11 = vadd.f32 %v1189_v10, %v1133_v7  ;;  %v1190_v13 = vpop.f32.mrb[2].mxu1  ;;  %v1135_v14 = vpop.f32.mrb[3].mxu0 }
 0x14e   : > { %v1136_v5 = vadd.f32 %v1135_v14, %v1134_v45  ;;  %v1191_v16 = vpop.f32.mrb[3].mxu1 }
 0x14f   : > { %v1192_v18 = vadd.f32 %v1191_v16, %v1190_v13 }
 0x150   : > { %v1137_v19 = vpop.f32.mrb[4].mxu0 }
 0x151   : > { %v644_v31 = vadd.f32 %v1192_v18, %v1136_v5  ;;  %v1193_v20 = vpop.f32.mrb[4].mxu1  ;;  %v1138_v21 = vpop.f32.mrb[5].mxu0 }
 0x152   : > { %v1139_v55 = vadd.f32 %v1138_v21, %v1137_v19  ;;  %v1194_v22 = vpop.f32.mrb[5].mxu1 }
 0x153   : > { %v1195_v23 = vadd.f32 %v1194_v22, %v1193_v20 }
 0x154   : > { %v1140_v25 = vpop.f32.mrb[6].mxu0 }
 0x155   : > { %v649_v26 = vadd.f32 %v1195_v23, %v1139_v55  ;;  %v1196_v28 = vpop.f32.mrb[6].mxu1  ;;  %v1141_v29 = vpop.f32.mrb[7].mxu0 }
 0x156   : > { %v1142_v32 = vadd.f32 %v1141_v29, %v1140_v25  ;;  %v1197_v33 = vpop.f32.mrb[7].mxu1 }
 0x157   : > { %v1198_v34 = vadd.f32 %v1197_v33, %v1196_v28 }
 0x158   : > { %v1143_v35 = vpop.f32.mrb[8].mxu0 }
 0x159   : > { %v654_v36 = vadd.f32 %v1198_v34, %v1142_v32  ;;  %v1199_v39 = vpop.f32.mrb[8].mxu1  ;;  %v1144_v40 = vpop.f32.mrb[9].mxu0 }
 0x15a   : > { %v1145_v41 = vadd.f32 %v1144_v40, %v1143_v35  ;;  %v1200_v42 = vpop.f32.mrb[9].mxu1 }
 0x15b   : > { %v1201_v43 = vadd.f32 %v1200_v42, %v1199_v39 }
 0x15c   : > { %v1146_v44 = vpop.f32.mrb[10].mxu0 }
 0x15d   : > { %v659_v46 = vadd.f32 %v1201_v43, %v1145_v41  ;;  %v1202_v49 = vpop.f32.mrb[10].mxu1  ;;  %v1147_v50 = vpop.f32.mrb[11].mxu0 }
 0x15e   : > { %v1148_v15 = vadd.f32 %v1147_v50, %v1146_v44  ;;  %v1203_v47 = vpop.f32.mrb[11].mxu1 }
 0x15f   : > { %v1204_v51 = vadd.f32 %v1203_v47, %v1202_v49 }
 0x160   : > { %v1149_v53 = vpop.f32.mrb[12].mxu0 }
 0x161   : > { %v664_v24 = vadd.f32 %v1204_v51, %v1148_v15  ;;  %v1205_v54 = vpop.f32.mrb[12].mxu1  ;;  %v1150_v62 = vpop.f32.mrb[13].mxu0 }
 0x162   : > { %v1151_v8 = vadd.f32 %v1150_v62, %v1149_v53  ;;  %v1206_v56 = vpop.f32.mrb[13].mxu1 }
 0x163   : > { %v1207_v17 = vadd.f32 %v1206_v56, %v1205_v54 }
 0x164   : > { %v1152_v30 = vpop.f32.mrb[14].mxu0 }
 0x165   : > { %v669_v57 = vadd.f32 %v1207_v17, %v1151_v8  ;;  %v1208_v52 = vpop.f32.mrb[14].mxu1  ;;  %v1153_v38 = vpop.f32.mrb[15].mxu0 }
 0x166   : > { %v1154_v58 = vadd.f32 %v1153_v38, %v1152_v30  ;;  %v1209_v12 = vpop.f32.mrb[15].mxu1 }
 0x167   : > { %v1210_v59 = vadd.f32 %v1209_v12, %v1208_v52 }
 0x168   : > { %v1243_v60 = vpop.f32.mrb[16].mxu0 }
 0x169   : > { %v674_v2 = vadd.f32 %v1210_v59, %v1154_v58  ;;  %v1244_v63 = vpop.f32.mrb[17].mxu0  ;;  %v1299_v1 = vpop.f32.mrb[16].mxu1 }
 0x16a   : > { %v1245_v37 = vadd.f32 %v1244_v63, %v1243_v60  ;;  %v1300_v3 = vpop.f32.mrb[17].mxu1 }
 0x16b   : > { %v1301_v4 = vadd.f32 %v1300_v3, %v1299_v1 }
 0x16c   : > { %v744_v27 = vadd.f32 %v1245_v37, %v639_v11  ;;  %v1246_v6 = vpop.f32.mrb[18].mxu0 }
 0x16d   : > { %v1247_v48 = vpop.f32.mrb[19].mxu0  ;;  %v1302_v61 = vpop.f32.mrb[18].mxu1 }
 0x16e   : > { %v1248_v0 = vadd.f32 %v1247_v48, %v1246_v6  ;;  %v1303_v7 = vpop.f32.mrb[19].mxu1  ;;  %v849_v9 = vadd.f32 %v1301_v4, %v744_v27 }
 0x16f   : > { %v1304_v10 = vadd.f32 %v1303_v7, %v1302_v61 }
 0x170   : > { %v749_v45 = vadd.f32 %v1248_v0, %v644_v31  ;;  %v1249_v13 = vpop.f32.mrb[20].mxu0 }
 0x171   : > { %v1250_v14 = vpop.f32.mrb[21].mxu0  ;;  %v1305_v5 = vpop.f32.mrb[20].mxu1 }
 0x172   : > { %v1251_v16 = vadd.f32 %v1250_v14, %v1249_v13  ;;  %v1306_v18 = vpop.f32.mrb[21].mxu1  ;;  %v854_v19 = vadd.f32 %v1304_v10, %v749_v45 }
 0x173   : > { %v1307_v20 = vadd.f32 %v1306_v18, %v1305_v5 }
 0x174   : > { %v754_v21 = vadd.f32 %v1251_v16, %v649_v26  ;;  %v1252_v55 = vpop.f32.mrb[22].mxu0 }
 0x175   : > { %v1253_v22 = vpop.f32.mrb[23].mxu0  ;;  %v1308_v23 = vpop.f32.mrb[22].mxu1 }
 0x176   : > { %v1254_v11 = vadd.f32 %v1253_v22, %v1252_v55  ;;  %v1309_v25 = vpop.f32.mrb[23].mxu1  ;;  %v859_v28 = vadd.f32 %v1307_v20, %v754_v21 }
 0x177   : > { %v1310_v29 = vadd.f32 %v1309_v25, %v1308_v23 }
 0x178   : > { %v759_v32 = vadd.f32 %v1254_v11, %v654_v36  ;;  %v1255_v33 = vpop.f32.mrb[24].mxu0 }
 0x179   : > { %v1256_v34 = vpop.f32.mrb[25].mxu0  ;;  %v1311_v35 = vpop.f32.mrb[24].mxu1 }
 0x17a   : > { %v1257_v31 = vadd.f32 %v1256_v34, %v1255_v33  ;;  %v1312_v39 = vpop.f32.mrb[25].mxu1  ;;  %v864_v40 = vadd.f32 %v1310_v29, %v759_v32 }
 0x17b   : > { %v1313_v41 = vadd.f32 %v1312_v39, %v1311_v35 }
 0x17c   : > { %v764_v42 = vadd.f32 %v1257_v31, %v659_v46  ;;  %v1258_v43 = vpop.f32.mrb[26].mxu0 }
 0x17d   : > { %v1259_v44 = vpop.f32.mrb[27].mxu0  ;;  %v1314_v49 = vpop.f32.mrb[26].mxu1 }
 0x17e   : > { %v1260_v26 = vadd.f32 %v1259_v44, %v1258_v43  ;;  %v1315_v50 = vpop.f32.mrb[27].mxu1  ;;  %v869_v15 = vadd.f32 %v1313_v41, %v764_v42 }
 0x17f   : > { %v1316_v47 = vadd.f32 %v1315_v50, %v1314_v49 }
 0x180   : > { %v769_v51 = vadd.f32 %v1260_v26, %v664_v24  ;;  %v1261_v53 = vpop.f32.mrb[28].mxu0 }
 0x181   : > { %v1262_v54 = vpop.f32.mrb[29].mxu0  ;;  %v1317_v62 = vpop.f32.mrb[28].mxu1 }
 0x182   : > { %v1263_v36 = vadd.f32 %v1262_v54, %v1261_v53  ;;  %v1318_v8 = vpop.f32.mrb[29].mxu1  ;;  %v874_v56 = vadd.f32 %v1316_v47, %v769_v51 }
 0x183   : > { %v1319_v17 = vadd.f32 %v1318_v8, %v1317_v62  ;;  %v1724_v8 = vmov (!%p2127_p8), 0.0  }
 0x184   : > { %v774_v30 = vadd.f32 %v1263_v36, %v669_v57  ;;  %v1264_v52 = vpop.f32.mrb[30].mxu0  ;;  %1032 = vst [vmem:[%s2113_s2] sm:$0x3] (!%p2127_p8), %v1724_v8 }
 0x185   : > { %v1265_v38 = vpop.f32.mrb[31].mxu0  ;;  %v1320_v58 = vpop.f32.mrb[30].mxu1 }
 0x186   : > { %v1266_v46 = vadd.f32 %v1265_v38, %v1264_v52  ;;  %v1321_v12 = vpop.f32.mrb[31].mxu1  ;;  %v879_v59 = vadd.f32 %v1319_v17, %v774_v30 }
 0x187   : > { %v1322_v60 = vadd.f32 %v1321_v12, %v1320_v58 }
 0x188   : > { %v779_v63 = vadd.f32 %v1266_v46, %v674_v2  ;;  %v1381_v1 = vpop.f32.mrb[32].mxu0 }
 0x189   : > { %v959_v37 = vadd.f32 %v1381_v1, %v854_v19  ;;  %v1387_v3 = vpop.f32.mrb[32].mxu1  ;;  %v953_v24 = vpop.f32.mrb[33].mxu0 }
 0x18a   : > { %v979_v4 = vadd.f32 %v1387_v3, %v874_v56  ;;  %v954_v27 = vadd.f32 %v953_v24, %v849_v9  ;;  %v973_v6 = vpop.f32.mrb[33].mxu1  ;;  %v884_v48 = vadd.f32 %v1322_v60, %v779_v63 }
 0x18b   : > { %v1006_v61 = vmul.f32 %v959_v37, %v959_v37  ;;  %v974_v0 = vadd.f32 %v973_v6, %v869_v15 }
 0x18c   : > { %v992_v7 = vadd.f32 %v959_v37, %v954_v27  ;;  %v1005_v57 = vmul.f32 %v954_v27, %v954_v27  ;;  %v1384_v10 = vpop.f32.mrb[34].mxu0  ;;  %v1010_v29 = vmul.f32 %v979_v4, %v979_v4 }
 0x18d   : > { %v969_v45 = vadd.f32 %v1384_v10, %v864_v40  ;;  %v1390_v13 = vpop.f32.mrb[34].mxu1  ;;  %v963_v14 = vpop.f32.mrb[35].mxu0  ;;  %v1009_v23 = vmul.f32 %v974_v0, %v974_v0 }
 0x18e   : > { %v1013_v5 = vadd.f32 %v1006_v61, %v1005_v57  ;;  %v989_v16 = vadd.f32 %v1390_v13, %v884_v48  ;;  %v964_v18 = vadd.f32 %v963_v14, %v859_v28  ;;  %v983_v2 = vpop.f32.mrb[35].mxu1 }
 0x18f   : > { %v984_v20 = vadd.f32 %v983_v2, %v879_v59  ;;  %v1008_v55 = vmul.f32 %v969_v45, %v969_v45 }
 0x190   : > { %v993_v19 = vadd.f32 %v992_v7, %v964_v18  ;;  %v1007_v21 = vmul.f32 %v964_v18, %v964_v18  ;;  %v1012_v39 = vmul.f32 %v989_v16, %v989_v16 }
 0x191   : > { %v1011_v35 = vmul.f32 %v984_v20, %v984_v20 }
 0x192   : > { %v994_v22 = vadd.f32 %v993_v19, %v969_v45  ;;  %v1014_v9 = vadd.f32 %v1013_v5, %v1007_v21 }
 0x194   : > { %v1015_v11 = vadd.f32 %v1014_v9, %v1008_v55  ;;  %v995_v25 = vadd.f32 %v994_v22, %v974_v0 }
 0x196   : > { %v996_v32 = vadd.f32 %v995_v25, %v979_v4  ;;  %v1016_v33 = vadd.f32 %v1015_v11, %v1009_v23 }
 0x198   : > { %v997_v34 = vadd.f32 %v996_v32, %v984_v20  ;;  %v1017_v31 = vadd.f32 %v1016_v33, %v1010_v29 }
 0x19a   : > { %v998_v40 = vadd.f32 %v997_v34, %v989_v16  ;;  %v1018_v41 = vadd.f32 %v1017_v31, %v1011_v35 }
 0x19c   : > { %v999_v28 = vrot.slane %v998_v40, 4  ;;  %v1019_v42 = vadd.f32 %v1018_v41, %v1012_v39 }
 0x19e   : > { %v1000_v43 = vadd.f32 %v999_v28, %v998_v40  ;;  %v1020_v44 = vrot.slane %v1019_v42, 4 }
 0x1a0   : > { %v1001_v49 = vrot.slane %v1000_v43, 2  ;;  %v1021_v26 = vadd.f32 %v1020_v44, %v1019_v42 }
 0x1a2   : > { %v1002_v50 = vadd.f32 %v1001_v49, %v1000_v43  ;;  %v1022_v15 = vrot.slane %v1021_v26, 2 }
 0x1a4   : > { %v1003_v47 = vrot.slane %v1002_v50, 1  ;;  %v1023_v51 = vadd.f32 %v1022_v15, %v1021_v26  ;;  %1031 = sbr.rel (%p2127_p8) target bundleno = 427 (0x1ab), region = 40 }
 0x1a6   : > { %v1024_v53 = vrot.slane %v1023_v51, 1  ;;  %v1004_v54 = vadd.f32 %v1003_v47, %v1002_v50 }
 0x1a8   : > { %v1025_v62 = vadd.f32 %v1024_v53, %v1023_v51 }
 0x1aa   : > { %v1027_v36 = vsel %vm1026_vm2, %v1004_v54, %v1025_v62 }
 0x1ab PF: > { %v1033_v56 = vld [vmem:[%s2113_s2] sm:$0x3] }
 0x1ac   : > { %v1034_v17 = vadd.f32 %v1033_v56, %v1027_v36 }
 0x1ae   : > { %1035 = vst [vmem:[%s2113_s2] sm:$0x3] %v1034_v17 }
 0x1af PF: > { %p13_p7 = scmp.ge.s32.totalorder %s1789_s21, 4   ;;  %s2128_s9 = smov %s1709_s10 }
 0x1b0   : > { %s2129_s10 = smov %s1713_s11  ;;  %s2130_s11 = smov %s1818_s8 }
 0x1b1   : > { %s2131_s12 = smov %s1789_s21  ;;  %15 = sbr.rel (!%p13_p7) target bundleno = 4 (0x4), region = 73 }
 0x1b8   :  { %1047 = vsyncpa [#allocation4], 1 }
 0x1b9   :  { %1049 = vsyncpa [#allocation4 + $0x1], 1 }
 0x1ba   :  { %1050 = vsyncpa [#allocation6], 1 }

// kernel: basic_block_forward_nhwc.5
= control target key start
LH: loop header
LB: loop body
LE: loop exit
PB: predicated region body
PF: predicated region fallthrough
CT: control target
= control target key end

     0   :  { %12 = vsyncpa [#allocation5], 0  ;;  %s4555_s0 = inlined_call_operand.vmem [shape: f32[2,8,8,128], index: 0, kind: input, shape index: {}]   ;;  %s4556_s1 = inlined_call_operand.vmem [shape: f32[1152,128], index: 1, kind: input, shape index: {}]   ;;  %s4557_s2 = inlined_call_operand.vmem [shape: f32[1152,128], index: 2, kind: input, shape index: {}]   ;;  %s4558_s3 = inlined_call_operand.vmem [shape: f32[1,128], index: 3, kind: input, shape index: {}]   ;;  %s4559_s4 = inlined_call_operand.vmem [shape: f32[1,128], index: 4, kind: input, shape index: {}]   ;;  %s4560_s5 = inlined_call_operand.vmem [shape: f32[1,128], index: 5, kind: input, shape index: {}]   ;;  %s4561_s6 = inlined_call_operand.vmem [shape: f32[1,128], index: 6, kind: input, shape index: {}]   ;;  %s4562_s7 = inlined_call_operand.hbm [shape: f32[128,128], index: 7, kind: output, shape index: {}]  }
   0x1   :  { %14 = vsyncpa [#allocation5 + $0x1], 0  ;;  %s3173_s24 = smov 0   ;;  %s3175_s25 = smov 0  }
   0x2   :  { %s3177_s26 = smov 0   ;;  %s3179_s27 = smov 0  }
   0x3 LB: > { %s3194_s28 = sadd.s32 4294967295, %s3127_s27   ;;  %s2092_s29 = sadd.s32 4294967294, %s3127_s27   ;;  %s3127_s27 = sphi %s3179_s27, %s4568_s27   ;;  %s3123_s26 = sphi %s3177_s26, %s4567_s26   ;;  %s3119_s25 = sphi %s3175_s25, %s4566_s25   ;;  %s3115_s24 = sphi %s3173_s24, %s4565_s24  }
   0x4   : > { %s3198_s30 = sadd.s32 1, %s3127_s27   ;;  %s179_s8 = sadd.s32 1, %s3123_s26 }
   0x5   : > { %s176_s9 = ssub.s32 %s3127_s27, %s3198_s30  ;;  %p189_p0 = scmp.ne.s32.totalorder %s3123_s26, %s3119_s25 }
   0x6   : > { %p177_p1 = scmp.eq.s32.totalorder %s176_s9, 0  ;;  %p190_p2 = scmp.eq.s32.totalorder %s3194_s28, 1 }
   0x7   : > { %p195_p3 = scmp.ne.s32.totalorder %s3119_s25, %s3115_s24  ;;  %p196_p4 = scmp.eq.s32.totalorder %s2092_s29, 1 }
   0x8   : > { %s3209_s10 = scalar_select %p177_p1, %s3123_s26, %s179_s8  }
   0x9   : > { %p3211_p5 = por %p190_p2, %p189_p0  ;;  %p3215_p6 = por %p196_p4, %p195_p3 }
   0xa   : > { %p2095_p7 = scmp.ge.s32.totalorder %s3127_s27, 1  ;;  %p240_p8 = scmp.lt.s32.totalorder %s3127_s27, 3 }
   0xc   : > { %p241_p9 = pnand %p2095_p7, %p240_p8 }
   0xd   : > { %v453_v0 = vld [vmem:[%s4556_s1 + $0x80] sm:$0xff] (!%p241_p9)  ;;  %v454_v1 = vld [vmem:[%s4556_s1 + $0x88] sm:$0xff] (!%p241_p9)  ;;  %v3129_v7 = vmov (!%p241_p9), 0.0   ;;  %v455_v12 = vld [vmem:[%s4556_s1 + $0x90] sm:$0xff] (!%p241_p9)  ;;  %p272_p10 = scmp.lt.s32.totalorder (!%p241_p9), %s3194_s28, 1  ;;  %vm351_vm0 = vcmask (!%p241_p9), 1046528  }
   0xe   : > { %244 = sbr.rel (%p241_p9) target bundleno = 657 (0x291), region = 48  ;;  %v485_v2 = vld [vmem:[%s4556_s1 + $0x180] sm:$0xff] (!%p241_p9)  ;;  %v2694_v3 = vpack.c.bf16 (!%p241_p9), %v454_v1, %v453_v0  ;;  %v486_v4 = vld [vmem:[%s4556_s1 + $0x188] sm:$0xff] (!%p241_p9)  ;;  %286 = vst [vmem:[#allocation2] sm:$0xff] (!%p241_p9), %v3129_v7  ;;  %287 = vst [vmem:[#allocation2 + $0x8] sm:$0x3] (!%p241_p9), %v3129_v7 }
   0xf   : > { %v437_v5 = vld [vmem:[%s4556_s1] sm:$0xff] (!%p241_p9)  ;;  %v438_v6 = vld [vmem:[%s4556_s1 + $0x8] sm:$0xff] (!%p241_p9)  ;;  %288 = vst [vmem:[#allocation2 + $0x10] sm:$0xff] (!%p241_p9), %v3129_v7  ;;  %289 = vst [vmem:[#allocation2 + $0x18] sm:$0x3] (!%p241_p9), %v3129_v7  ;;  %v2726_v8 = vpack.c.bf16 (!%p241_p9), %v486_v4, %v485_v2  ;;  %vm384_vm1 = vcmask (!%p241_p9), 1045504  }
  0x10   : > { %290 = vst [vmem:[#allocation2 + $0x20] sm:$0xff] (!%p241_p9), %v3129_v7  ;;  %291 = vst [vmem:[#allocation2 + $0x28] sm:$0x3] (!%p241_p9), %v3129_v7  ;;  %v2696_v9 = vpack.c.bf16 (!%p241_p9), %v438_v6, %v437_v5  ;;  %v469_v10 = vld [vmem:[%s4556_s1 + $0x100] sm:$0xff] (!%p241_p9)  ;;  %v470_v11 = vld [vmem:[%s4556_s1 + $0x108] sm:$0xff] (!%p241_p9)  ;;  %2695 = vmatprep.subr.bf16.mxu0 (!%p241_p9), %v2694_v3  ;;  %s269_s22 = sand.u32 (!%p241_p9), 1, %s3119_s25  }
  0x11   : > { %292 = vst [vmem:[#allocation2 + $0x30] sm:$0xff] (!%p241_p9), %v3129_v7  ;;  %293 = vst [vmem:[#allocation2 + $0x38] sm:$0x3] (!%p241_p9), %v3129_v7  ;;  %v2728_v13 = vpack.c.bf16 (!%p241_p9), %v470_v11, %v469_v10  ;;  %v456_v14 = vld [vmem:[%s4556_s1 + $0x98] sm:$0xff] (!%p241_p9)  ;;  %v487_v15 = vld [vmem:[%s4556_s1 + $0x190] sm:$0xff] (!%p241_p9)  ;;  %2727 = vmatprep.subr.bf16.mxu1 (!%p241_p9), %v2726_v8  ;;  %s2096_s8 = sshll.u32 (!%p241_p9), %s269_s22, 6 }
  0x12   : > { %294 = vst [vmem:[#allocation2 + $0x40] sm:$0xff] (!%p241_p9), %v3129_v7  ;;  %295 = vst [vmem:[#allocation2 + $0x48] sm:$0x3] (!%p241_p9), %v3129_v7  ;;  %v488_v16 = vld [vmem:[%s4556_s1 + $0x198] sm:$0xff] (!%p241_p9)  ;;  %2697 = vmatpush3.bf16.msra.mxu0 (!%p241_p9), %v2696_v9  ;;  %v2698_v17 = vpack.c.bf16 (!%p241_p9), %v456_v14, %v455_v12  ;;  %v439_v19 = vld [vmem:[%s4556_s1 + $0x10] sm:$0xff] (!%p241_p9)  ;;  %s2109_s9 = sshll.u32 (!%p241_p9), %s3194_s28, 10 }
  0x13   : > { %296 = vst [vmem:[#allocation2 + $0x50] sm:$0xff] (!%p241_p9), %v3129_v7  ;;  %297 = vst [vmem:[#allocation2 + $0x58] sm:$0x3] (!%p241_p9), %v3129_v7  ;;  %v2730_v18 = vpack.c.bf16 (!%p241_p9), %v488_v16, %v487_v15  ;;  %v440_v20 = vld [vmem:[%s4556_s1 + $0x18] sm:$0xff] (!%p241_p9)  ;;  %v471_v21 = vld [vmem:[%s4556_s1 + $0x110] sm:$0xff] (!%p241_p9)  ;;  %2729 = vmatpush3.bf16.msra.mxu1 (!%p241_p9), %v2728_v13  ;;  %v3433_v15 = vrot.slane (!%p241_p9), %v3129_v7, 1  ;;  %s4506_s16 = scalar_lea.hbm (!%p241_p9), %s4562_s7, %s2109_s9 }
  0x14   : > { %298 = vst [vmem:[#allocation2 + $0x60] sm:$0xff] (!%p241_p9), %v3129_v7  ;;  %299 = vst [vmem:[#allocation2 + $0x68] sm:$0x3] (!%p241_p9), %v3129_v7  ;;  %v2700_v22 = vpack.c.bf16 (!%p241_p9), %v440_v20, %v439_v19  ;;  %v472_v23 = vld [vmem:[%s4556_s1 + $0x118] sm:$0xff] (!%p241_p9)  ;;  %v457_v24 = vld [vmem:[%s4556_s1 + $0xa0] sm:$0xff] (!%p241_p9)  ;;  %2699 = vmatprep.subr.bf16.mxu0 (!%p241_p9), %v2698_v17  ;;  %s3130_s18 = smov (!%p241_p9), [#allocation4]  }
  0x15   : > { %300 = vst [vmem:[#allocation2 + $0x70] sm:$0xff] %v3129_v7  ;;  %301 = vst [vmem:[#allocation2 + $0x78] sm:$0x3] %v3129_v7  ;;  %v458_v25 = vld [vmem:[%s4556_s1 + $0xa8] sm:$0xff]  ;;  %2731 = vmatprep.subr.bf16.mxu1 %v2730_v18  ;;  %v2732_v26 = vpack.c.bf16 %v472_v23, %v471_v21  ;;  %v489_v28 = vld [vmem:[%s4556_s1 + $0x1a0] sm:$0xff]  ;;  %s3370_s15 = scalar_select %p272_p10, %s3194_s28, 1 }
  0x16   : > { %302 = vst [vmem:[#allocation2 + $0x80] sm:$0xff] %v3129_v7  ;;  %303 = vst [vmem:[#allocation2 + $0x88] sm:$0x3] %v3129_v7  ;;  %v2702_v27 = vpack.c.bf16 %v458_v25, %v457_v24  ;;  %v490_v29 = vld [vmem:[%s4556_s1 + $0x1a8] sm:$0xff]  ;;  %v441_v30 = vld [vmem:[%s4556_s1 + $0x20] sm:$0xff]  ;;  %2701 = vmatpush3.bf16.msra.mxu0 %v2700_v22  ;;  %s4514_s28 = scalar_lea.sflag [#allocation5], %s269_s22 }
  0x17   : > { %305 = vst [vmem:[#allocation2 + $0x98] sm:$0x3] %v3129_v7  ;;  %1145 = vst [vmem:[#allocation3 + $0x8] sm:$0x3] %v3129_v7  ;;  %v2734_v31 = vpack.c.bf16 %v490_v29, %v489_v28  ;;  %v442_v32 = vld [vmem:[%s4556_s1 + $0x28] sm:$0xff]  ;;  %v473_v33 = vld [vmem:[%s4556_s1 + $0x120] sm:$0xff]  ;;  %2733 = vmatpush3.bf16.msra.mxu1 %v2732_v26 }
  0x18   : > { %1146 = vst [vmem:[#allocation3 + $0x10] sm:$0xff] %v3129_v7  ;;  %1147 = vst [vmem:[#allocation3 + $0x18] sm:$0x3] %v3129_v7  ;;  %v474_v34 = vld [vmem:[%s4556_s1 + $0x128] sm:$0xff]  ;;  %v2704_v35 = vpack.c.bf16 %v442_v32, %v441_v30  ;;  %v459_v36 = vld [vmem:[%s4556_s1 + $0xb0] sm:$0xff]  ;;  %2703 = vmatprep.subr.bf16.mxu0 %v2702_v27  ;;  %s2108_s19 = sshll.u32 %s3370_s15, 6 }
  0x19   : > { %1148 = vst [vmem:[#allocation3 + $0x20] sm:$0xff] %v3129_v7  ;;  %1149 = vst [vmem:[#allocation3 + $0x28] sm:$0x3] %v3129_v7  ;;  %v460_v37 = vld [vmem:[%s4556_s1 + $0xb8] sm:$0xff]  ;;  %v491_v38 = vld [vmem:[%s4556_s1 + $0x1b0] sm:$0xff]  ;;  %v2736_v39 = vpack.c.bf16 %v474_v34, %v473_v33  ;;  %2735 = vmatprep.subr.bf16.mxu1 %v2734_v31  ;;  %s3418_s21 = scalar_lea.vmem %s4555_s0, %s2108_s19  ;;  %s4493_s15 = scalar_lea.vmem [#allocation4], %s2096_s8 }
  0x1a   : > { %1150 = vst [vmem:[#allocation3 + $0x30] sm:$0xff] %v3129_v7  ;;  %1151 = vst [vmem:[#allocation3 + $0x38] sm:$0x3] %v3129_v7  ;;  %v2706_v40 = vpack.c.bf16 %v460_v37, %v459_v36  ;;  %v492_v41 = vld [vmem:[%s4556_s1 + $0x1b8] sm:$0xff]  ;;  %v443_v42 = vld [vmem:[%s4556_s1 + $0x30] sm:$0xff]  ;;  %2705 = vmatpush3.bf16.msra.mxu0 %v2704_v35  ;;  %s2030_s13 = sshll.u32 %s4493_s15, 4  ;;  %s4508_s13 = int_to_ptr.vmem [resolvable:$true] %s2030_s13 }
  0x1b   : > { %1152 = vst [vmem:[#allocation3 + $0x40] sm:$0xff] %v3129_v7  ;;  %1153 = vst [vmem:[#allocation3 + $0x48] sm:$0x3] %v3129_v7  ;;  %v444_v43 = vld [vmem:[%s4556_s1 + $0x38] sm:$0xff]  ;;  %v2738_v44 = vpack.c.bf16 %v492_v41, %v491_v38  ;;  %v475_v45 = vld [vmem:[%s4556_s1 + $0x130] sm:$0xff]  ;;  %2737 = vmatpush3.bf16.msra.mxu1 %v2736_v39  ;;  %s3065_s17 = scalar_lea.vmem %s4508_s13, 1024 }
  0x1c   : > { %1154 = vst [vmem:[#allocation3 + $0x50] sm:$0xff] %v3129_v7  ;;  %1155 = vst [vmem:[#allocation3 + $0x58] sm:$0x3] %v3129_v7  ;;  %v476_v46 = vld [vmem:[%s4556_s1 + $0x138] sm:$0xff]  ;;  %v461_v47 = vld [vmem:[%s4556_s1 + $0xc0] sm:$0xff]  ;;  %v2708_v51 = vpack.c.bf16 %v444_v43, %v443_v42  ;;  %2707 = vmatprep.subr.bf16.mxu0 %v2706_v40  ;;  %p3066_p11 = scmp.ne.s32.totalorder %s4508_s13, %s3065_s17 }
  0x1d   : > { %1156 = vst [vmem:[#allocation3 + $0x60] sm:$0xff] %v3129_v7  ;;  %1157 = vst [vmem:[#allocation3 + $0x68] sm:$0x3] %v3129_v7  ;;  %v462_v48 = vld [vmem:[%s4556_s1 + $0xc8] sm:$0xff]  ;;  %v493_v49 = vld [vmem:[%s4556_s1 + $0x1c0] sm:$0xff]  ;;  %v2740_v52 = vpack.c.bf16 %v476_v46, %v475_v45  ;;  %2739 = vmatprep.subr.bf16.mxu1 %v2738_v44 }
  0x1e   : > { %1158 = vst [vmem:[#allocation3 + $0x70] sm:$0xff] %v3129_v7  ;;  %1159 = vst [vmem:[#allocation3 + $0x78] sm:$0x3] %v3129_v7  ;;  %v494_v50 = vld [vmem:[%s4556_s1 + $0x1c8] sm:$0xff]  ;;  %v2710_v53 = vpack.c.bf16 %v462_v48, %v461_v47  ;;  %v445_v54 = vld [vmem:[%s4556_s1 + $0x40] sm:$0xff]  ;;  %2709 = vmatpush3.bf16.msra.mxu0 %v2708_v51  ;;  %v3491_v47 = vrot.slane %v3129_v7, 2  ;;  %p3067_p12 = pnand %p3066_p11, %p3211_p5 }
  0x1f   : > { %1160 = vst [vmem:[#allocation3 + $0x80] sm:$0xff] %v3129_v7  ;;  %1161 = vst [vmem:[#allocation3 + $0x88] sm:$0x3] %v3129_v7  ;;  %v446_v55 = vld [vmem:[%s4556_s1 + $0x48] sm:$0xff]  ;;  %v477_v56 = vld [vmem:[%s4556_s1 + $0x140] sm:$0xff]  ;;  %v2742_v57 = vpack.c.bf16 %v494_v50, %v493_v49  ;;  %2741 = vmatpush3.bf16.msra.mxu1 %v2740_v52 }
  0x20   : > { %1163 = vst [vmem:[#allocation3 + $0x98] sm:$0x3] %v3129_v7  ;;  %v478_v58 = vld [vmem:[%s4556_s1 + $0x148] sm:$0xff]  ;;  %v463_v59 = vld [vmem:[%s4556_s1 + $0xd0] sm:$0xff]  ;;  %v464_v60 = vld [vmem:[%s4556_s1 + $0xd8] sm:$0xff]  ;;  %v2712_v63 = vpack.c.bf16 %v446_v55, %v445_v54  ;;  %2711 = vmatprep.subr.bf16.mxu0 %v2710_v53  ;;  %p3068_p13 = pneg %p3067_p12 }
  0x21   : > { %v495_v61 = vld [vmem:[%s4556_s1 + $0x1d0] sm:$0xff]  ;;  %v496_v62 = vld [vmem:[%s4556_s1 + $0x1d8] sm:$0xff]  ;;  %v2744_v0 = vpack.c.bf16 %v478_v58, %v477_v56  ;;  %v2714_v1 = vpack.c.bf16 %v464_v60, %v463_v59  ;;  %2743 = vmatprep.subr.bf16.mxu1 %v2742_v57  ;;  %v465_v8 = vld [vmem:[%s4556_s1 + $0xe0] sm:$0xff] }
  0x22   : > { %v447_v2 = vld [vmem:[%s4556_s1 + $0x50] sm:$0xff]  ;;  %v448_v3 = vld [vmem:[%s4556_s1 + $0x58] sm:$0xff]  ;;  %v2746_v5 = vpack.c.bf16 %v496_v62, %v495_v61  ;;  %v466_v9 = vld [vmem:[%s4556_s1 + $0xe8] sm:$0xff]  ;;  %2713 = vmatpush3.bf16.msra.mxu0 %v2712_v63 }
  0x23   : > { %v479_v4 = vld [vmem:[%s4556_s1 + $0x150] sm:$0xff]  ;;  %v480_v6 = vld [vmem:[%s4556_s1 + $0x158] sm:$0xff]  ;;  %v497_v10 = vld [vmem:[%s4556_s1 + $0x1e0] sm:$0xff]  ;;  %v2716_v12 = vpack.c.bf16 %v448_v3, %v447_v2  ;;  %2745 = vmatpush3.bf16.msra.mxu1 %v2744_v0  ;;  %2715 = vmatprep.subr.bf16.mxu0 %v2714_v1  ;;  %v2718_v17 = vpack.c.bf16 %v466_v9, %v465_v8 }
  0x24   : > { %v498_v11 = vld [vmem:[%s4556_s1 + $0x1e8] sm:$0xff]  ;;  %v449_v13 = vld [vmem:[%s4556_s1 + $0x60] sm:$0xff]  ;;  %v2748_v16 = vpack.c.bf16 %v480_v6, %v479_v4  ;;  %2747 = vmatprep.subr.bf16.mxu1 %v2746_v5  ;;  %v467_v23 = vld [vmem:[%s4556_s1 + $0xf0] sm:$0xff] }
  0x25   : > { %v450_v14 = vld [vmem:[%s4556_s1 + $0x68] sm:$0xff]  ;;  %v481_v18 = vld [vmem:[%s4556_s1 + $0x160] sm:$0xff]  ;;  %v2750_v21 = vpack.c.bf16 %v498_v11, %v497_v10  ;;  %v468_v24 = vld [vmem:[%s4556_s1 + $0xf8] sm:$0xff] }
  0x26   : > { %v3438_v19 = vld [vmem:[#allocation2 + $0x8] sm:$0x3]  ;;  %v278_v20 = vld [vmem:[%s3418_s21] sm:$0xff]  ;;  %v499_v26 = vld [vmem:[%s4556_s1 + $0x1f0] sm:$0xff]  ;;  %2717 = vmatpush3.bf16.msra.mxu0 %v2716_v12  ;;  %v2720_v28 = vpack.c.bf16 %v450_v14, %v449_v13  ;;  %v2722_v32 = vpack.c.bf16 %v468_v24, %v467_v23 }
  0x27   : > { %v482_v22 = vld [vmem:[%s4556_s1 + $0x168] sm:$0xff]  ;;  %v353_v25 = vrot.slane %v3438_v19, 1  ;;  %307 = vst [vmem:[#allocation2 + $0x11] sm:$0xff] %v278_v20  ;;  %v500_v27 = vld [vmem:[%s4556_s1 + $0x1f8] sm:$0xff]  ;;  %2749 = vmatpush3.bf16.msra.mxu1 %v2748_v16  ;;  %2719 = vmatprep.subr.bf16.mxu0 %v2718_v17  ;;  %v451_v33 = vld [vmem:[%s4556_s1 + $0x70] sm:$0xff]  ;;  %v386_v48 = vrot.slane %v3438_v19, 2 }
  0x28   : > { %v279_v30 = vld [vmem:[%s3418_s21 + $0x8] sm:$0xff]  ;;  %v2752_v31 = vpack.c.bf16 %v482_v22, %v481_v18  ;;  %v452_v34 = vld [vmem:[%s4556_s1 + $0x78] sm:$0xff]  ;;  %v483_v35 = vld [vmem:[%s4556_s1 + $0x170] sm:$0xff]  ;;  %2751 = vmatprep.subr.bf16.mxu1 %v2750_v21  ;;  %v2754_v36 = vpack.c.bf16 %v500_v27, %v499_v26 }
  0x29   : > { %v354_v29 = vsel %vm351_vm0, %v3433_v15, %v353_v25  ;;  %308 = vst [vmem:[#allocation2 + $0x21] sm:$0xff] %v279_v30  ;;  %v484_v37 = vld [vmem:[%s4556_s1 + $0x178] sm:$0xff]  ;;  %v517_v38 = vld [vmem:[%s4556_s1 + $0x280] sm:$0xff]  ;;  %v518_v39 = vld [vmem:[%s4556_s1 + $0x288] sm:$0xff]  ;;  %v2724_v43 = vpack.c.bf16 %v452_v34, %v451_v33  ;;  %v387_v1 = vsel %vm384_vm1, %v3491_v47, %v386_v48 }
  0x2a   : > { %645 = vmatprep.mubr.f32.mxu0 %v354_v29  ;;  %v549_v40 = vld [vmem:[%s4556_s1 + $0x380] sm:$0xff]  ;;  %v550_v41 = vld [vmem:[%s4556_s1 + $0x388] sm:$0xff]  ;;  %v280_v42 = vld [vmem:[%s3418_s21 + $0x10] sm:$0xff]  ;;  %2721 = vmatpush3.bf16.msra.mxu0 %v2720_v28  ;;  %v2756_v45 = vpack.c.bf16 %v484_v37, %v483_v35  ;;  %v2758_v49 = vpack.c.bf16 %v518_v39, %v517_v38 }
  0x2b   : > { %v501_v44 = vld [vmem:[%s4556_s1 + $0x200] sm:$0xff]  ;;  %309 = vst [vmem:[#allocation2 + $0x31] sm:$0xff] %v280_v42  ;;  %2753 = vmatpush3.bf16.msra.mxu1 %v2752_v31  ;;  %2723 = vmatprep.subr.bf16.mxu0 %v2722_v32  ;;  %v502_v50 = vld [vmem:[%s4556_s1 + $0x208] sm:$0xff]  ;;  %v2790_v52 = vpack.c.bf16 %v550_v41, %v549_v40  ;;  %v519_v57 = vld [vmem:[%s4556_s1 + $0x290] sm:$0xff] }
  0x2c   : > { %2755 = vmatprep.subr.bf16.mxu1 %v2754_v36  ;;  %v533_v55 = vld [vmem:[%s4556_s1 + $0x300] sm:$0xff]  ;;  %v534_v56 = vld [vmem:[%s4556_s1 + $0x308] sm:$0xff]  ;;  %v520_v58 = vld [vmem:[%s4556_s1 + $0x298] sm:$0xff]  ;;  %v2760_v61 = vpack.c.bf16 %v502_v50, %v501_v44 }
  0x2d   : > { %v551_v59 = vld [vmem:[%s4556_s1 + $0x390] sm:$0xff]  ;;  %v281_v60 = vld [vmem:[%s3418_s21 + $0x18] sm:$0xff]  ;;  %v2792_v2 = vpack.c.bf16 %v534_v56, %v533_v55  ;;  %v2762_v10 = vpack.c.bf16 %v520_v58, %v519_v57  ;;  %v521_v14 = vld [vmem:[%s4556_s1 + $0x2a0] sm:$0xff] }
  0x2e   : > { %v3488_v46 = vld [vmem:[#allocation2 + $0x10] sm:$0xff]  ;;  %v318_v51 = vld [vmem:[#allocation2 + $0x18] sm:$0x3]  ;;  %2725 = vmatpush3.bf16.msra.mxu0 %v2724_v43  ;;  %310 = vst [vmem:[#allocation2 + $0x41] sm:$0xff] %v281_v60  ;;  %v522_v16 = vld [vmem:[%s4556_s1 + $0x2a8] sm:$0xff] }
  0x2f   : > { %750 = vmatprep.mubr.f32.mxu1 %v3488_v46  ;;  %v355_v53 = vrot.slane %v3488_v46, 1  ;;  %v356_v54 = vrot.slane %v318_v51, 1  ;;  %v552_v63 = vld [vmem:[%s4556_s1 + $0x398] sm:$0xff]  ;;  %2757 = vmatpush3.bf16.msra.mxu1 %v2756_v45  ;;  %v388_v3 = vrot.slane %v3488_v46, 2  ;;  %v389_v4 = vrot.slane %v318_v51, 2  ;;  %v503_v5 = vld [vmem:[%s4556_s1 + $0x210] sm:$0xff] }
  0x30   : > { %v3515_v62 = vld [vmem:[#allocation2 + $0x20] sm:$0xff]  ;;  %v3520_v0 = vld [vmem:[#allocation2 + $0x28] sm:$0x3]  ;;  %2759 = vmatprep.subr.bf16.mxu0 %v2758_v49  ;;  %v504_v6 = vld [vmem:[%s4556_s1 + $0x218] sm:$0xff]  ;;  %2791 = vmatprep.subr.bf16.mxu1 %v2790_v52  ;;  %v2794_v17 = vpack.c.bf16 %v552_v63, %v551_v59  ;;  %v2766_v32 = vpack.c.bf16 %v522_v16, %v521_v14 }
  0x31   : > { %v535_v8 = vld [vmem:[%s4556_s1 + $0x310] sm:$0xff]  ;;  %v3535_v9 = vsel %vm351_vm0, %v355_v53, %v356_v54  ;;  %v358_v11 = vrot.slane %v3515_v62, 1  ;;  %v359_v12 = vrot.slane %v3520_v0, 1  ;;  %v536_v13 = vld [vmem:[%s4556_s1 + $0x318] sm:$0xff]  ;;  %646 = vmatmul.mubr.f32.vlgmr.msra.gmra.mrb[0].mxu0 %v3129_v7  ;;  %v282_v20 = vld [vmem:[%s3418_s21 + $0x20] sm:$0xff]  ;;  %v2764_v21 = vpack.c.bf16 %v504_v6, %v503_v5 }
  0x32   : > { %v3549_v18 = vld [vmem:[#allocation2 + $0x30] sm:$0xff]  ;;  %v3551_v19 = vld [vmem:[#allocation2 + $0x38] sm:$0x3]  ;;  %751 = vmatmul.mubr.f32.vlgmr.msra.gmra.mrb[0].mxu1 %v387_v1  ;;  %2761 = vmatpush3.bf16.msra.mxu0 %v2760_v61  ;;  %v553_v22 = vld [vmem:[%s4556_s1 + $0x3a0] sm:$0xff]  ;;  %311 = vst [vmem:[#allocation2 + $0x51] sm:$0xff] %v282_v20  ;;  %v3563_v24 = vsel %vm384_vm1, %v388_v3, %v389_v4  ;;  %v2796_v25 = vpack.c.bf16 %v536_v13, %v535_v8  ;;  %v391_v26 = vrot.slane %v3515_v62, 2 }
  0x33   : > { %v554_v23 = vld [vmem:[%s4556_s1 + $0x3a8] sm:$0xff]  ;;  %650 = vmatprep.mubr.f32.mxu0 %v3535_v9  ;;  %755 = vmatprep.mubr.f32.mxu1 %v3515_v62  ;;  %v392_v27 = vrot.slane %v3520_v0, 2  ;;  %v505_v28 = vld [vmem:[%s4556_s1 + $0x220] sm:$0xff]  ;;  %v3577_v31 = vsel %vm351_vm0, %v358_v11, %v359_v12  ;;  %v361_v33 = vrot.slane %v3549_v18, 1  ;;  %v362_v34 = vrot.slane %v3551_v19, 1  ;;  %v523_v36 = vld [vmem:[%s4556_s1 + $0x2b0] sm:$0xff] }
  0x34   : > { %v506_v29 = vld [vmem:[%s4556_s1 + $0x228] sm:$0xff]  ;;  %v537_v30 = vld [vmem:[%s4556_s1 + $0x320] sm:$0xff]  ;;  %2793 = vmatpush3.bf16.msra.mxu1 %v2792_v2  ;;  %2763 = vmatprep.subr.bf16.mxu0 %v2762_v10  ;;  %v524_v37 = vld [vmem:[%s4556_s1 + $0x2b8] sm:$0xff]  ;;  %v2798_v38 = vpack.c.bf16 %v554_v23, %v553_v22  ;;  %v394_v48 = vrot.slane %v3549_v18, 2  ;;  %v395_v49 = vrot.slane %v3551_v19, 2 }
  0x35   : > { %v538_v35 = vld [vmem:[%s4556_s1 + $0x328] sm:$0xff]  ;;  %651 = vmatmul.mubr.f32.gmra.mrb[2].mxu0 %v3488_v46  ;;  %2795 = vmatprep.subr.bf16.mxu1 %v2794_v17  ;;  %v3591_v39 = vld [vmem:[#allocation2 + $0x40] sm:$0xff]  ;;  %v2768_v42 = vpack.c.bf16 %v506_v29, %v505_v28  ;;  %v555_v43 = vld [vmem:[%s4556_s1 + $0x3b0] sm:$0xff]  ;;  %v3606_v45 = vsel %vm384_vm1, %v391_v26, %v392_v27  ;;  %v3620_v53 = vsel %vm351_vm0, %v361_v33, %v362_v34 }
  0x36   : > { %v3593_v40 = vld [vmem:[#allocation2 + $0x48] sm:$0x3]  ;;  %756 = vmatmul.mubr.f32.gmra.mrb[2].mxu1 %v3563_v24  ;;  %2765 = vmatpush3.bf16.msra.mxu0 %v2764_v21  ;;  %v556_v44 = vld [vmem:[%s4556_s1 + $0x3b8] sm:$0xff]  ;;  %v2800_v46 = vpack.c.bf16 %v538_v35, %v537_v30  ;;  %v507_v50 = vld [vmem:[%s4556_s1 + $0x230] sm:$0xff]  ;;  %v2770_v54 = vpack.c.bf16 %v524_v37, %v523_v36  ;;  %v364_v55 = vrot.slane %v3591_v39, 1  ;;  %v3649_v4 = vsel %vm384_vm1, %v394_v48, %v395_v49 }
  0x37   : > { %v283_v41 = vld [vmem:[%s3418_s21 + $0x28] sm:$0xff]  ;;  %655 = vmatprep.mubr.f32.mxu0 %v3577_v31  ;;  %760 = vmatprep.mubr.f32.mxu1 %v3549_v18  ;;  %v508_v51 = vld [vmem:[%s4556_s1 + $0x238] sm:$0xff]  ;;  %v539_v52 = vld [vmem:[%s4556_s1 + $0x330] sm:$0xff]  ;;  %v365_v56 = vrot.slane %v3593_v40, 1  ;;  %v2802_v60 = vpack.c.bf16 %v556_v44, %v555_v43  ;;  %v397_v6 = vrot.slane %v3591_v39, 2  ;;  %v398_v8 = vrot.slane %v3593_v40, 2 }
  0x38   : > { %312 = vst [vmem:[#allocation2 + $0x61] sm:$0xff] %v283_v41  ;;  %2797 = vmatpush3.bf16.msra.mxu1 %v2796_v25  ;;  %2767 = vmatprep.subr.bf16.mxu0 %v2766_v32  ;;  %v540_v57 = vld [vmem:[%s4556_s1 + $0x338] sm:$0xff]  ;;  %v525_v58 = vld [vmem:[%s4556_s1 + $0x2c0] sm:$0xff]  ;;  %v526_v59 = vld [vmem:[%s4556_s1 + $0x2c8] sm:$0xff]  ;;  %v2772_v1 = vpack.c.bf16 %v508_v51, %v507_v50 }
  0x39   : > { %656 = vmatmul.mubr.f32.gmra.mrb[4].mxu0 %v3515_v62  ;;  %2799 = vmatprep.subr.bf16.mxu1 %v2798_v38  ;;  %v3634_v61 = vld [vmem:[#allocation2 + $0x50] sm:$0xff]  ;;  %v3636_v63 = vld [vmem:[#allocation2 + $0x58] sm:$0x3]  ;;  %v557_v2 = vld [vmem:[%s4556_s1 + $0x3c0] sm:$0xff]  ;;  %v2804_v5 = vpack.c.bf16 %v540_v57, %v539_v52  ;;  %v3663_v13 = vsel %vm351_vm0, %v364_v55, %v365_v56  ;;  %v2774_v14 = vpack.c.bf16 %v526_v59, %v525_v58 }
  0x3a   : > { %v284_v0 = vld [vmem:[%s3418_s21 + $0x30] sm:$0xff]  ;;  %761 = vmatmul.mubr.f32.gmra.mrb[4].mxu1 %v3606_v45  ;;  %2769 = vmatpush3.bf16.msra.mxu0 %v2768_v42  ;;  %v558_v3 = vld [vmem:[%s4556_s1 + $0x3c8] sm:$0xff]  ;;  %v509_v10 = vld [vmem:[%s4556_s1 + $0x240] sm:$0xff]  ;;  %v367_v16 = vrot.slane %v3634_v61, 1  ;;  %v368_v17 = vrot.slane %v3636_v63, 1  ;;  %v3692_v30 = vsel %vm384_vm1, %v397_v6, %v398_v8  ;;  %v400_v33 = vrot.slane %v3634_v61, 2 }
  0x3b   : > { %313 = vst [vmem:[#allocation2 + $0x71] sm:$0xff] %v284_v0  ;;  %660 = vmatprep.mubr.f32.mxu0 %v3620_v53  ;;  %765 = vmatprep.mubr.f32.mxu1 %v3591_v39  ;;  %v510_v11 = vld [vmem:[%s4556_s1 + $0x248] sm:$0xff]  ;;  %v541_v12 = vld [vmem:[%s4556_s1 + $0x340] sm:$0xff]  ;;  %v527_v20 = vld [vmem:[%s4556_s1 + $0x2d0] sm:$0xff]  ;;  %v2806_v22 = vpack.c.bf16 %v558_v3, %v557_v2  ;;  %v401_v34 = vrot.slane %v3636_v63, 2 }
  0x3c   : > { %2801 = vmatpush3.bf16.msra.mxu1 %v2800_v46  ;;  %2771 = vmatprep.subr.bf16.mxu0 %v2770_v54  ;;  %v542_v19 = vld [vmem:[%s4556_s1 + $0x348] sm:$0xff]  ;;  %v528_v21 = vld [vmem:[%s4556_s1 + $0x2d8] sm:$0xff]  ;;  %v2776_v27 = vpack.c.bf16 %v510_v11, %v509_v10  ;;  %v559_v28 = vld [vmem:[%s4556_s1 + $0x3d0] sm:$0xff]  ;;  %v3703_v37 = vsel %vm351_vm0, %v367_v16, %v368_v17 }
  0x3d   : > { %661 = vmatmul.mubr.f32.gmra.mrb[6].mxu0 %v3549_v18  ;;  %2803 = vmatprep.subr.bf16.mxu1 %v2802_v60  ;;  %v285_v26 = vld [vmem:[%s3418_s21 + $0x38] sm:$0xff]  ;;  %v2808_v32 = vpack.c.bf16 %v542_v19, %v541_v12  ;;  %v511_v35 = vld [vmem:[%s4556_s1 + $0x250] sm:$0xff]  ;;  %v2778_v38 = vpack.c.bf16 %v528_v21, %v527_v20  ;;  %v529_v44 = vld [vmem:[%s4556_s1 + $0x2e0] sm:$0xff]  ;;  %v3732_v55 = vsel %vm384_vm1, %v400_v33, %v401_v34  ;;  %s3069_s21 = sshll.u32 %s3130_s18, 4  ;;  %s3070_s21 = int_to_ptr.vmem [resolvable:$false] %s3069_s21 }
  0x3e   : > { %766 = vmatmul.mubr.f32.gmra.mrb[6].mxu1 %v3649_v4  ;;  %2773 = vmatpush3.bf16.msra.mxu0 %v2772_v1  ;;  %v560_v29 = vld [vmem:[%s4556_s1 + $0x3d8] sm:$0xff]  ;;  %314 = vst [vmem:[#allocation2 + $0x81] sm:$0xff] %v285_v26  ;;  %v543_v42 = vld [vmem:[%s4556_s1 + $0x350] sm:$0xff]  ;;  %v530_v49 = vld [vmem:[%s4556_s1 + $0x2e8] sm:$0xff]  ;;  %s3071_s20 = scalar_lea.vmem %s3070_s21, 2048  ;;  %p3072_p0 = scmp.lt.s32.totalorder %s4508_s13, %s3070_s21 }
  0x3f   : > { %v3677_v23 = vld [vmem:[#allocation2 + $0x60] sm:$0xff]  ;;  %v3679_v25 = vld [vmem:[#allocation2 + $0x68] sm:$0x3]  ;;  %665 = vmatprep.mubr.f32.mxu0 %v3663_v13  ;;  %770 = vmatprep.mubr.f32.mxu1 %v3634_v61  ;;  %v512_v36 = vld [vmem:[%s4556_s1 + $0x258] sm:$0xff]  ;;  %v2810_v46 = vpack.c.bf16 %v560_v29, %v559_v28  ;;  %v2782_v0 = vpack.c.bf16 %v530_v49, %v529_v44  ;;  %p3073_p1 = scmp.lt.s32.totalorder %s3071_s20, %s3065_s17 }
  0x40   : > { %2805 = vmatpush3.bf16.msra.mxu1 %v2804_v5  ;;  %2775 = vmatprep.subr.bf16.mxu0 %v2774_v14  ;;  %v370_v40 = vrot.slane %v3677_v23, 1  ;;  %v371_v41 = vrot.slane %v3679_v25, 1  ;;  %v544_v43 = vld [vmem:[%s4556_s1 + $0x358] sm:$0xff]  ;;  %v2780_v51 = vpack.c.bf16 %v512_v36, %v511_v35  ;;  %v561_v52 = vld [vmem:[%s4556_s1 + $0x3e0] sm:$0xff]  ;;  %v562_v54 = vld [vmem:[%s4556_s1 + $0x3e8] sm:$0xff]  ;;  %v403_v57 = vrot.slane %v3677_v23, 2 }
  0x41   : > { %666 = vmatmul.mubr.f32.gmra.mrb[8].mxu0 %v3591_v39  ;;  %2807 = vmatprep.subr.bf16.mxu1 %v2806_v22  ;;  %v2812_v56 = vpack.c.bf16 %v544_v43, %v543_v42  ;;  %v404_v58 = vrot.slane %v3679_v25, 2  ;;  %v513_v59 = vld [vmem:[%s4556_s1 + $0x260] sm:$0xff]  ;;  %v514_v60 = vld [vmem:[%s4556_s1 + $0x268] sm:$0xff]  ;;  %v2814_v5 = vpack.c.bf16 %v562_v54, %v561_v52  ;;  %v531_v8 = vld [vmem:[%s4556_s1 + $0x2f0] sm:$0xff]  ;;  %p3074_p2 = por %p3073_p1, %p3072_p0 }
  0x42   : > { %v3717_v48 = vld [vmem:[#allocation2 + $0x70] sm:$0xff]  ;;  %v330_v50 = vld [vmem:[#allocation2 + $0x78] sm:$0x3]  ;;  %771 = vmatmul.mubr.f32.gmra.mrb[8].mxu1 %v3692_v30  ;;  %2777 = vmatpush3.bf16.msra.mxu0 %v2776_v27  ;;  %v3743_v63 = vsel %vm351_vm0, %v370_v40, %v371_v41  ;;  %v545_v3 = vld [vmem:[%s4556_s1 + $0x360] sm:$0xff]  ;;  %v2784_v11 = vpack.c.bf16 %v514_v60, %v513_v59 }
  0x43   : > { %670 = vmatprep.mubr.f32.mxu0 %v3703_v37  ;;  %775 = vmatprep.mubr.f32.mxu1 %v3677_v23  ;;  %v373_v1 = vrot.slane %v3717_v48, 1  ;;  %v374_v2 = vrot.slane %v330_v50, 1  ;;  %v546_v6 = vld [vmem:[%s4556_s1 + $0x368] sm:$0xff]  ;;  %v532_v10 = vld [vmem:[%s4556_s1 + $0x2f8] sm:$0xff]  ;;  %v563_v12 = vld [vmem:[%s4556_s1 + $0x3f0] sm:$0xff]  ;;  %v3769_v16 = vsel %vm384_vm1, %v403_v57, %v404_v58  ;;  %v406_v17 = vrot.slane %v3717_v48, 2  ;;  %p3075_p3 = pnand %p3074_p2, %p3068_p13 }
  0x44   : > { %2809 = vmatpush3.bf16.msra.mxu1 %v2808_v32  ;;  %2779 = vmatprep.subr.bf16.mxu0 %v2778_v38  ;;  %v564_v14 = vld [vmem:[%s4556_s1 + $0x3f8] sm:$0xff]  ;;  %v407_v19 = vrot.slane %v330_v50, 2  ;;  %v515_v20 = vld [vmem:[%s4556_s1 + $0x270] sm:$0xff]  ;;  %v2816_v26 = vpack.c.bf16 %v546_v6, %v545_v3  ;;  %v2786_v27 = vpack.c.bf16 %v532_v10, %v531_v8  ;;  %v565_v28 = vld [vmem:[%s4556_s1 + $0x400] sm:$0xff] }
  0x45   : > { %671 = vmatmul.mubr.f32.gmra.mrb[10].mxu0 %v3634_v61  ;;  %2811 = vmatprep.subr.bf16.mxu1 %v2810_v46  ;;  %v516_v21 = vld [vmem:[%s4556_s1 + $0x278] sm:$0xff]  ;;  %v3779_v22 = vsel %vm351_vm0, %v373_v1, %v374_v2  ;;  %v3781_v25 = vld [vmem:[#allocation2 + $0x80] sm:$0xff]  ;;  %v566_v29 = vld [vmem:[%s4556_s1 + $0x408] sm:$0xff]  ;;  %v2818_v32 = vpack.c.bf16 %v564_v14, %v563_v12 }
  0x46   : > { %776 = vmatmul.mubr.f32.gmra.mrb[10].mxu1 %v3732_v55  ;;  %2781 = vmatpush3.bf16.msra.mxu0 %v2780_v51  ;;  %v547_v33 = vld [vmem:[%s4556_s1 + $0x370] sm:$0xff]  ;;  %v548_v34 = vld [vmem:[%s4556_s1 + $0x378] sm:$0xff]  ;;  %v2788_v35 = vpack.c.bf16 %v516_v21, %v515_v20  ;;  %v3800_v36 = vsel %vm384_vm1, %v406_v17, %v407_v19  ;;  %v2822_v38 = vpack.c.bf16 %v566_v29, %v565_v28  ;;  %v569_v44 = vld [vmem:[%s4556_s1 + $0x420] sm:$0xff]  ;;  %v423_v59 = vrot.slane %v3781_v25, 2 }
  0x47   : > { %675 = vmatprep.mubr.f32.mxu0 %v3743_v63  ;;  %780 = vmatprep.mubr.f32.mxu1 %v3717_v48  ;;  %v2820_v40 = vpack.c.bf16 %v548_v34, %v547_v33  ;;  %v567_v41 = vld [vmem:[%s4556_s1 + $0x410] sm:$0xff]  ;;  %v568_v42 = vld [vmem:[%s4556_s1 + $0x418] sm:$0xff]  ;;  %v570_v46 = vld [vmem:[%s4556_s1 + $0x428] sm:$0xff] }
  0x48   : > { %2813 = vmatpush3.bf16.msra.mxu1 %v2812_v56  ;;  %2783 = vmatprep.subr.bf16.mxu0 %v2782_v0  ;;  %v2826_v43 = vpack.c.bf16 %v568_v42, %v567_v41  ;;  %v571_v49 = vld [vmem:[%s4556_s1 + $0x430] sm:$0xff]  ;;  %v572_v50 = vld [vmem:[%s4556_s1 + $0x438] sm:$0xff]  ;;  %v574_v51 = vld [vmem:[%s4556_s1 + $0x448] sm:$0xff] }
  0x49   : > { %676 = vmatmul.mubr.f32.gmra.mrb[12].mxu0 %v3677_v23  ;;  %2815 = vmatprep.subr.bf16.mxu1 %v2814_v5  ;;  %v576_v52 = vld [vmem:[%s4556_s1 + $0x458] sm:$0xff]  ;;  %v577_v54 = vld [vmem:[%s4556_s1 + $0x460] sm:$0xff]  ;;  %v578_v56 = vld [vmem:[%s4556_s1 + $0x468] sm:$0xff] }
  0x4a   : > { %781 = vmatmul.mubr.f32.gmra.mrb[12].mxu1 %v3769_v16  ;;  %2785 = vmatpush3.bf16.msra.mxu0 %v2784_v11  ;;  %v2846_v58 = vpack.c.bf16 %v578_v56, %v577_v54  ;;  %v580_v0 = vld [vmem:[%s4556_s1 + $0x478] sm:$0xff]  ;;  %v1342_v6 = vld [vmem:[%s4557_s2 + $0x188] sm:$0xff]  ;;  %v1325_v10 = vld [vmem:[%s4557_s2 + $0x100] sm:$0xff] }
  0x4b   : > { %680 = vmatprep.mubr.f32.mxu0 %v3779_v22  ;;  %785 = vmatprep.mubr.f32.mxu1 %v3781_v25  ;;  %v1326_v11 = vld [vmem:[%s4557_s2 + $0x108] sm:$0xff]  ;;  %v1311_v14 = vld [vmem:[%s4557_s2 + $0x90] sm:$0xff]  ;;  %v1296_v20 = vld [vmem:[%s4557_s2 + $0x18] sm:$0xff] }
  0x4c   : > { %2817 = vmatpush3.bf16.msra.mxu1 %v2816_v26  ;;  %2787 = vmatprep.subr.bf16.mxu0 %v2786_v27  ;;  %v2888_v12 = vpack.c.bf16 %v1326_v11, %v1325_v10  ;;  %v1295_v19 = vld [vmem:[%s4557_s2 + $0x10] sm:$0xff]  ;;  %v1328_v28 = vld [vmem:[%s4557_s2 + $0x118] sm:$0xff]  ;;  %v1314_v33 = vld [vmem:[%s4557_s2 + $0xa8] sm:$0xff] }
  0x4d   : > { %681 = vmatmul.mubr.f32.gmra.mrb[14].mxu0 %v3717_v48  ;;  %2819 = vmatprep.subr.bf16.mxu1 %v2818_v32  ;;  %v2860_v21 = vpack.c.bf16 %v1296_v20, %v1295_v19  ;;  %v1327_v27 = vld [vmem:[%s4557_s2 + $0x110] sm:$0xff]  ;;  %v1313_v32 = vld [vmem:[%s4557_s2 + $0xa0] sm:$0xff]  ;;  %v1346_v41 = vld [vmem:[%s4557_s2 + $0x1a8] sm:$0xff] }
  0x4e   : > { %786 = vmatmul.mubr.f32.gmra.mrb[14].mxu1 %v3800_v36  ;;  %2789 = vmatpush3.bf16.msra.mxu0 %v2788_v35  ;;  %v2892_v29 = vpack.c.bf16 %v1328_v28, %v1327_v27  ;;  %v2862_v34 = vpack.c.bf16 %v1314_v33, %v1313_v32  ;;  %v1297_v35 = vld [vmem:[%s4557_s2 + $0x20] sm:$0xff]  ;;  %v1322_v10 = vld [vmem:[%s4557_s2 + $0xe8] sm:$0xff]  ;;  %v1324_v27 = vld [vmem:[%s4557_s2 + $0xf8] sm:$0xff] }
  0x4f   : > { %855 = vmatprep.mubr.f32.mxu0 %v3563_v24  ;;  %2823 = vmatprep.subr.bf16.mxu0 %v2822_v38  ;;  %v2830_v24 = vpack.c.bf16 %v570_v46, %v569_v44  ;;  %v1330_v44 = vld [vmem:[%s4557_s2 + $0x128] sm:$0xff]  ;;  %v1317_v56 = vld [vmem:[%s4557_s2 + $0xc0] sm:$0xff]  ;;  %v1308_v32 = vld [vmem:[%s4557_s2 + $0x78] sm:$0xff] }
  0x50   : > { %2821 = vmatpush3.bf16.msra.mxu1 %v2820_v40  ;;  %960 = vmatprep.mubr.f32.mxu1 %v3577_v31  ;;  %v1345_v40 = vld [vmem:[%s4557_s2 + $0x1a0] sm:$0xff]  ;;  %v1354_v19 = vld [vmem:[%s4557_s2 + $0x1e8] sm:$0xff] }
  0x51   : > { %856 = vmatmul.mubr.f32.vlgmr.msra.gmra.mrb[16].mxu0 %v3535_v9  ;;  %v573_v9 = vld [vmem:[%s4556_s1 + $0x440] sm:$0xff]  ;;  %v2894_v42 = vpack.c.bf16 %v1346_v41, %v1345_v40  ;;  %v1339_v40 = vld [vmem:[%s4557_s2 + $0x170] sm:$0xff]  ;;  %v1340_v41 = vld [vmem:[%s4557_s2 + $0x178] sm:$0xff] }
  0x52   : > { %2825 = vmatpush3.bf16.msra.mxu0 %v2822_v38  ;;  %860 = vmatprep.mubr.f32.mxu0 %v3606_v45 }
  0x53   : > { %961 = vmatmul.mubr.f32.vlgmr.msra.gmra.mrb[16].mxu1 %v3515_v62  ;;  %2827 = vmatprep.subr.bf16.mxu0 %v2826_v43  ;;  %v2834_v62 = vpack.c.bf16 %v572_v50, %v571_v49  ;;  %v1316_v49 = vld [vmem:[%s4557_s2 + $0xb8] sm:$0xff] }
  0x54   : > { %965 = vmatprep.mubr.f32.mxu1 %v3620_v53 }
  0x55   : > { %861 = vmatmul.mubr.f32.gmra.mrb[18].mxu0 %v3577_v31  ;;  %v575_v31 = vld [vmem:[%s4556_s1 + $0x450] sm:$0xff] }
  0x56   : > { %2829 = vmatpush3.bf16.msra.mxu0 %v2826_v43  ;;  %865 = vmatprep.mubr.f32.mxu0 %v3649_v4  ;;  %v1329_v43 = vld [vmem:[%s4557_s2 + $0x120] sm:$0xff] }
  0x57   : > { %966 = vmatmul.mubr.f32.gmra.mrb[18].mxu1 %v3549_v18  ;;  %2831 = vmatprep.subr.bf16.mxu0 %v2830_v24  ;;  %v2838_v18 = vpack.c.bf16 %v574_v51, %v573_v9  ;;  %v2896_v46 = vpack.c.bf16 %v1330_v44, %v1329_v43  ;;  %v1300_v9 = vld [vmem:[%s4557_s2 + $0x38] sm:$0xff] }
  0x58   : > { %970 = vmatprep.mubr.f32.mxu1 %v3663_v13 }
  0x59   : > { %866 = vmatmul.mubr.f32.gmra.mrb[20].mxu0 %v3620_v53  ;;  %v332_v53 = vld [vmem:[#allocation2 + $0x88] sm:$0x3] }
  0x5a   : > { %2833 = vmatpush3.bf16.msra.mxu0 %v2830_v24  ;;  %870 = vmatprep.mubr.f32.mxu0 %v3692_v30  ;;  %v420_v57 = vrot.slane %v332_v53, 1  ;;  %v424_v60 = vrot.slane %v332_v53, 2  ;;  %v1315_v24 = vld [vmem:[%s4557_s2 + $0xb0] sm:$0xff] }
  0x5b   : > { %971 = vmatmul.mubr.f32.gmra.mrb[20].mxu1 %v3591_v39  ;;  %2835 = vmatprep.subr.bf16.mxu0 %v2834_v62  ;;  %v2842_v39 = vpack.c.bf16 %v576_v52, %v575_v31  ;;  %v2866_v50 = vpack.c.bf16 %v1316_v49, %v1315_v24  ;;  %v1348_v31 = vld [vmem:[%s4557_s2 + $0x1b8] sm:$0xff]  ;;  %v1331_v53 = vld [vmem:[%s4557_s2 + $0x130] sm:$0xff]  ;;  %v1373_v49 = vld [vmem:[%s4557_s2 + $0x280] sm:$0xff] }
  0x5c   : > { %975 = vmatprep.mubr.f32.mxu1 %v3703_v37  ;;  %v425_v2 = vsel %vm384_vm1, %v423_v59, %v424_v60  ;;  %v1349_v60 = vld [vmem:[%s4557_s2 + $0x1c0] sm:$0xff] }
  0x5d   : > { %871 = vmatmul.mubr.f32.gmra.mrb[22].mxu0 %v3663_v13  ;;  %v419_v13 = vrot.slane %v3781_v25, 1 }
  0x5e   : > { %2837 = vmatpush3.bf16.msra.mxu0 %v2834_v62  ;;  %875 = vmatprep.mubr.f32.mxu0 %v3732_v55  ;;  %v1299_v62 = vld [vmem:[%s4557_s2 + $0x30] sm:$0xff] }
  0x5f   : > { %976 = vmatmul.mubr.f32.gmra.mrb[22].mxu1 %v3634_v61  ;;  %2839 = vmatprep.subr.bf16.mxu0 %v2838_v18  ;;  %v334_v61 = vld [vmem:[#allocation2 + $0x98] sm:$0x3]  ;;  %v421_v1 = vsel %vm351_vm0, %v419_v13, %v420_v57  ;;  %v2868_v51 = vpack.c.bf16 %v1300_v9, %v1299_v62  ;;  %v1318_v13 = vld [vmem:[%s4557_s2 + $0xc8] sm:$0xff]  ;;  %v1357_v9 = vld [vmem:[%s4557_s2 + $0x200] sm:$0xff] }
  0x60   : > { %980 = vmatprep.mubr.f32.mxu1 %v3743_v63  ;;  %v2870_v57 = vpack.c.bf16 %v1318_v13, %v1317_v56  ;;  %v1359_v13 = vld [vmem:[%s4557_s2 + $0x210] sm:$0xff] }
  0x61   : > { %876 = vmatmul.mubr.f32.gmra.mrb[24].mxu0 %v3703_v37  ;;  %v579_v37 = vld [vmem:[%s4556_s1 + $0x470] sm:$0xff] }
  0x62   : > { %2841 = vmatpush3.bf16.msra.mxu0 %v2838_v18  ;;  %880 = vmatprep.mubr.f32.mxu0 %v3769_v16  ;;  %v2850_v3 = vpack.c.bf16 %v580_v0, %v579_v37  ;;  %v1347_v18 = vld [vmem:[%s4557_s2 + $0x1b0] sm:$0xff]  ;;  %v1350_v37 = vld [vmem:[%s4557_s2 + $0x1c8] sm:$0xff] }
  0x63   : > { %981 = vmatmul.mubr.f32.gmra.mrb[24].mxu1 %v3677_v23  ;;  %2843 = vmatprep.subr.bf16.mxu0 %v2842_v39  ;;  %v430_v23 = vrot.slane %v334_v61, 1  ;;  %v2898_v52 = vpack.c.bf16 %v1348_v31, %v1347_v18  ;;  %v2902_v0 = vpack.c.bf16 %v1350_v37, %v1349_v60  ;;  %v1405_v18 = vld [vmem:[%s4557_s2 + $0x380] sm:$0xff] }
  0x64   : > { %985 = vmatprep.mubr.f32.mxu1 %v3779_v22  ;;  %v1361_v37 = vld [vmem:[%s4557_s2 + $0x220] sm:$0xff] }
  0x65   : > { %881 = vmatmul.mubr.f32.gmra.mrb[26].mxu0 %v3743_v63  ;;  %v431_v5 = vsel %vm351_vm0, %v3433_v15, %v430_v23  ;;  %v434_v15 = vrot.slane %v334_v61, 2  ;;  %v1301_v61 = vld [vmem:[%s4557_s2 + $0x40] sm:$0xff]  ;;  %v1334_v23 = vld [vmem:[%s4557_s2 + $0x148] sm:$0xff] }
  0x66   : > { %2845 = vmatpush3.bf16.msra.mxu0 %v2842_v39  ;;  %885 = vmatprep.mubr.f32.mxu0 %v3800_v36  ;;  %v1332_v39 = vld [vmem:[%s4557_s2 + $0x138] sm:$0xff] }
  0x67   : > { %986 = vmatmul.mubr.f32.gmra.mrb[26].mxu1 %v3717_v48  ;;  %2847 = vmatprep.subr.bf16.mxu0 %v2846_v58  ;;  %v435_v48 = vsel %vm384_vm1, %v3491_v47, %v434_v15  ;;  %v1341_v47 = vld [vmem:[%s4557_s2 + $0x180] sm:$0xff]  ;;  %v2900_v54 = vpack.c.bf16 %v1332_v39, %v1331_v53  ;;  %v1375_v39 = vld [vmem:[%s4557_s2 + $0x290] sm:$0xff] }
  0x68   : > { %990 = vmatprep.mubr.f32.mxu1 %v421_v1  ;;  %v2886_v8 = vpack.c.bf16 %v1342_v6, %v1341_v47  ;;  %v1336_v47 = vld [vmem:[%s4557_s2 + $0x158] sm:$0xff] }
  0x69   : > { %886 = vmatmul.mubr.f32.gmra.mrb[28].mxu0 %v3779_v22  ;;  %v1343_v22 = vld [vmem:[%s4557_s2 + $0x190] sm:$0xff] }
  0x6a   : > { %2849 = vmatpush3.bf16.msra.mxu0 %v2846_v58  ;;  %890 = vmatprep.mubr.f32.mxu0 %v425_v2  ;;  %v1302_v58 = vld [vmem:[%s4557_s2 + $0x48] sm:$0xff] }
  0x6b   : > { %991 = vmatmul.mubr.f32.gmra.mrb[28].mxu1 %v3781_v25  ;;  %2851 = vmatprep.subr.bf16.mxu0 %v2850_v3  ;;  %v1344_v25 = vld [vmem:[%s4557_s2 + $0x198] sm:$0xff]  ;;  %v2872_v59 = vpack.c.bf16 %v1302_v58, %v1301_v61  ;;  %v1377_v58 = vld [vmem:[%s4557_s2 + $0x2a0] sm:$0xff] }
  0x6c   : > { %995 = vmatprep.mubr.f32.mxu1 %v431_v5  ;;  %v2890_v26 = vpack.c.bf16 %v1344_v25, %v1343_v22  ;;  %v1320_v5 = vld [vmem:[%s4557_s2 + $0xd8] sm:$0xff]  ;;  %v1338_v22 = vld [vmem:[%s4557_s2 + $0x168] sm:$0xff] }
  0x6d   : > { %891 = vmatmul.mubr.f32.gmra.mrb[30].mxu0 %v421_v1  ;;  %v1333_v1 = vld [vmem:[%s4557_s2 + $0x140] sm:$0xff] }
  0x6e   : > { %2853 = vmatpush3.bf16.msra.mxu0 %v2850_v3  ;;  %2638 = vmatprep.mubr.f32.mxu0 %v3606_v45  ;;  %v1310_v45 = vld [vmem:[%s4557_s2 + $0x88] sm:$0xff]  ;;  %v1319_v3 = vld [vmem:[%s4557_s2 + $0xd0] sm:$0xff] }
  0x6f   : > { %996 = vmatmul.mubr.f32.gmra.mrb[30].mxu1 %v3129_v7  ;;  %v1309_v7 = vld [vmem:[%s4557_s2 + $0x80] sm:$0xff]  ;;  %2887 = vmatprep.subr.bf16.mxu0 %v2886_v8  ;;  %v2874_v15 = vpack.c.bf16 %v1320_v5, %v1319_v3  ;;  %v1363_v5 = vld [vmem:[%s4557_s2 + $0x230] sm:$0xff] }
  0x70   : > { %v1321_v8 = vld [vmem:[%s4557_s2 + $0xe0] sm:$0xff] }
  0x71   : > { %2639 = vmatmul.mubr.f32.vlgmr.msra.gmra.mrb[32].mxu0 %v3649_v4  ;;  %v2854_v4 = vpack.c.bf16 %v1310_v45, %v1309_v7  ;;  %v1304_v7 = vld [vmem:[%s4557_s2 + $0x58] sm:$0xff]  ;;  %v2878_v11 = vpack.c.bf16 %v1322_v10, %v1321_v8  ;;  %v1367_v10 = vld [vmem:[%s4557_s2 + $0x250] sm:$0xff] }
  0x72   : > { %2641 = vmatprep.mubr.f32.mxu0 %v3692_v30  ;;  %v1293_v30 = vld [vmem:[%s4557_s2] sm:$0xff]  ;;  %2889 = vmatpush3.bf16.msra.mxu0 %v2888_v12 }
  0x73   : > { %2855 = vmatprep.subr.bf16.mxu1 %v2854_v4  ;;  %2891 = vmatprep.subr.bf16.mxu0 %v2890_v26  ;;  %v1351_v4 = vld [vmem:[%s4557_s2 + $0x1d0] sm:$0xff]  ;;  %v1305_v12 = vld [vmem:[%s4557_s2 + $0x60] sm:$0xff] }
  0x74   : > { %v1323_v26 = vld [vmem:[%s4557_s2 + $0xf0] sm:$0xff] }
  0x75   : > { %2642 = vmatmul.mubr.f32.gmra.mrb[34].mxu0 %v3732_v55  ;;  %v1294_v55 = vld [vmem:[%s4557_s2 + $0x8] sm:$0xff]  ;;  %v2882_v28 = vpack.c.bf16 %v1324_v27, %v1323_v26  ;;  %v1371_v27 = vld [vmem:[%s4557_s2 + $0x270] sm:$0xff] }
  0x76   : > { %2644 = vmatprep.mubr.f32.mxu0 %v3769_v16  ;;  %v2856_v63 = vpack.c.bf16 %v1294_v55, %v1293_v30  ;;  %v1312_v16 = vld [vmem:[%s4557_s2 + $0x98] sm:$0xff]  ;;  %2893 = vmatpush3.bf16.msra.mxu0 %v2892_v29  ;;  %v1307_v29 = vld [vmem:[%s4557_s2 + $0x70] sm:$0xff] }
  0x77   : > { %v2858_v17 = vpack.c.bf16 %v1312_v16, %v1311_v14  ;;  %2895 = vmatprep.subr.bf16.mxu0 %v2894_v42  ;;  %v1352_v30 = vld [vmem:[%s4557_s2 + $0x1d8] sm:$0xff]  ;;  %v1306_v14 = vld [vmem:[%s4557_s2 + $0x68] sm:$0xff]  ;;  %v2884_v33 = vpack.c.bf16 %v1308_v32, %v1307_v29  ;;  %v4082_v42 = vld [vmem:[#allocation2] sm:$0xff] }
  0x78   : > { %2857 = vmatpush3.bf16.msra.mxu1 %v2856_v63  ;;  %v2906_v55 = vpack.c.bf16 %v1352_v30, %v1351_v4  ;;  %v1335_v63 = vld [vmem:[%s4557_s2 + $0x150] sm:$0xff]  ;;  %v2880_v16 = vpack.c.bf16 %v1306_v14, %v1305_v12  ;;  %v1209_v43 = vrot.slane %v4082_v42, 1  ;;  %v1365_v30 = vld [vmem:[%s4557_s2 + $0x240] sm:$0xff] }
  0x79   : > { %2645 = vmatmul.mubr.f32.gmra.mrb[36].mxu0 %v3800_v36  ;;  %2859 = vmatprep.subr.bf16.mxu1 %v2858_v17  ;;  %v1298_v36 = vld [vmem:[%s4557_s2 + $0x28] sm:$0xff]  ;;  %v2908_v6 = vpack.c.bf16 %v1336_v47, %v1335_v63  ;;  %v1353_v17 = vld [vmem:[%s4557_s2 + $0x1e0] sm:$0xff]  ;;  %v1383_v47 = vld [vmem:[%s4557_s2 + $0x2d0] sm:$0xff] }
  0x7a   : > { %2647 = vmatprep.mubr.f32.mxu0 %v425_v2  ;;  %v2864_v38 = vpack.c.bf16 %v1298_v36, %v1297_v35  ;;  %2897 = vmatpush3.bf16.msra.mxu0 %v2896_v46  ;;  %v2904_v2 = vpack.c.bf16 %v1334_v23, %v1333_v1  ;;  %v2910_v20 = vpack.c.bf16 %v1354_v19, %v1353_v17  ;;  %v1356_v35 = vld [vmem:[%s4557_s2 + $0x1f8] sm:$0xff]  ;;  %v4074_v36 = vld [vmem:[#allocation3 + $0x8] sm:$0x3]  ;;  %v1379_v23 = vld [vmem:[%s4557_s2 + $0x2b0] sm:$0xff] }
  0x7b   : > { %2899 = vmatprep.subr.bf16.mxu0 %v2898_v52  ;;  %v1210_v44 = vrot.slane %v4074_v36, 1  ;;  %v2916_v46 = vpack.c.bf16 %v1340_v41, %v1339_v40  ;;  %v1406_v52 = vld [vmem:[%s4557_s2 + $0x388] sm:$0xff]  ;;  %v1385_v14 = vld [vmem:[%s4557_s2 + $0x2e0] sm:$0xff] }
  0x7c   : > { %2861 = vmatpush3.bf16.msra.mxu1 %v2860_v21  ;;  %v1337_v21 = vld [vmem:[%s4557_s2 + $0x160] sm:$0xff]  ;;  %v2950_v53 = vpack.c.bf16 %v1406_v52, %v1405_v18 }
  0x7d   : > { %2648 = vmatmul.mubr.f32.gmra.mrb[38].mxu0 %v435_v48  ;;  %2863 = vmatprep.subr.bf16.mxu1 %v2862_v34  ;;  %v1303_v48 = vld [vmem:[%s4557_s2 + $0x50] sm:$0xff]  ;;  %v2912_v25 = vpack.c.bf16 %v1338_v22, %v1337_v21  ;;  %v1211_v24 = vsel %vm351_vm0, %v1209_v43, %v1210_v44  ;;  %v1369_v19 = vld [vmem:[%s4557_s2 + $0x260] sm:$0xff] }
  0x7e   : > { %2901 = vmatpush3.bf16.msra.mxu0 %v2900_v54  ;;  %v2876_v45 = vpack.c.bf16 %v1304_v7, %v1303_v48  ;;  %v1355_v34 = vld [vmem:[%s4557_s2 + $0x1f0] sm:$0xff]  ;;  %1501 = vmatprep.mubr.f32.mxu1 %v1211_v24  ;;  %v1376_v54 = vld [vmem:[%s4557_s2 + $0x298] sm:$0xff]  ;;  %v1381_v7 = vld [vmem:[%s4557_s2 + $0x2c0] sm:$0xff] }
  0x7f   : > { %2903 = vmatprep.subr.bf16.mxu0 %v2902_v0  ;;  %v2922_v56 = vpack.c.bf16 %v1376_v54, %v1375_v39  ;;  %v1362_v0 = vld [vmem:[%s4557_s2 + $0x228] sm:$0xff]  ;;  %v1387_v22 = vld [vmem:[%s4557_s2 + $0x2f0] sm:$0xff]  ;;  %v1421_v32 = vld [vmem:[%s4557_s2 + $0x400] sm:$0xff] }
  0x80   : > { %2865 = vmatpush3.bf16.msra.mxu1 %v2864_v38  ;;  %v2914_v38 = vpack.c.bf16 %v1356_v35, %v1355_v34  ;;  %v2928_v1 = vpack.c.bf16 %v1362_v0, %v1361_v37 }
  0x81   : > { %2867 = vmatprep.subr.bf16.mxu1 %v2866_v50  ;;  %v1374_v50 = vld [vmem:[%s4557_s2 + $0x288] sm:$0xff] }
  0x82   : > { %2905 = vmatpush3.bf16.msra.mxu0 %v2904_v2  ;;  %v2918_v62 = vpack.c.bf16 %v1374_v50, %v1373_v49  ;;  %v1380_v2 = vld [vmem:[%s4557_s2 + $0x2b8] sm:$0xff] }
  0x83   : > { %2907 = vmatprep.subr.bf16.mxu0 %v2906_v55  ;;  %v2930_v3 = vpack.c.bf16 %v1380_v2, %v1379_v23  ;;  %v1366_v55 = vld [vmem:[%s4557_s2 + $0x248] sm:$0xff] }
  0x84   : > { %2869 = vmatpush3.bf16.msra.mxu1 %v2868_v51  ;;  %v1358_v51 = vld [vmem:[%s4557_s2 + $0x208] sm:$0xff]  ;;  %v2936_v63 = vpack.c.bf16 %v1366_v55, %v1365_v30 }
  0x85   : > { %2871 = vmatprep.subr.bf16.mxu1 %v2870_v57  ;;  %v2920_v31 = vpack.c.bf16 %v1358_v51, %v1357_v9  ;;  %v1360_v57 = vld [vmem:[%s4557_s2 + $0x218] sm:$0xff] }
  0x86   : > { %2909 = vmatpush3.bf16.msra.mxu0 %v2908_v6  ;;  %v2924_v61 = vpack.c.bf16 %v1360_v57, %v1359_v13  ;;  %v1384_v6 = vld [vmem:[%s4557_s2 + $0x2d8] sm:$0xff] }
  0x87   : > { %2911 = vmatprep.subr.bf16.mxu0 %v2910_v20  ;;  %v2938_v8 = vpack.c.bf16 %v1384_v6, %v1383_v47  ;;  %v1370_v20 = vld [vmem:[%s4557_s2 + $0x268] sm:$0xff] }
  0x88   : > { %2873 = vmatpush3.bf16.msra.mxu1 %v2872_v59  ;;  %v1378_v59 = vld [vmem:[%s4557_s2 + $0x2a8] sm:$0xff]  ;;  %v2944_v21 = vpack.c.bf16 %v1370_v20, %v1369_v19 }
  0x89   : > { %2875 = vmatprep.subr.bf16.mxu1 %v2874_v15  ;;  %v2926_v60 = vpack.c.bf16 %v1378_v59, %v1377_v58  ;;  %v1364_v15 = vld [vmem:[%s4557_s2 + $0x238] sm:$0xff] }
  0x8a   : > { %2913 = vmatpush3.bf16.msra.mxu0 %v2912_v25  ;;  %v2932_v48 = vpack.c.bf16 %v1364_v15, %v1363_v5  ;;  %v1388_v25 = vld [vmem:[%s4557_s2 + $0x2f8] sm:$0xff] }
  0x8b   : > { %2915 = vmatprep.subr.bf16.mxu0 %v2914_v38  ;;  %v2946_v26 = vpack.c.bf16 %v1388_v25, %v1387_v22 }
  0x8c   : > { %2877 = vmatpush3.bf16.msra.mxu1 %v2876_v45  ;;  %v1382_v45 = vld [vmem:[%s4557_s2 + $0x2c8] sm:$0xff] }
  0x8d   : > { %2879 = vmatprep.subr.bf16.mxu1 %v2878_v11  ;;  %v2934_v4 = vpack.c.bf16 %v1382_v45, %v1381_v7  ;;  %v1368_v11 = vld [vmem:[%s4557_s2 + $0x258] sm:$0xff] }
  0x8e   : > { %2917 = vmatpush3.bf16.msra.mxu0 %v2916_v46  ;;  %v2940_v12 = vpack.c.bf16 %v1368_v11, %v1367_v10 }
  0x8f   : > { %2951 = vmatprep.subr.bf16.mxu0 %v2950_v53 }
  0x90   : > { %2881 = vmatpush3.bf16.msra.mxu1 %v2880_v16  ;;  %v1386_v16 = vld [vmem:[%s4557_s2 + $0x2e8] sm:$0xff] }
  0x91   : > { %2883 = vmatprep.subr.bf16.mxu1 %v2882_v28  ;;  %v2942_v17 = vpack.c.bf16 %v1386_v16, %v1385_v14  ;;  %v1372_v28 = vld [vmem:[%s4557_s2 + $0x278] sm:$0xff] }
  0x92   : > { %v2948_v29 = vpack.c.bf16 %v1372_v28, %v1371_v27 }
  0x94   : > { %2885 = vmatpush3.bf16.msra.mxu1 %v2884_v33  ;;  %v1422_v33 = vld [vmem:[%s4557_s2 + $0x408] sm:$0xff] }
  0x95   : > { %2919 = vmatprep.subr.bf16.mxu1 %v2918_v62  ;;  %v4198_v34 = vpack.c.bf16 %v1422_v33, %v1421_v32 }
  0x97   : > { %1502 = vmatmul.mubr.f32.vlgmr.msra.gmra.mrb[32].mxu1 %v4082_v42 }
  0x98   : > { %2921 = vmatpush3.bf16.msra.mxu1 %v2920_v31 }
  0x99   : > { %2923 = vmatprep.subr.bf16.mxu1 %v2922_v56 }
  0x9c   : > { %2925 = vmatpush3.bf16.msra.mxu1 %v2924_v61 }
  0x9d   : > { %2927 = vmatprep.subr.bf16.mxu1 %v2926_v60 }
  0xa0   : > { %2929 = vmatpush3.bf16.msra.mxu1 %v2928_v1 }
  0xa1   : > { %2931 = vmatprep.subr.bf16.mxu1 %v2930_v3 }
  0xa4   : > { %2933 = vmatpush3.bf16.msra.mxu1 %v2932_v48 }
  0xa5   : > { %2935 = vmatprep.subr.bf16.mxu1 %v2934_v4 }
  0xa8   : > { %2937 = vmatpush3.bf16.msra.mxu1 %v2936_v63 }
  0xa9   : > { %2939 = vmatprep.subr.bf16.mxu1 %v2938_v8 }
  0xac   : > { %2941 = vmatpush3.bf16.msra.mxu1 %v2940_v12 }
  0xad   : > { %2943 = vmatprep.subr.bf16.mxu1 %v2942_v17 }
  0xb0   : > { %2945 = vmatpush3.bf16.msra.mxu1 %v2944_v21 }
  0xb1   : > { %2947 = vmatprep.subr.bf16.mxu1 %v2946_v26 }
  0xb4   : > { %2949 = vmatpush3.bf16.msra.mxu1 %v2948_v29 }
  0xb5   : > { %2983 = vmatprep.subr.bf16.mxu1 %v4198_v34 }
 0x104   : > { %v2142_v35 = vpop.f32.mrb[0].mxu0 }
 0x105   : > { %v2198_v38 = vpop.f32.mrb[0].mxu1  ;;  %v2143_v40 = vpop.f32.mrb[1].mxu0 }
 0x106   : > { %v2144_v41 = vadd.f32 %v2143_v40, %v2142_v35  ;;  %v2199_v44 = vpop.f32.mrb[1].mxu1 }
 0x107   : > { %v2200_v46 = vadd.f32 %v2199_v44, %v2198_v38 }
 0x108   : > { %v2145_v24 = vpop.f32.mrb[2].mxu0 }
 0x109   : > { %v753_v49 = vadd.f32 %v2200_v46, %v2144_v41  ;;  %v2201_v50 = vpop.f32.mrb[2].mxu1  ;;  %v2146_v62 = vpop.f32.mrb[3].mxu0 }
 0x10a   : > { %v2147_v9 = vadd.f32 %v2146_v62, %v2145_v24  ;;  %v2202_v51 = vpop.f32.mrb[3].mxu1 }
 0x10b   : > { %v2203_v18 = vadd.f32 %v2202_v51, %v2201_v50 }
 0x10c   : > { %v2148_v31 = vpop.f32.mrb[4].mxu0 }
 0x10d   : > { %v758_v52 = vadd.f32 %v2203_v18, %v2147_v9  ;;  %v2204_v53 = vpop.f32.mrb[4].mxu1  ;;  %v2149_v39 = vpop.f32.mrb[5].mxu0 }
 0x10e   : > { %v2150_v54 = vadd.f32 %v2149_v39, %v2148_v31  ;;  %v2205_v56 = vpop.f32.mrb[5].mxu1 }
 0x10f   : > { %v2206_v13 = vadd.f32 %v2205_v56, %v2204_v53 }
 0x110   : > { %v2151_v57 = vpop.f32.mrb[6].mxu0 }
 0x111   : > { %v763_v61 = vadd.f32 %v2206_v13, %v2150_v54  ;;  %v2207_v58 = vpop.f32.mrb[6].mxu1  ;;  %v2152_v59 = vpop.f32.mrb[7].mxu0 }
 0x112   : > { %v2153_v60 = vadd.f32 %v2152_v59, %v2151_v57  ;;  %v2208_v37 = vpop.f32.mrb[7].mxu1 }
 0x113   : > { %v2209_v0 = vadd.f32 %v2208_v37, %v2207_v58 }
 0x114   : > { %v2154_v1 = vpop.f32.mrb[8].mxu0 }
 0x115   : > { %v768_v23 = vadd.f32 %v2209_v0, %v2153_v60  ;;  %v2210_v2 = vpop.f32.mrb[8].mxu1  ;;  %v2155_v3 = vpop.f32.mrb[9].mxu0 }
 0x116   : > { %v2156_v5 = vadd.f32 %v2155_v3, %v2154_v1  ;;  %v2211_v15 = vpop.f32.mrb[9].mxu1 }
 0x117   : > { %v2212_v48 = vadd.f32 %v2211_v15, %v2210_v2 }
 0x118   : > { %v2157_v7 = vpop.f32.mrb[10].mxu0 }
 0x119   : > { %v773_v45 = vadd.f32 %v2212_v48, %v2156_v5  ;;  %v2213_v4 = vpop.f32.mrb[10].mxu1  ;;  %v2158_v30 = vpop.f32.mrb[11].mxu0 }
 0x11a   : > { %v2159_v55 = vadd.f32 %v2158_v30, %v2157_v7  ;;  %v2214_v63 = vpop.f32.mrb[11].mxu1 }
 0x11b   : > { %v2215_v47 = vadd.f32 %v2214_v63, %v2213_v4 }
 0x11c   : > { %v2160_v6 = vpop.f32.mrb[12].mxu0 }
 0x11d   : > { %v778_v8 = vadd.f32 %v2215_v47, %v2159_v55  ;;  %v2216_v10 = vpop.f32.mrb[12].mxu1  ;;  %v2161_v11 = vpop.f32.mrb[13].mxu0 }
 0x11e   : > { %v2162_v12 = vadd.f32 %v2161_v11, %v2160_v6  ;;  %v2217_v14 = vpop.f32.mrb[13].mxu1 }
 0x11f   : > { %v2218_v16 = vadd.f32 %v2217_v14, %v2216_v10 }
 0x120   : > { %v2163_v17 = vpop.f32.mrb[14].mxu0 }
 0x121   : > { %v783_v19 = vadd.f32 %v2218_v16, %v2162_v12  ;;  %v2219_v20 = vpop.f32.mrb[14].mxu1  ;;  %v2164_v21 = vpop.f32.mrb[15].mxu0 }
 0x122   : > { %v2165_v22 = vadd.f32 %v2164_v21, %v2163_v17  ;;  %v2220_v25 = vpop.f32.mrb[15].mxu1 }
 0x123   : > { %v2221_v26 = vadd.f32 %v2220_v25, %v2219_v20 }
 0x124   : > { %v2254_v27 = vpop.f32.mrb[16].mxu0 }
 0x125   : > { %v788_v28 = vadd.f32 %v2221_v26, %v2165_v22  ;;  %v2255_v29 = vpop.f32.mrb[17].mxu0 }
 0x126   : > { %v2256_v32 = vadd.f32 %v2255_v29, %v2254_v27  ;;  %v2310_v33 = vpop.f32.mrb[16].mxu1 }
 0x127   : > { %v2311_v35 = vpop.f32.mrb[17].mxu1 }
 0x128   : > { %v858_v38 = vadd.f32 %v2256_v32, %v753_v49  ;;  %v2312_v40 = vadd.f32 %v2311_v35, %v2310_v33  ;;  %v2257_v41 = vpop.f32.mrb[18].mxu0 }
 0x129   : > { %v2258_v44 = vpop.f32.mrb[19].mxu0 }
 0x12a   : > { %v2259_v46 = vadd.f32 %v2258_v44, %v2257_v41  ;;  %v2313_v24 = vpop.f32.mrb[18].mxu1  ;;  %v963_v50 = vadd.f32 %v2312_v40, %v858_v38 }
 0x12b   : > { %v2314_v62 = vpop.f32.mrb[19].mxu1 }
 0x12c   : > { %v863_v9 = vadd.f32 %v2259_v46, %v758_v52  ;;  %v2315_v51 = vadd.f32 %v2314_v62, %v2313_v24  ;;  %v2260_v18 = vpop.f32.mrb[20].mxu0 }
 0x12d   : > { %v2261_v31 = vpop.f32.mrb[21].mxu0 }
 0x12e   : > { %v2262_v53 = vadd.f32 %v2261_v31, %v2260_v18  ;;  %v2316_v39 = vpop.f32.mrb[20].mxu1  ;;  %v968_v54 = vadd.f32 %v2315_v51, %v863_v9 }
 0x12f   : > { %v2317_v56 = vpop.f32.mrb[21].mxu1 }
 0x130   : > { %v868_v13 = vadd.f32 %v2262_v53, %v763_v61  ;;  %v2318_v57 = vadd.f32 %v2317_v56, %v2316_v39  ;;  %v2263_v58 = vpop.f32.mrb[22].mxu0 }
 0x131   : > { %v2264_v59 = vpop.f32.mrb[23].mxu0 }
 0x132   : > { %v2265_v49 = vadd.f32 %v2264_v59, %v2263_v58  ;;  %v2319_v60 = vpop.f32.mrb[22].mxu1  ;;  %v973_v37 = vadd.f32 %v2318_v57, %v868_v13 }
 0x133   : > { %v2320_v0 = vpop.f32.mrb[23].mxu1 }
 0x134   : > { %v873_v1 = vadd.f32 %v2265_v49, %v768_v23  ;;  %v2321_v2 = vadd.f32 %v2320_v0, %v2319_v60  ;;  %v2266_v3 = vpop.f32.mrb[24].mxu0 }
 0x135   : > { %v2267_v5 = vpop.f32.mrb[25].mxu0 }
 0x136   : > { %v2268_v52 = vadd.f32 %v2267_v5, %v2266_v3  ;;  %v2322_v15 = vpop.f32.mrb[24].mxu1  ;;  %v978_v48 = vadd.f32 %v2321_v2, %v873_v1 }
 0x137   : > { %v2323_v7 = vpop.f32.mrb[25].mxu1 }
 0x138   : > { %v878_v4 = vadd.f32 %v2268_v52, %v773_v45  ;;  %v2324_v30 = vadd.f32 %v2323_v7, %v2322_v15  ;;  %v2269_v55 = vpop.f32.mrb[26].mxu0  ;;  %v1242_v15 = vrot.slane %v4074_v36, 2  ;;  %v1407_v36 = vld [vmem:[%s4557_s2 + $0x390] sm:$0xff] }
 0x139   : > { %v2270_v63 = vpop.f32.mrb[27].mxu0 }
 0x13a   : > { %v2271_v61 = vadd.f32 %v2270_v63, %v2269_v55  ;;  %v2325_v47 = vpop.f32.mrb[26].mxu1  ;;  %v983_v6 = vadd.f32 %v2324_v30, %v878_v4  ;;  %v1389_v30 = vld [vmem:[%s4557_s2 + $0x300] sm:$0xff]  ;;  %v1390_v55 = vld [vmem:[%s4557_s2 + $0x308] sm:$0xff] }
 0x13b   : > { %v2326_v10 = vpop.f32.mrb[27].mxu1 }
 0x13c   : > { %v883_v11 = vadd.f32 %v2271_v61, %v778_v8  ;;  %v2327_v12 = vadd.f32 %v2326_v10, %v2325_v47  ;;  %v2272_v14 = vpop.f32.mrb[28].mxu0  ;;  %v2099_v8 = vld [vmem:[%s4558_s3] ss:$0 sm:$0xff]  ;;  %v1408_v47 = vld [vmem:[%s4557_s2 + $0x398] sm:$0xff] }
 0x13d   : > { %v2273_v16 = vpop.f32.mrb[29].mxu0 }
 0x13e   : > { %v2274_v23 = vadd.f32 %v2273_v16, %v2272_v14  ;;  %v2328_v17 = vpop.f32.mrb[28].mxu1  ;;  %v988_v20 = vadd.f32 %v2327_v12, %v883_v11 }
 0x13f   : > { %v2329_v21 = vpop.f32.mrb[29].mxu1 }
 0x140   : > { %v888_v22 = vadd.f32 %v2274_v23, %v783_v19  ;;  %v2330_v25 = vadd.f32 %v2329_v21, %v2328_v17  ;;  %v2275_v26 = vpop.f32.mrb[30].mxu0  ;;  %v2100_v19 = vld [vmem:[%s4559_s4] ss:$0 sm:$0xff]  ;;  %v2952_v23 = vpack.c.bf16 %v1390_v55, %v1389_v30 }
 0x141   : > { %v2276_v27 = vpop.f32.mrb[31].mxu0 }
 0x142   : > { %v2277_v45 = vadd.f32 %v2276_v27, %v2275_v26  ;;  %v2331_v29 = vpop.f32.mrb[30].mxu1  ;;  %v993_v32 = vadd.f32 %v2330_v25, %v888_v22 }
 0x143   : > { %v2332_v33 = vpop.f32.mrb[31].mxu1 }
 0x144   : > { %v893_v35 = vadd.f32 %v2277_v45, %v788_v28  ;;  %v2333_v38 = vadd.f32 %v2332_v33, %v2331_v29  ;;  %v2640_v40 = vpop.f32.mrb[32].mxu0  ;;  %v2954_v45 = vpack.c.bf16 %v1408_v47, %v1407_v36  ;;  %v1392_v29 = vld [vmem:[%s4557_s2 + $0x318] sm:$0xff] }
 0x145   : > { %v1073_v41 = vadd.f32 %v2640_v40, %v968_v54  ;;  %v1067_v44 = vpop.f32.mrb[33].mxu0  ;;  %v1409_v40 = vld [vmem:[%s4557_s2 + $0x3a0] sm:$0xff] }
 0x146   : > { %v1068_v46 = vadd.f32 %v1067_v44, %v963_v50  ;;  %v998_v24 = vadd.f32 %v2333_v38, %v893_v35 }
 0x147   : > { %v1114_v62 = vmul.f32 %v2099_v8, %v1073_v41 }
 0x148   : > { %v1113_v9 = vmul.f32 %v2099_v8, %v1068_v46  ;;  %v2643_v51 = vpop.f32.mrb[34].mxu0 }
 0x149   : > { %v1129_v18 = vadd.f32 %v2100_v19, %v1114_v62  ;;  %v1083_v31 = vadd.f32 %v2643_v51, %v978_v48  ;;  %v1077_v28 = vpop.f32.mrb[35].mxu0  ;;  %v1393_v62 = vld [vmem:[%s4557_s2 + $0x320] sm:$0xff]  ;;  %v1411_v51 = vld [vmem:[%s4557_s2 + $0x3b0] sm:$0xff] }
 0x14a   : > { %v1128_v53 = vadd.f32 %v2100_v19, %v1113_v9  ;;  %v1078_v39 = vadd.f32 %v1077_v28, %v973_v37  ;;  %v1241_v37 = vrot.slane %v4082_v42, 2  ;;  %v1394_v9 = vld [vmem:[%s4557_s2 + $0x328] sm:$0xff] }
 0x14b   : > { %v1137_v56 = vmax.f32 %v1129_v18, 0.0  ;;  %v1116_v13 = vmul.f32 %v2099_v8, %v1083_v31 }
 0x14c   : > { %v1136_v57 = vmax.f32 %v1128_v53, 0.0  ;;  %v1115_v58 = vmul.f32 %v2099_v8, %v1078_v39  ;;  %v2646_v54 = vpop.f32.mrb[36].mxu0  ;;  %v1243_v14 = vsel %vm384_vm1, %v1241_v37, %v1242_v15 }
 0x14d   : > { %1166 = vst [vmem:[#allocation3 + $0x21] sm:$0xff] %v1137_v56  ;;  %v1131_v59 = vadd.f32 %v2100_v19, %v1116_v13  ;;  %v1093_v49 = vadd.f32 %v2646_v54, %v988_v20  ;;  %v1087_v60 = vpop.f32.mrb[37].mxu0  ;;  %v1391_v20 = vld [vmem:[%s4557_s2 + $0x310] sm:$0xff]  ;;  %v1412_v56 = vld [vmem:[%s4557_s2 + $0x3b8] sm:$0xff] }
 0x14e   : > { %1165 = vst [vmem:[#allocation3 + $0x11] sm:$0xff] %v1136_v57  ;;  %v1130_v50 = vadd.f32 %v2100_v19, %v1115_v58  ;;  %v1088_v0 = vadd.f32 %v1087_v60, %v983_v6  ;;  %v2960_v60 = vpack.c.bf16 %v1394_v9, %v1393_v62 }
 0x14f   : > { %v1139_v1 = vmax.f32 %v1131_v59, 0.0  ;;  %v1118_v2 = vmul.f32 %v2099_v8, %v1093_v49 }
 0x150   : > { %v1138_v3 = vmax.f32 %v1130_v50, 0.0  ;;  %v1117_v5 = vmul.f32 %v2099_v8, %v1088_v0  ;;  %v2649_v52 = vpop.f32.mrb[38].mxu0 }
 0x151   : > { %1168 = vst [vmem:[#allocation3 + $0x41] sm:$0xff] %v1139_v1  ;;  %v1133_v48 = vadd.f32 %v2100_v19, %v1118_v2  ;;  %v1103_v7 = vadd.f32 %v2649_v52, %v998_v24  ;;  %v1097_v4 = vpop.f32.mrb[39].mxu0  ;;  %v2956_v24 = vpack.c.bf16 %v1392_v29, %v1391_v20  ;;  %v2962_v1 = vpack.c.bf16 %v1412_v56, %v1411_v51  ;;  %v1395_v2 = vld [vmem:[%s4557_s2 + $0x330] sm:$0xff] }
 0x152   : > { %1167 = vst [vmem:[#allocation3 + $0x31] sm:$0xff] %v1138_v3  ;;  %v1132_v63 = vadd.f32 %v2100_v19, %v1117_v5  ;;  %v1098_v61 = vadd.f32 %v1097_v4, %v993_v32  ;;  %v1396_v3 = vld [vmem:[%s4557_s2 + $0x338] sm:$0xff]  ;;  %v1414_v4 = vld [vmem:[%s4557_s2 + $0x3c8] sm:$0xff]  ;;  %v1399_v29 = vld [vmem:[%s4557_s2 + $0x350] sm:$0xff] }
 0x153   : > { %v1141_v6 = vmax.f32 %v1133_v48, 0.0  ;;  %v1120_v10 = vmul.f32 %v2099_v8, %v1103_v7  ;;  %v1413_v7 = vld [vmem:[%s4557_s2 + $0x3c0] sm:$0xff] }
 0x154   : > { %v1140_v11 = vmax.f32 %v1132_v63, 0.0  ;;  %v1119_v12 = vmul.f32 %v2099_v8, %v1098_v61  ;;  %v4224_v16 = vld [vmem:[#allocation3 + $0x20] sm:$0xff]  ;;  %v1178_v17 = vld [vmem:[#allocation3 + $0x28] sm:$0x3]  ;;  %v2964_v63 = vpack.c.bf16 %v1396_v3, %v1395_v2 }
 0x155   : > { %1170 = vst [vmem:[#allocation3 + $0x61] sm:$0xff] %v1141_v6  ;;  %v1135_v21 = vadd.f32 %v2100_v19, %v1120_v10  ;;  %v1175_v22 = vld [vmem:[#allocation3 + $0x10] sm:$0xff]  ;;  %v1176_v25 = vld [vmem:[#allocation3 + $0x18] sm:$0x3]  ;;  %v1215_v26 = vrot.slane %v4224_v16, 1  ;;  %v1216_v27 = vrot.slane %v1178_v17, 1  ;;  %v2966_v6 = vpack.c.bf16 %v1414_v4, %v1413_v7 }
 0x156   : > { %1169 = vst [vmem:[#allocation3 + $0x51] sm:$0xff] %v1140_v11  ;;  %v1134_v32 = vadd.f32 %v2100_v19, %v1119_v12  ;;  %1606 = vmatprep.mubr.f32.mxu0 %v1175_v22  ;;  %v1212_v33 = vrot.slane %v1175_v22, 1  ;;  %v1213_v35 = vrot.slane %v1176_v25, 1  ;;  %v1244_v38 = vrot.slane %v1175_v22, 2  ;;  %v1410_v8 = vld [vmem:[%s4557_s2 + $0x3a8] sm:$0xff]  ;;  %v1397_v61 = vld [vmem:[%s4557_s2 + $0x340] sm:$0xff] }
 0x157   : > { %v1143_v41 = vmax.f32 %v1135_v21, 0.0  ;;  %1607 = vmatmul.mubr.f32.vlgmr.msra.gmra.mrb[40].mxu0 %v1243_v14  ;;  %v1245_v44 = vrot.slane %v1176_v25, 2  ;;  %v4254_v18 = vsel %vm351_vm0, %v1215_v26, %v1216_v27  ;;  %v1247_v53 = vrot.slane %v4224_v16, 2  ;;  %v1398_v10 = vld [vmem:[%s4557_s2 + $0x348] sm:$0xff]  ;;  %v1415_v11 = vld [vmem:[%s4557_s2 + $0x3d0] sm:$0xff]  ;;  %v1416_v12 = vld [vmem:[%s4557_s2 + $0x3d8] sm:$0xff] }
 0x158   : > { %v1142_v46 = vmax.f32 %v1134_v32, 0.0  ;;  %1611 = vmatprep.mubr.f32.mxu0 %v4224_v16  ;;  %2953 = vmatpush3.bf16.msra.mxu0 %v2952_v23  ;;  %v4241_v19 = vsel %vm351_vm0, %v1212_v33, %v1213_v35  ;;  %v2958_v39 = vpack.c.bf16 %v1410_v8, %v1409_v40  ;;  %v1248_v54 = vrot.slane %v1178_v17, 2  ;;  %v4266_v59 = vld [vmem:[#allocation3 + $0x40] sm:$0xff]  ;;  %v1182_v49 = vld [vmem:[#allocation3 + $0x48] sm:$0x3]  ;;  %v1400_v32 = vld [vmem:[%s4557_s2 + $0x358] sm:$0xff] }
 0x159   : > { %1172 = vst [vmem:[#allocation3 + $0x81] sm:$0xff] %v1143_v41  ;;  %1506 = vmatprep.mubr.f32.mxu1 %v4241_v19  ;;  %2955 = vmatprep.subr.bf16.mxu0 %v2954_v45  ;;  %v4256_v31 = vld [vmem:[#allocation3 + $0x30] sm:$0xff]  ;;  %v1180_v28 = vld [vmem:[#allocation3 + $0x38] sm:$0x3]  ;;  %v4263_v13 = vsel %vm384_vm1, %v1244_v38, %v1245_v44  ;;  %v1221_v50 = vrot.slane %v4266_v59, 1  ;;  %v1222_v0 = vrot.slane %v1182_v49, 1  ;;  %v2968_v25 = vpack.c.bf16 %v1398_v10, %v1397_v61 }
 0x15a   : > { %1171 = vst [vmem:[#allocation3 + $0x71] sm:$0xff] %v1142_v46  ;;  %1507 = vmatmul.mubr.f32.gmra.mrb[34].mxu1 %v1175_v22  ;;  %v1218_v57 = vrot.slane %v4256_v31, 1  ;;  %v1219_v58 = vrot.slane %v1180_v28, 1  ;;  %v4283_v52 = vsel %vm384_vm1, %v1247_v53, %v1248_v54  ;;  %v1250_v15 = vrot.slane %v4256_v31, 2  ;;  %v1417_v8 = vld [vmem:[%s4557_s2 + $0x3e0] sm:$0xff]  ;;  %v1418_v41 = vld [vmem:[%s4557_s2 + $0x3e8] sm:$0xff] }
 0x15b   : > { %1511 = vmatprep.mubr.f32.mxu1 %v4254_v18  ;;  %1612 = vmatmul.mubr.f32.gmra.mrb[42].mxu0 %v4263_v13  ;;  %v1251_v48 = vrot.slane %v1180_v28, 2  ;;  %v4301_v36 = vsel %vm351_vm0, %v1221_v50, %v1222_v0  ;;  %v1253_v47 = vrot.slane %v4266_v59, 2  ;;  %v1254_v20 = vrot.slane %v1182_v49, 2  ;;  %v1401_v28 = vld [vmem:[%s4557_s2 + $0x360] sm:$0xff]  ;;  %v1402_v53 = vld [vmem:[%s4557_s2 + $0x368] sm:$0xff]  ;;  %v1419_v54 = vld [vmem:[%s4557_s2 + $0x3f0] sm:$0xff] }
 0x15c   : > { %1616 = vmatprep.mubr.f32.mxu0 %v4256_v31  ;;  %2957 = vmatpush3.bf16.msra.mxu0 %v2956_v24  ;;  %v4280_v5 = vsel %vm351_vm0, %v1218_v57, %v1219_v58  ;;  %v4318_v21 = vld [vmem:[#allocation3 + $0x60] sm:$0xff]  ;;  %v1186_v22 = vld [vmem:[#allocation3 + $0x68] sm:$0x3]  ;;  %v2970_v45 = vpack.c.bf16 %v1416_v12, %v1415_v11  ;;  %v2972_v24 = vpack.c.bf16 %v1400_v32, %v1399_v29  ;;  %v1420_v49 = vld [vmem:[%s4557_s2 + $0x3f8] sm:$0xff] }
 0x15d   : > { %2959 = vmatprep.subr.bf16.mxu0 %v2958_v39  ;;  %v4294_v30 = vld [vmem:[#allocation3 + $0x50] sm:$0xff]  ;;  %v1184_v55 = vld [vmem:[#allocation3 + $0x58] sm:$0x3]  ;;  %v4315_v14 = vsel %vm384_vm1, %v1250_v15, %v1251_v48  ;;  %v1227_v26 = vrot.slane %v4318_v21, 1  ;;  %v1228_v27 = vrot.slane %v1186_v22, 1  ;;  %v4335_v35 = vsel %vm384_vm1, %v1253_v47, %v1254_v20  ;;  %v1426_v10 = vld [vmem:[%s4557_s2 + $0x428] sm:$0xff] }
 0x15e   : > { %1512 = vmatmul.mubr.f32.gmra.mrb[36].mxu1 %v4224_v16  ;;  %v1224_v23 = vrot.slane %v4294_v30, 1  ;;  %v1225_v17 = vrot.slane %v1184_v55, 1  ;;  %v1256_v38 = vrot.slane %v4294_v30, 2  ;;  %v1257_v40 = vrot.slane %v1184_v55, 2  ;;  %v1403_v0 = vld [vmem:[%s4557_s2 + $0x370] sm:$0xff]  ;;  %v1424_v61 = vld [vmem:[%s4557_s2 + $0x418] sm:$0xff] }
 0x15f   : > { %1516 = vmatprep.mubr.f32.mxu1 %v4280_v5  ;;  %1617 = vmatmul.mubr.f32.gmra.mrb[44].mxu0 %v4283_v52  ;;  %v4350_v62 = vsel %vm351_vm0, %v1227_v26, %v1228_v27  ;;  %v1259_v9 = vrot.slane %v4318_v21, 2  ;;  %v2974_v51 = vpack.c.bf16 %v1418_v41, %v1417_v8  ;;  %v1260_v58 = vrot.slane %v1186_v22, 2  ;;  %v1428_v11 = vld [vmem:[%s4557_s2 + $0x438] sm:$0xff]  ;;  %v1435_v29 = vld [vmem:[%s4557_s2 + $0x470] sm:$0xff] }
 0x160   : > { %1621 = vmatprep.mubr.f32.mxu0 %v4266_v59  ;;  %2961 = vmatpush3.bf16.msra.mxu0 %v2960_v60  ;;  %v4332_v33 = vsel %vm351_vm0, %v1224_v23, %v1225_v17  ;;  %v4361_v39 = vsel %vm384_vm1, %v1256_v38, %v1257_v40  ;;  %v2976_v60 = vpack.c.bf16 %v1402_v53, %v1401_v28  ;;  %v4389_v7 = vld [vmem:[#allocation3 + $0x80] sm:$0xff]  ;;  %v1432_v12 = vld [vmem:[%s4557_s2 + $0x458] sm:$0xff]  ;;  %v1434_v17 = vld [vmem:[%s4557_s2 + $0x468] sm:$0xff] }
 0x161   : > { %2963 = vmatprep.subr.bf16.mxu0 %v2962_v1  ;;  %v4346_v44 = vld [vmem:[#allocation3 + $0x70] sm:$0xff]  ;;  %v1188_v46 = vld [vmem:[#allocation3 + $0x78] sm:$0x3]  ;;  %v2978_v50 = vpack.c.bf16 %v1420_v49, %v1419_v54  ;;  %v4384_v3 = vsel %vm384_vm1, %v1259_v9, %v1260_v58  ;;  %v1279_v27 = vrot.slane %v4389_v7, 2 }
 0x162   : > { %1517 = vmatmul.mubr.f32.gmra.mrb[38].mxu1 %v4256_v31  ;;  %v1230_v56 = vrot.slane %v4346_v44, 1  ;;  %v1231_v57 = vrot.slane %v1188_v46, 1  ;;  %v1404_v1 = vld [vmem:[%s4557_s2 + $0x378] sm:$0xff]  ;;  %v1262_v15 = vrot.slane %v4346_v44, 2  ;;  %v1263_v48 = vrot.slane %v1188_v46, 2 }
 0x163   : > { %1521 = vmatprep.mubr.f32.mxu1 %v4301_v36  ;;  %1622 = vmatmul.mubr.f32.gmra.mrb[46].mxu0 %v4315_v14  ;;  %v2980_v4 = vpack.c.bf16 %v1404_v1, %v1403_v0  ;;  %v1192_v20 = vld [vmem:[#allocation3 + $0x98] sm:$0x3] }
 0x164   : > { %1626 = vmatprep.mubr.f32.mxu0 %v4294_v30  ;;  %2965 = vmatpush3.bf16.msra.mxu0 %v2964_v63  ;;  %v4381_v2 = vsel %vm351_vm0, %v1230_v56, %v1231_v57  ;;  %v4394_v55 = vsel %vm384_vm1, %v1262_v15, %v1263_v48  ;;  %v1423_v63 = vld [vmem:[%s4557_s2 + $0x410] sm:$0xff]  ;;  %v1286_v26 = vrot.slane %v1192_v20, 1 }
 0x165   : > { %2967 = vmatprep.subr.bf16.mxu0 %v2966_v6  ;;  %v2986_v47 = vpack.c.bf16 %v1424_v61, %v1423_v63  ;;  %v1425_v6 = vld [vmem:[%s4557_s2 + $0x420] sm:$0xff] }
 0x166   : > { %1522 = vmatmul.mubr.f32.gmra.mrb[40].mxu1 %v4266_v59  ;;  %v1287_v38 = vsel %vm351_vm0, %v1209_v43, %v1286_v26  ;;  %v1290_v43 = vrot.slane %v1192_v20, 2 }
 0x167   : > { %1526 = vmatprep.mubr.f32.mxu1 %v4332_v33  ;;  %1627 = vmatmul.mubr.f32.gmra.mrb[48].mxu0 %v4335_v35 }
 0x168   : > { %1631 = vmatprep.mubr.f32.mxu0 %v4318_v21  ;;  %2969 = vmatpush3.bf16.msra.mxu0 %v2968_v25  ;;  %v1291_v8 = vsel %vm384_vm1, %v1241_v37, %v1290_v43 }
 0x169   : > { %2971 = vmatprep.subr.bf16.mxu0 %v2970_v45 }
 0x16a   : > { %1527 = vmatmul.mubr.f32.gmra.mrb[42].mxu1 %v4294_v30 }
 0x16b   : > { %1531 = vmatprep.mubr.f32.mxu1 %v4350_v62  ;;  %1632 = vmatmul.mubr.f32.gmra.mrb[50].mxu0 %v4361_v39 }
 0x16c   : > { %1636 = vmatprep.mubr.f32.mxu0 %v4346_v44  ;;  %2973 = vmatpush3.bf16.msra.mxu0 %v2972_v24 }
 0x16d   : > { %2975 = vmatprep.subr.bf16.mxu0 %v2974_v51 }
 0x16e   : > { %1532 = vmatmul.mubr.f32.gmra.mrb[44].mxu1 %v4318_v21 }
 0x16f   : > { %1536 = vmatprep.mubr.f32.mxu1 %v4381_v2  ;;  %1637 = vmatmul.mubr.f32.gmra.mrb[52].mxu0 %v4384_v3 }
 0x170   : > { %1641 = vmatprep.mubr.f32.mxu0 %v4389_v7  ;;  %2977 = vmatpush3.bf16.msra.mxu0 %v2976_v60 }
 0x171   : > { %2979 = vmatprep.subr.bf16.mxu0 %v2978_v50 }
 0x172   : > { %1537 = vmatmul.mubr.f32.gmra.mrb[46].mxu1 %v4346_v44 }
 0x173   : > { %1642 = vmatmul.mubr.f32.gmra.mrb[54].mxu0 %v4394_v55  ;;  %1711 = vmatprep.mubr.f32.mxu1 %v4263_v13  ;;  %v2990_v13 = vpack.c.bf16 %v1426_v10, %v1425_v6 }
 0x174   : > { %2981 = vmatpush3.bf16.msra.mxu0 %v2980_v4  ;;  %1816 = vmatprep.mubr.f32.mxu0 %v4254_v18 }
 0x176   : > { %1712 = vmatmul.mubr.f32.vlgmr.msra.gmra.mrb[48].mxu1 %v4241_v19  ;;  %v1427_v19 = vld [vmem:[%s4557_s2 + $0x430] sm:$0xff] }
 0x177   : > { %1716 = vmatprep.mubr.f32.mxu1 %v4283_v52  ;;  %1817 = vmatmul.mubr.f32.vlgmr.msra.gmra.mrb[56].mxu0 %v4224_v16  ;;  %v1429_v16 = vld [vmem:[%s4557_s2 + $0x440] sm:$0xff] }
 0x178   : > { %2985 = vmatpush3.bf16.msra.mxu1 %v4198_v34  ;;  %1821 = vmatprep.mubr.f32.mxu0 %v4280_v5  ;;  %v2994_v34 = vpack.c.bf16 %v1428_v11, %v1427_v19 }
 0x179   : > { %2987 = vmatprep.subr.bf16.mxu1 %v2986_v47 }
 0x17a   : > { %1717 = vmatmul.mubr.f32.gmra.mrb[50].mxu1 %v4254_v18  ;;  %v1430_v18 = vld [vmem:[%s4557_s2 + $0x448] sm:$0xff] }
 0x17b   : > { %1721 = vmatprep.mubr.f32.mxu1 %v4315_v14  ;;  %1822 = vmatmul.mubr.f32.gmra.mrb[58].mxu0 %v4256_v31  ;;  %v2998_v31 = vpack.c.bf16 %v1430_v18, %v1429_v16 }
 0x17c   : > { %2989 = vmatpush3.bf16.msra.mxu1 %v2986_v47  ;;  %1826 = vmatprep.mubr.f32.mxu0 %v4301_v36 }
 0x17d   : > { %2991 = vmatprep.subr.bf16.mxu1 %v2990_v13 }
 0x17e   : > { %1722 = vmatmul.mubr.f32.gmra.mrb[52].mxu1 %v4280_v5  ;;  %v1431_v5 = vld [vmem:[%s4557_s2 + $0x450] sm:$0xff] }
 0x17f   : > { %1726 = vmatprep.mubr.f32.mxu1 %v4335_v35  ;;  %1827 = vmatmul.mubr.f32.gmra.mrb[60].mxu0 %v4266_v59  ;;  %v1190_v59 = vld [vmem:[#allocation3 + $0x88] sm:$0x3]  ;;  %v3002_v23 = vpack.c.bf16 %v1432_v12, %v1431_v5 }
 0x180   : > { %2993 = vmatpush3.bf16.msra.mxu1 %v2990_v13  ;;  %1831 = vmatprep.mubr.f32.mxu0 %v4332_v33  ;;  %v1276_v22 = vrot.slane %v1190_v59, 1  ;;  %v1280_v45 = vrot.slane %v1190_v59, 2 }
 0x181   : > { %2995 = vmatprep.subr.bf16.mxu1 %v2994_v34 }
 0x182   : > { %1727 = vmatmul.mubr.f32.gmra.mrb[54].mxu1 %v4301_v36  ;;  %v1433_v36 = vld [vmem:[%s4557_s2 + $0x460] sm:$0xff]  ;;  %v1281_v40 = vsel %vm384_vm1, %v1279_v27, %v1280_v45 }
 0x183   : > { %1731 = vmatprep.mubr.f32.mxu1 %v4361_v39  ;;  %1832 = vmatmul.mubr.f32.gmra.mrb[62].mxu0 %v4294_v30  ;;  %v1275_v30 = vrot.slane %v4389_v7, 1  ;;  %v3006_v25 = vpack.c.bf16 %v1434_v17, %v1433_v36 }
 0x184   : > { %2997 = vmatpush3.bf16.msra.mxu1 %v2994_v34  ;;  %1836 = vmatprep.mubr.f32.mxu0 %v4350_v62 }
 0x185   : > { %2999 = vmatprep.subr.bf16.mxu1 %v2998_v31  ;;  %v1277_v32 = vsel %vm351_vm0, %v1275_v30, %v1276_v22 }
 0x186   : > { %1732 = vmatmul.mubr.f32.gmra.mrb[56].mxu1 %v4332_v33 }
 0x187   : > { %1736 = vmatprep.mubr.f32.mxu1 %v4384_v3  ;;  %1837 = vmatmul.mubr.f32.gmra.mrb[64].mxu0 %v4318_v21  ;;  %v1436_v21 = vld [vmem:[%s4557_s2 + $0x478] sm:$0xff] }
 0x188   : > { %3001 = vmatpush3.bf16.msra.mxu1 %v2998_v31  ;;  %1841 = vmatprep.mubr.f32.mxu0 %v4381_v2  ;;  %v3010_v33 = vpack.c.bf16 %v1436_v21, %v1435_v29 }
 0x189   : > { %3003 = vmatprep.subr.bf16.mxu1 %v3002_v23 }
 0x18a   : > { %1737 = vmatmul.mubr.f32.gmra.mrb[58].mxu1 %v4350_v62 }
 0x18b   : > { %1741 = vmatprep.mubr.f32.mxu1 %v4394_v55  ;;  %1842 = vmatmul.mubr.f32.gmra.mrb[66].mxu0 %v4346_v44 }
 0x18c   : > { %3005 = vmatpush3.bf16.msra.mxu1 %v3002_v23  ;;  %1846 = vmatprep.mubr.f32.mxu0 %v1277_v32 }
 0x18d   : > { %3007 = vmatprep.subr.bf16.mxu1 %v3006_v25 }
 0x18e   : > { %1742 = vmatmul.mubr.f32.gmra.mrb[60].mxu1 %v4381_v2 }
 0x18f   : > { %1746 = vmatprep.mubr.f32.mxu1 %v1281_v40  ;;  %1847 = vmatmul.mubr.f32.gmra.mrb[68].mxu0 %v4389_v7 }
 0x190   : > { %3009 = vmatpush3.bf16.msra.mxu1 %v3006_v25  ;;  %1851 = vmatprep.mubr.f32.mxu0 %v1287_v38 }
 0x191   : > { %3011 = vmatprep.subr.bf16.mxu1 %v3010_v33 }
 0x192   : > { %1747 = vmatmul.mubr.f32.gmra.mrb[62].mxu1 %v1277_v32 }
 0x193   : > { %2682 = vmatprep.mubr.f32.mxu1 %v4283_v52  ;;  %1852 = vmatmul.mubr.f32.gmra.mrb[70].mxu0 %v4082_v42  ;;  %v2390_v52 = vpop.f32.mrb[32].mxu1 }
 0x194   : > { %3013 = vmatpush3.bf16.msra.mxu1 %v3010_v33  ;;  %v2391_v41 = vpop.f32.mrb[33].mxu1 }
 0x195   : > { %v2392_v44 = vadd.f32 %v2391_v41, %v2390_v52 }
 0x197   : > { %2683 = vmatmul.mubr.f32.vlgmr.msra.gmra.mrb[64].mxu1 %v4315_v14 }
 0x198   : > { %2685 = vmatprep.mubr.f32.mxu1 %v4335_v35 }
 0x19b   : > { %2686 = vmatmul.mubr.f32.gmra.mrb[66].mxu1 %v4361_v39 }
 0x19c   : > { %2688 = vmatprep.mubr.f32.mxu1 %v4384_v3 }
 0x19f   : > { %2689 = vmatmul.mubr.f32.gmra.mrb[68].mxu1 %v4394_v55 }
 0x1a0   : > { %2691 = vmatprep.mubr.f32.mxu1 %v1281_v40 }
 0x1a3   : > { %2692 = vmatmul.mubr.f32.gmra.mrb[70].mxu1 %v1291_v8 }
 0x22a   : > { %v2446_v46 = vpop.f32.mrb[40].mxu0 }
 0x22b   : > { %v2447_v14 = vpop.f32.mrb[41].mxu0 }
 0x22c   : > { %v2448_v24 = vadd.f32 %v2447_v14, %v2446_v46 }
 0x22d   : > { %v2393_v35 = vpop.f32.mrb[34].mxu1 }
 0x22e   : > { %v1609_v62 = vadd.f32 %v2448_v24, %v2392_v44  ;;  %v2394_v9 = vpop.f32.mrb[35].mxu1  ;;  %v2449_v51 = vpop.f32.mrb[42].mxu0 }
 0x22f   : > { %v2395_v28 = vadd.f32 %v2394_v9, %v2393_v35  ;;  %v2450_v53 = vpop.f32.mrb[43].mxu0 }
 0x230   : > { %v2451_v39 = vadd.f32 %v2450_v53, %v2449_v51 }
 0x231   : > { %v2396_v56 = vpop.f32.mrb[36].mxu1 }
 0x232   : > { %v1614_v57 = vadd.f32 %v2451_v39, %v2395_v28  ;;  %v2397_v58 = vpop.f32.mrb[37].mxu1  ;;  %v2452_v42 = vpop.f32.mrb[44].mxu0 }
 0x233   : > { %v2398_v54 = vadd.f32 %v2397_v58, %v2396_v56  ;;  %v2453_v37 = vpop.f32.mrb[45].mxu0 }
 0x234   : > { %v2454_v49 = vadd.f32 %v2453_v37, %v2452_v42 }
 0x235   : > { %v2399_v60 = vpop.f32.mrb[38].mxu1 }
 0x236   : > { %v1619_v50 = vadd.f32 %v2454_v49, %v2398_v54  ;;  %v2400_v0 = vpop.f32.mrb[39].mxu1  ;;  %v2455_v1 = vpop.f32.mrb[46].mxu0 }
 0x237   : > { %v2401_v2 = vadd.f32 %v2400_v0, %v2399_v60  ;;  %v2456_v3 = vpop.f32.mrb[47].mxu0 }
 0x238   : > { %v2457_v15 = vadd.f32 %v2456_v3, %v2455_v1 }
 0x239   : > { %v2402_v48 = vpop.f32.mrb[40].mxu1 }
 0x23a   : > { %v1624_v7 = vadd.f32 %v2457_v15, %v2401_v2  ;;  %v2403_v4 = vpop.f32.mrb[41].mxu1  ;;  %v2458_v55 = vpop.f32.mrb[48].mxu0 }
 0x23b   : > { %v2404_v63 = vadd.f32 %v2403_v4, %v2402_v48  ;;  %v2459_v61 = vpop.f32.mrb[49].mxu0 }
 0x23c   : > { %v2460_v47 = vadd.f32 %v2459_v61, %v2458_v55 }
 0x23d   : > { %v2405_v6 = vpop.f32.mrb[42].mxu1 }
 0x23e   : > { %v1629_v10 = vadd.f32 %v2460_v47, %v2404_v63  ;;  %v2406_v13 = vpop.f32.mrb[43].mxu1  ;;  %v2461_v19 = vpop.f32.mrb[50].mxu0 }
 0x23f   : > { %v2407_v11 = vadd.f32 %v2406_v13, %v2405_v6  ;;  %v2462_v34 = vpop.f32.mrb[51].mxu0 }
 0x240   : > { %v2463_v16 = vadd.f32 %v2462_v34, %v2461_v19 }
 0x241   : > { %v2408_v18 = vpop.f32.mrb[44].mxu1 }
 0x242   : > { %v1634_v31 = vadd.f32 %v2463_v16, %v2407_v11  ;;  %v2409_v5 = vpop.f32.mrb[45].mxu1  ;;  %v2464_v12 = vpop.f32.mrb[52].mxu0 }
 0x243   : > { %v2410_v59 = vadd.f32 %v2409_v5, %v2408_v18  ;;  %v2465_v23 = vpop.f32.mrb[53].mxu0 }
 0x244   : > { %v2466_v36 = vadd.f32 %v2465_v23, %v2464_v12 }
 0x245   : > { %v2411_v17 = vpop.f32.mrb[46].mxu1 }
 0x246   : > { %v1639_v20 = vadd.f32 %v2466_v36, %v2410_v59  ;;  %v2412_v30 = vpop.f32.mrb[47].mxu1  ;;  %v2467_v22 = vpop.f32.mrb[54].mxu0 }
 0x247   : > { %v2413_v25 = vadd.f32 %v2412_v30, %v2411_v17  ;;  %v2468_v26 = vpop.f32.mrb[55].mxu0 }
 0x248   : > { %v2469_v27 = vadd.f32 %v2468_v26, %v2467_v22 }
 0x249   : > { %v2502_v45 = vpop.f32.mrb[48].mxu1 }
 0x24a   : > { %v1644_v29 = vadd.f32 %v2469_v27, %v2413_v25  ;;  %v2503_v21 = vpop.f32.mrb[49].mxu1  ;;  %v2558_v32 = vpop.f32.mrb[56].mxu0 }
 0x24b   : > { %v2504_v33 = vadd.f32 %v2503_v21, %v2502_v45  ;;  %v2559_v38 = vpop.f32.mrb[57].mxu0 }
 0x24c   : > { %v2560_v40 = vadd.f32 %v2559_v38, %v2558_v32 }
 0x24d   : > { %v1714_v43 = vadd.f32 %v2504_v33, %v1609_v62  ;;  %v2505_v8 = vpop.f32.mrb[50].mxu1 }
 0x24e   : > { %v2506_v52 = vpop.f32.mrb[51].mxu1  ;;  %v2561_v41 = vpop.f32.mrb[58].mxu0 }
 0x24f   : > { %v2507_v44 = vadd.f32 %v2506_v52, %v2505_v8  ;;  %v2562_v46 = vpop.f32.mrb[59].mxu0  ;;  %v1819_v14 = vadd.f32 %v2560_v40, %v1714_v43 }
 0x250   : > { %v2563_v24 = vadd.f32 %v2562_v46, %v2561_v41 }
 0x251   : > { %v1719_v35 = vadd.f32 %v2507_v44, %v1614_v57  ;;  %v2508_v9 = vpop.f32.mrb[52].mxu1 }
 0x252   : > { %v2509_v51 = vpop.f32.mrb[53].mxu1  ;;  %v2564_v28 = vpop.f32.mrb[60].mxu0 }
 0x253   : > { %v2510_v53 = vadd.f32 %v2509_v51, %v2508_v9  ;;  %v2565_v39 = vpop.f32.mrb[61].mxu0  ;;  %v1824_v56 = vadd.f32 %v2563_v24, %v1719_v35  ;;  %v3057_v9 = vld [vmem:[#allocation2 + $0x21] sm:$0xff] }
 0x254   : > { %v2566_v58 = vadd.f32 %v2565_v39, %v2564_v28 }
 0x255   : > { %v1724_v42 = vadd.f32 %v2510_v53, %v1619_v50  ;;  %v2511_v54 = vpop.f32.mrb[54].mxu1  ;;  %v3058_v53 = vld [vmem:[#allocation2 + $0x11] sm:$0xff] }
 0x256   : > { %v2512_v37 = vpop.f32.mrb[55].mxu1  ;;  %v2567_v49 = vpop.f32.mrb[62].mxu0 }
 0x257   : > { %v2513_v62 = vadd.f32 %v2512_v37, %v2511_v54  ;;  %v2568_v60 = vpop.f32.mrb[63].mxu0  ;;  %v1829_v0 = vadd.f32 %v2566_v58, %v1724_v42 }
 0x258   : > { %v2569_v1 = vadd.f32 %v2568_v60, %v2567_v49 }
 0x259   : > { %v1729_v2 = vadd.f32 %v2513_v62, %v1624_v7  ;;  %v2514_v3 = vpop.f32.mrb[56].mxu1 }
 0x25a   : > { %v2515_v15 = vpop.f32.mrb[57].mxu1  ;;  %v2570_v48 = vpop.f32.mrb[64].mxu0 }
 0x25b   : > { %v2516_v57 = vadd.f32 %v2515_v15, %v2514_v3  ;;  %v2571_v4 = vpop.f32.mrb[65].mxu0  ;;  %v1834_v55 = vadd.f32 %v2569_v1, %v1729_v2  ;;  %v3060_v3 = vld [vmem:[#allocation2 + $0x31] sm:$0xff] }
 0x25c   : > { %v2572_v63 = vadd.f32 %v2571_v4, %v2570_v48 }
 0x25d   : > { %v1734_v61 = vadd.f32 %v2516_v57, %v1629_v10  ;;  %v2517_v47 = vpop.f32.mrb[58].mxu1 }
 0x25e   : > { %v2518_v6 = vpop.f32.mrb[59].mxu1  ;;  %v2573_v13 = vpop.f32.mrb[66].mxu0 }
 0x25f   : > { %v2519_v50 = vadd.f32 %v2518_v6, %v2517_v47  ;;  %v2574_v19 = vpop.f32.mrb[67].mxu0  ;;  %v1839_v11 = vadd.f32 %v2572_v63, %v1734_v61 }
 0x260   : > { %v2575_v34 = vadd.f32 %v2574_v19, %v2573_v13 }
 0x261   : > { %v1739_v16 = vadd.f32 %v2519_v50, %v1634_v31  ;;  %v2520_v18 = vpop.f32.mrb[60].mxu1  ;;  %v2101_v31 = vld [vmem:[%s4560_s5] ss:$0 sm:$0xff]  ;;  %v3061_v50 = vld [vmem:[#allocation2 + $0x61] sm:$0xff] }
 0x262   : > { %v2521_v5 = vpop.f32.mrb[61].mxu1  ;;  %v2576_v12 = vpop.f32.mrb[68].mxu0 }
 0x263   : > { %v2522_v7 = vadd.f32 %v2521_v5, %v2520_v18  ;;  %v2577_v59 = vpop.f32.mrb[69].mxu0  ;;  %v1844_v23 = vadd.f32 %v2575_v34, %v1739_v16  ;;  %v3062_v34 = vld [vmem:[#allocation2 + $0x51] sm:$0xff] }
 0x264   : > { %v2578_v36 = vadd.f32 %v2577_v59, %v2576_v12 }
 0x265   : > { %v1744_v17 = vadd.f32 %v2522_v7, %v1639_v20  ;;  %v2523_v30 = vpop.f32.mrb[62].mxu1  ;;  %v2102_v20 = vld [vmem:[%s4561_s6] ss:$0 sm:$0xff] }
 0x266   : > { %v2524_v22 = vpop.f32.mrb[63].mxu1  ;;  %v2579_v10 = vpop.f32.mrb[70].mxu0 }
 0x267   : > { %v2525_v25 = vadd.f32 %v2524_v22, %v2523_v30  ;;  %v2580_v26 = vpop.f32.mrb[71].mxu0  ;;  %v1849_v27 = vadd.f32 %v2578_v36, %v1744_v17  ;;  %v3064_v17 = vld [vmem:[#allocation2 + $0x71] sm:$0xff] }
 0x268   : > { %v2581_v45 = vadd.f32 %v2580_v26, %v2579_v10 }
 0x269   : > { %v1749_v21 = vadd.f32 %v2525_v25, %v1644_v29 }
 0x26a   : > { %v2684_v32 = vpop.f32.mrb[64].mxu1 }
 0x26b   : > { %v1929_v33 = vadd.f32 %v2684_v32, %v1824_v56  ;;  %v1923_v38 = vpop.f32.mrb[65].mxu1  ;;  %v1854_v40 = vadd.f32 %v2581_v45, %v1749_v21 }
 0x26c   : > { %v1924_v43 = vadd.f32 %v1923_v38, %v1819_v14 }
 0x26d   : > { %v1970_v8 = vmul.f32 %v2101_v31, %v1929_v33 }
 0x26e   : > { %v1969_v52 = vmul.f32 %v2101_v31, %v1924_v43  ;;  %v2687_v41 = vpop.f32.mrb[66].mxu1 }
 0x26f   : > { %v1985_v29 = vadd.f32 %v2102_v20, %v1970_v8  ;;  %v1939_v44 = vadd.f32 %v2687_v41, %v1834_v55  ;;  %v1933_v46 = vpop.f32.mrb[67].mxu1 }
 0x270   : > { %v1984_v24 = vadd.f32 %v2102_v20, %v1969_v52  ;;  %v1934_v35 = vadd.f32 %v1933_v46, %v1829_v0  ;;  %v3059_v0 = vld [vmem:[#allocation2 + $0x41] sm:$0xff] }
 0x271   : > { %v1993_v51 = vadd.f32 %v3057_v9, %v1985_v29  ;;  %v1972_v28 = vmul.f32 %v2101_v31, %v1939_v44 }
 0x272   : > { %v1992_v39 = vadd.f32 %v3058_v53, %v1984_v24  ;;  %v1971_v56 = vmul.f32 %v2101_v31, %v1934_v35  ;;  %v2690_v58 = vpop.f32.mrb[68].mxu1 }
 0x273   : > { %v2001_v42 = vmax.f32 %v1993_v51, 0.0  ;;  %v1987_v54 = vadd.f32 %v2102_v20, %v1972_v28  ;;  %v1949_v14 = vadd.f32 %v2690_v58, %v1844_v23  ;;  %v1943_v37 = vpop.f32.mrb[69].mxu1  ;;  %v3063_v23 = vld [vmem:[#allocation2 + $0x81] sm:$0xff] }
 0x274   : > { %v2000_v49 = vmax.f32 %v1992_v39, 0.0  ;;  %v1986_v62 = vadd.f32 %v2102_v20, %v1971_v56  ;;  %v1944_v60 = vadd.f32 %v1943_v37, %v1839_v11 }
 0x275   : > { %2009 = vst [vmem:[%s4493_s15 + $0x8] sm:$0xff] %v2001_v42  ;;  %v1995_v1 = vadd.f32 %v3059_v0, %v1987_v54  ;;  %v1974_v2 = vmul.f32 %v2101_v31, %v1949_v14 }
 0x276   : > { %2008 = vst [vmem:[%s4493_s15] sm:$0xff] %v2000_v49  ;;  %v1994_v15 = vadd.f32 %v3060_v3, %v1986_v62  ;;  %v1973_v48 = vmul.f32 %v2101_v31, %v1944_v60  ;;  %v2693_v57 = vpop.f32.mrb[70].mxu1 }
 0x277   : > { %v2003_v4 = vmax.f32 %v1995_v1, 0.0  ;;  %v1989_v55 = vadd.f32 %v2102_v20, %v1974_v2  ;;  %v1959_v63 = vadd.f32 %v2693_v57, %v1854_v40  ;;  %v1953_v61 = vpop.f32.mrb[71].mxu1 }
 0x278   : > { %v2002_v47 = vmax.f32 %v1994_v15, 0.0  ;;  %v1988_v6 = vadd.f32 %v2102_v20, %v1973_v48  ;;  %v1954_v13 = vadd.f32 %v1953_v61, %v1849_v27 }
 0x279   : > { %2011 = vst [vmem:[%s4493_s15 + $0x18] sm:$0xff] %v2003_v4  ;;  %v1997_v19 = vadd.f32 %v3061_v50, %v1989_v55  ;;  %v1976_v11 = vmul.f32 %v2101_v31, %v1959_v63 }
 0x27a   : > { %2010 = vst [vmem:[%s4493_s15 + $0x10] sm:$0xff] %v2002_v47  ;;  %v1996_v16 = vadd.f32 %v3062_v34, %v1988_v6  ;;  %v1975_v18 = vmul.f32 %v2101_v31, %v1954_v13 }
 0x27b   : > { %v2005_v5 = vmax.f32 %v1997_v19, 0.0  ;;  %v1991_v12 = vadd.f32 %v2102_v20, %v1976_v11 }
 0x27c   : > { %v2004_v7 = vmax.f32 %v1996_v16, 0.0  ;;  %v1990_v59 = vadd.f32 %v2102_v20, %v1975_v18 }
 0x27d   : > { %2013 = vst [vmem:[%s4493_s15 + $0x28] sm:$0xff] %v2005_v5  ;;  %v1999_v36 = vadd.f32 %v3063_v23, %v1991_v12 }
 0x27e   : > { %2012 = vst [vmem:[%s4493_s15 + $0x20] sm:$0xff] %v2004_v7  ;;  %v1998_v30 = vadd.f32 %v3064_v17, %v1990_v59 }
 0x27f   : > { %v2007_v22 = vmax.f32 %v1999_v36, 0.0 }
 0x280   : > { %v2006_v10 = vmax.f32 %v1998_v30, 0.0 }
 0x281   : > { %2015 = vst [vmem:[%s4493_s15 + $0x38] sm:$0xff] %v2007_v22 }
 0x282   : > { %2014 = vst [vmem:[%s4493_s15 + $0x30] sm:$0xff] %v2006_v10 }
 0x283   : > { %3078 = shalt.err (!%p3075_p3)
}
 0x284   : > { %s3079_s22 = scalar_lea.hbm %s4506_s16, 1024  ;;  %s3083_s8 = scalar_lea.hbm %s4562_s7, 2048 }
 0x285   : > { %p3080_p4 = scmp.ne.s32.totalorder %s4506_s16, %s3079_s22  ;;  %p3084_p9 = scmp.lt.u32.totalorder %s4506_s16, %s4562_s7 }
 0x286   : > { %p3085_p10 = scmp.lt.u32.totalorder %s3083_s8, %s3079_s22  ;;  %p3087_p12 = scmp.lt.u32.totalorder %s3079_s22, %s4506_s16 }
 0x287   : > { %p3081_p7 = pnand %p3080_p4, %p3211_p5 }
 0x288   : > { %p3086_p11 = por %p3085_p10, %p3084_p9 }
 0x289   : > { %p3082_p8 = pneg %p3081_p7 }
 0x28a   : > { %p3088_p13 = por %p3087_p12, %p3086_p11 }
 0x28c   : > { %p3089_p0 = pnand %p3088_p13, %p3082_p8 }
 0x28e   : > { %3092 = shalt.err (!%p3089_p0)
}
 0x28f   : > { %s3131_s14 = smov 128   ;;  %s3132_s19 = smov 8  }
 0x290   : > { %3014 = dma.vmem_to_hbm [thread:$0]  (%p3211_p5), %s4508_s13, 1024, %s4506_s16, %s4514_s28, %s3131_s14, %s3131_s14, %s3132_s19  }
 0x291 PF: > { %p3020_p1 = scmp.ge.s32.totalorder %s3127_s27, 2  ;;  %s2045_s17 = sand.u32 1, %s3115_s24  }
 0x292   : > { %s2046_s18 = scalar_lea.sflag [#allocation5], %s2045_s17 }
 0x293   : > { %p3017_p2 = pnand %p3020_p1, %p3215_p6 }
 0x295   : > { %3110 = dma.done.wait (!%p3017_p2), %s2046_s18, 1024  }
 0x296   : > { %3112 = vsyncadd (!%p3017_p2), %s2046_s18, 4294966272  ;;  %p17_p3 = scmp.ge.s32.totalorder %s3198_s30, 4   ;;  %s4565_s24 = smov %s3119_s25 }
 0x297   : > { %s4566_s25 = smov %s3123_s26  ;;  %s4567_s26 = smov %s3209_s10 }
 0x298   : > { %s4568_s27 = smov %s3198_s30  ;;  %19 = sbr.rel (!%p17_p3) target bundleno = 3 (0x3), region = 85 }
 0x29f   :  { %2051 = vsyncpa [#allocation5], 1 }
 0x2a0   :  { %2053 = vsyncpa [#allocation5 + $0x1], 1 }

// kernel: basic_block_forward_nhwc.4
= control target key start
LH: loop header
LB: loop body
LE: loop exit
PB: predicated region body
PF: predicated region fallthrough
CT: control target
= control target key end

     0   :  { %10 = vsyncpa [#allocation5], 0  ;;  %s3010_s18 = smov 0   ;;  %s3901_s0 = inlined_call_operand.vmem [shape: f32[2,8,8,128], index: 0, kind: input, shape index: {}]   ;;  %s3902_s1 = inlined_call_operand.vmem [shape: f32[1152,128], index: 1, kind: input, shape index: {}]   ;;  %s3903_s2 = inlined_call_operand.hbm [shape: f32[1152,128], index: 2, kind: input, shape index: {}]   ;;  %s3904_s3 = inlined_call_operand.vmem [shape: f32[1,128], index: 3, kind: input, shape index: {}]   ;;  %s3905_s4 = inlined_call_operand.vmem [shape: f32[1,128], index: 4, kind: input, shape index: {}]   ;;  %s3906_s5 = inlined_call_operand.vmem [shape: f32[2,128], index: 5, kind: output, shape index: {}]  }
   0x1 LB: > { %s3016_s19 = sadd.s32 4294967295, %s2973_s18   ;;  %p1994_p0 = scmp.ge.s32.totalorder %s2973_s18, 1  ;;  %s2973_s18 = sphi %s3010_s18, %s16_s18  }
   0x2   : > { %p152_p1 = scmp.lt.s32.totalorder %s2973_s18, 3  ;;  %s2975_s20 = smov [#allocation4]  }
   0x3   : > { %s167_s21 = sshll.u32 %s2975_s20, 4  ;;  %p3907_p4 = scmp.eq.s32.totalorder %s3016_s19, 0  ;;  %s168_s21 = int_to_ptr.vmem [resolvable:$true] %s167_s21 }
   0x4   : > { %p3021_p3 = pnand %p1994_p0, %p152_p1  ;;  %s2935_s26 = scalar_lea.hbm %s3903_s2, 18432 }
   0x5   : > { %p2936_p7 = scmp.ne.s32.totalorder %s3903_s2, %s2935_s26  ;;  %p2942_p11 = scmp.lt.u32.totalorder %s2935_s26, %s3903_s2 }
   0x6   : > { %s3909_s22 = scalar_select %p3021_p3, 1, 0 }
   0x7   : > { %p2915_p5 = pneg %p3021_p3 }
   0x9   : > { %p3030_p6 = pnand %p3907_p4, %p2915_p5 }
   0xb   : > { %p2937_p8 = pneg %p3030_p6 }
   0xd   : > { %p2938_p9 = pnand %p2937_p8, %p2936_p7 }
   0xf   : > { %p2939_p10 = pneg %p2938_p9 }
  0x11   : > { %p2944_p12 = pnand %p2942_p11, %p2939_p10 }
  0x13   : > { %2947 = shalt.err (!%p2944_p12)
}
  0x14   : > { %s2948_s6 = scalar_lea.vmem %s168_s21, 18432  ;;  %p2956_p5 = scmp.lt.s32.totalorder %s168_s21, %s168_s21 }
  0x15   : > { %p2949_p13 = scmp.ne.s32.totalorder %s168_s21, %s2948_s6  ;;  %p2957_p2 = scmp.lt.s32.totalorder %s2948_s6, %s2948_s6 }
  0x17   : > { %p2951_p0 = pnand %p2949_p13, %p2937_p8  ;;  %p2958_p4 = por %p2957_p2, %p2956_p5 }
  0x19   : > { %p2952_p1 = pneg %p2951_p0 }
  0x1b   : > { %p2959_p3 = pnand %p2958_p4, %p2952_p1 }
  0x1d   : > { %2962 = shalt.err (!%p2959_p3)
}
  0x1e   : > { %s2976_s7 = smov 128   ;;  %s2977_s8 = smov 8  }
  0x1f   : > { %2918 = dma.hbm_to_vmem [thread:$0]  (!%p3030_p6), %s3903_s2, 18432, %s168_s21, [#allocation5], %s2976_s7, %s2976_s7, %s2977_s8  }
  0x20   : > { %p3911_p7 = scmp.ne.s32.totalorder %s3909_s22, 0 }
  0x21   : > { %p3912_p9 = scmp.eq.s32.totalorder (!%p3911_p7), %s3016_s19, 0 }
  0x22   : > { %197 = sbr.rel (%p3911_p7) target bundleno = 686 (0x2ae), region = 40 }
  0x29   : > { %2968 = dma.done.wait (%p3912_p9), [#allocation5], 18432   ;;  %p3913_p8 = pmov %p3912_p9 }
  0x2a   : > { %v2978_v0 = vmov 0.0   ;;  %v400_v1 = vld [vmem:[%s3902_s1 + $0x80] sm:$0xff]  ;;  %v401_v2 = vld [vmem:[%s3902_s1 + $0x88] sm:$0xff]  ;;  %v402_v12 = vld [vmem:[%s3902_s1 + $0x90] sm:$0xff]  ;;  %p220_p2 = scmp.lt.s32.totalorder %s3016_s19, 1  ;;  %vm298_vm0 = vcmask 1046528  }
  0x2b   : > { %2970 = vsyncadd (%p3913_p8), [#allocation5], 4294948864  ;;  %233 = vst [vmem:[#allocation2] sm:$0xff] %v2978_v0  ;;  %v432_v3 = vld [vmem:[%s3902_s1 + $0x180] sm:$0xff]  ;;  %v2591_v4 = vpack.c.bf16 %v401_v2, %v400_v1  ;;  %v433_v5 = vld [vmem:[%s3902_s1 + $0x188] sm:$0xff]  ;;  %vm331_vm1 = vcmask 1045504  }
  0x2c   : > { %234 = vst [vmem:[#allocation2 + $0x8] sm:$0x3] %v2978_v0  ;;  %235 = vst [vmem:[#allocation2 + $0x10] sm:$0xff] %v2978_v0  ;;  %v384_v6 = vld [vmem:[%s3902_s1] sm:$0xff]  ;;  %v385_v7 = vld [vmem:[%s3902_s1 + $0x8] sm:$0xff]  ;;  %v2623_v8 = vpack.c.bf16 %v433_v5, %v432_v3  ;;  %s3205_s14 = scalar_select %p220_p2, %s3016_s19, 1 }
  0x2d   : > { %236 = vst [vmem:[#allocation2 + $0x18] sm:$0x3] %v2978_v0  ;;  %237 = vst [vmem:[#allocation2 + $0x20] sm:$0xff] %v2978_v0  ;;  %v2593_v9 = vpack.c.bf16 %v385_v7, %v384_v6  ;;  %v416_v10 = vld [vmem:[%s3902_s1 + $0x100] sm:$0xff]  ;;  %v417_v11 = vld [vmem:[%s3902_s1 + $0x108] sm:$0xff]  ;;  %2592 = vmatprep.subr.bf16.mxu0 %v2591_v4  ;;  %vm1943_vm2 = vcmask 1040384  }
  0x2e   : > { %238 = vst [vmem:[#allocation2 + $0x28] sm:$0x3] %v2978_v0  ;;  %239 = vst [vmem:[#allocation2 + $0x30] sm:$0xff] %v2978_v0  ;;  %v2625_v13 = vpack.c.bf16 %v417_v11, %v416_v10  ;;  %v403_v14 = vld [vmem:[%s3902_s1 + $0x98] sm:$0xff]  ;;  %v434_v15 = vld [vmem:[%s3902_s1 + $0x190] sm:$0xff]  ;;  %2624 = vmatprep.subr.bf16.mxu1 %v2623_v8  ;;  %s2006_s8 = sshll.u32 %s3205_s14, 6 }
  0x2f   : > { %240 = vst [vmem:[#allocation2 + $0x38] sm:$0x3] %v2978_v0  ;;  %241 = vst [vmem:[#allocation2 + $0x40] sm:$0xff] %v2978_v0  ;;  %v435_v16 = vld [vmem:[%s3902_s1 + $0x198] sm:$0xff]  ;;  %2594 = vmatpush3.bf16.msra.mxu0 %v2593_v9  ;;  %v2595_v17 = vpack.c.bf16 %v403_v14, %v402_v12  ;;  %v386_v19 = vld [vmem:[%s3902_s1 + $0x10] sm:$0xff]  ;;  %s3253_s25 = scalar_lea.vmem %s3901_s0, %s2006_s8  ;;  %p3914_p3 = scmp.ne.s32.totalorder %s3016_s19, 0 }
  0x30   : > { %242 = vst [vmem:[#allocation2 + $0x48] sm:$0x3] %v2978_v0  ;;  %243 = vst [vmem:[#allocation2 + $0x50] sm:$0xff] %v2978_v0  ;;  %v2627_v18 = vpack.c.bf16 %v435_v16, %v434_v15  ;;  %v387_v20 = vld [vmem:[%s3902_s1 + $0x18] sm:$0xff]  ;;  %v418_v21 = vld [vmem:[%s3902_s1 + $0x110] sm:$0xff]  ;;  %2626 = vmatpush3.bf16.msra.mxu1 %v2625_v13  ;;  %v3268_v15 = vrot.slane %v2978_v0, 1 }
  0x31   : > { %244 = vst [vmem:[#allocation2 + $0x58] sm:$0x3] %v2978_v0  ;;  %245 = vst [vmem:[#allocation2 + $0x60] sm:$0xff] %v2978_v0  ;;  %v2597_v22 = vpack.c.bf16 %v387_v20, %v386_v19  ;;  %v419_v23 = vld [vmem:[%s3902_s1 + $0x118] sm:$0xff]  ;;  %v404_v24 = vld [vmem:[%s3902_s1 + $0xa0] sm:$0xff]  ;;  %2596 = vmatprep.subr.bf16.mxu0 %v2595_v17 }
  0x32   : > { %246 = vst [vmem:[#allocation2 + $0x68] sm:$0x3] %v2978_v0  ;;  %247 = vst [vmem:[#allocation2 + $0x70] sm:$0xff] %v2978_v0  ;;  %v405_v25 = vld [vmem:[%s3902_s1 + $0xa8] sm:$0xff]  ;;  %2628 = vmatprep.subr.bf16.mxu1 %v2627_v18  ;;  %v2629_v26 = vpack.c.bf16 %v419_v23, %v418_v21  ;;  %v436_v28 = vld [vmem:[%s3902_s1 + $0x1a0] sm:$0xff] }
  0x33   : > { %248 = vst [vmem:[#allocation2 + $0x78] sm:$0x3] %v2978_v0  ;;  %249 = vst [vmem:[#allocation2 + $0x80] sm:$0xff] %v2978_v0  ;;  %v2599_v27 = vpack.c.bf16 %v405_v25, %v404_v24  ;;  %v437_v29 = vld [vmem:[%s3902_s1 + $0x1a8] sm:$0xff]  ;;  %v388_v30 = vld [vmem:[%s3902_s1 + $0x20] sm:$0xff]  ;;  %2598 = vmatpush3.bf16.msra.mxu0 %v2597_v22 }
  0x34   : > { %250 = vst [vmem:[#allocation2 + $0x88] sm:$0x3] %v2978_v0  ;;  %252 = vst [vmem:[#allocation2 + $0x98] sm:$0x3] %v2978_v0  ;;  %v2631_v31 = vpack.c.bf16 %v437_v29, %v436_v28  ;;  %v389_v32 = vld [vmem:[%s3902_s1 + $0x28] sm:$0xff]  ;;  %v420_v33 = vld [vmem:[%s3902_s1 + $0x120] sm:$0xff]  ;;  %2630 = vmatpush3.bf16.msra.mxu1 %v2629_v26 }
  0x35   : > { %1092 = vst [vmem:[#allocation3 + $0x8] sm:$0x3] %v2978_v0  ;;  %1093 = vst [vmem:[#allocation3 + $0x10] sm:$0xff] %v2978_v0  ;;  %v421_v34 = vld [vmem:[%s3902_s1 + $0x128] sm:$0xff]  ;;  %v2601_v35 = vpack.c.bf16 %v389_v32, %v388_v30  ;;  %v406_v36 = vld [vmem:[%s3902_s1 + $0xb0] sm:$0xff]  ;;  %2600 = vmatprep.subr.bf16.mxu0 %v2599_v27 }
  0x36   : > { %1094 = vst [vmem:[#allocation3 + $0x18] sm:$0x3] %v2978_v0  ;;  %1095 = vst [vmem:[#allocation3 + $0x20] sm:$0xff] %v2978_v0  ;;  %v407_v37 = vld [vmem:[%s3902_s1 + $0xb8] sm:$0xff]  ;;  %v438_v38 = vld [vmem:[%s3902_s1 + $0x1b0] sm:$0xff]  ;;  %v2633_v39 = vpack.c.bf16 %v421_v34, %v420_v33  ;;  %2632 = vmatprep.subr.bf16.mxu1 %v2631_v31 }
  0x37   : > { %1096 = vst [vmem:[#allocation3 + $0x28] sm:$0x3] %v2978_v0  ;;  %1097 = vst [vmem:[#allocation3 + $0x30] sm:$0xff] %v2978_v0  ;;  %v2603_v40 = vpack.c.bf16 %v407_v37, %v406_v36  ;;  %v439_v41 = vld [vmem:[%s3902_s1 + $0x1b8] sm:$0xff]  ;;  %v390_v42 = vld [vmem:[%s3902_s1 + $0x30] sm:$0xff]  ;;  %2602 = vmatpush3.bf16.msra.mxu0 %v2601_v35 }
  0x38   : > { %1098 = vst [vmem:[#allocation3 + $0x38] sm:$0x3] %v2978_v0  ;;  %1099 = vst [vmem:[#allocation3 + $0x40] sm:$0xff] %v2978_v0  ;;  %v391_v43 = vld [vmem:[%s3902_s1 + $0x38] sm:$0xff]  ;;  %v2635_v44 = vpack.c.bf16 %v439_v41, %v438_v38  ;;  %v422_v45 = vld [vmem:[%s3902_s1 + $0x130] sm:$0xff]  ;;  %2634 = vmatpush3.bf16.msra.mxu1 %v2633_v39 }
  0x39   : > { %1100 = vst [vmem:[#allocation3 + $0x48] sm:$0x3] %v2978_v0  ;;  %1101 = vst [vmem:[#allocation3 + $0x50] sm:$0xff] %v2978_v0  ;;  %v423_v46 = vld [vmem:[%s3902_s1 + $0x138] sm:$0xff]  ;;  %v408_v47 = vld [vmem:[%s3902_s1 + $0xc0] sm:$0xff]  ;;  %v2605_v51 = vpack.c.bf16 %v391_v43, %v390_v42  ;;  %2604 = vmatprep.subr.bf16.mxu0 %v2603_v40 }
  0x3a   : > { %1102 = vst [vmem:[#allocation3 + $0x58] sm:$0x3] %v2978_v0  ;;  %1103 = vst [vmem:[#allocation3 + $0x60] sm:$0xff] %v2978_v0  ;;  %v409_v48 = vld [vmem:[%s3902_s1 + $0xc8] sm:$0xff]  ;;  %v440_v49 = vld [vmem:[%s3902_s1 + $0x1c0] sm:$0xff]  ;;  %v2637_v52 = vpack.c.bf16 %v423_v46, %v422_v45  ;;  %2636 = vmatprep.subr.bf16.mxu1 %v2635_v44 }
  0x3b   : > { %1104 = vst [vmem:[#allocation3 + $0x68] sm:$0x3] %v2978_v0  ;;  %1105 = vst [vmem:[#allocation3 + $0x70] sm:$0xff] %v2978_v0  ;;  %v441_v50 = vld [vmem:[%s3902_s1 + $0x1c8] sm:$0xff]  ;;  %v2607_v53 = vpack.c.bf16 %v409_v48, %v408_v47  ;;  %v392_v54 = vld [vmem:[%s3902_s1 + $0x40] sm:$0xff]  ;;  %2606 = vmatpush3.bf16.msra.mxu0 %v2605_v51  ;;  %v3326_v47 = vrot.slane %v2978_v0, 2 }
  0x3c   : > { %1106 = vst [vmem:[#allocation3 + $0x78] sm:$0x3] %v2978_v0  ;;  %1107 = vst [vmem:[#allocation3 + $0x80] sm:$0xff] %v2978_v0  ;;  %v393_v55 = vld [vmem:[%s3902_s1 + $0x48] sm:$0xff]  ;;  %v424_v56 = vld [vmem:[%s3902_s1 + $0x140] sm:$0xff]  ;;  %v2639_v57 = vpack.c.bf16 %v441_v50, %v440_v49  ;;  %2638 = vmatpush3.bf16.msra.mxu1 %v2637_v52 }
  0x3d   : > { %1108 = vst [vmem:[#allocation3 + $0x88] sm:$0x3] %v2978_v0  ;;  %1110 = vst [vmem:[#allocation3 + $0x98] sm:$0x3] %v2978_v0  ;;  %v425_v58 = vld [vmem:[%s3902_s1 + $0x148] sm:$0xff]  ;;  %v410_v59 = vld [vmem:[%s3902_s1 + $0xd0] sm:$0xff]  ;;  %v2609_v63 = vpack.c.bf16 %v393_v55, %v392_v54  ;;  %2608 = vmatprep.subr.bf16.mxu0 %v2607_v53 }
  0x3e   : > { %v411_v60 = vld [vmem:[%s3902_s1 + $0xd8] sm:$0xff]  ;;  %v442_v61 = vld [vmem:[%s3902_s1 + $0x1d0] sm:$0xff]  ;;  %v2641_v1 = vpack.c.bf16 %v425_v58, %v424_v56  ;;  %2640 = vmatprep.subr.bf16.mxu1 %v2639_v57  ;;  %v412_v8 = vld [vmem:[%s3902_s1 + $0xe0] sm:$0xff] }
  0x3f   : > { %v443_v62 = vld [vmem:[%s3902_s1 + $0x1d8] sm:$0xff]  ;;  %v2611_v2 = vpack.c.bf16 %v411_v60, %v410_v59  ;;  %v394_v3 = vld [vmem:[%s3902_s1 + $0x50] sm:$0xff]  ;;  %v413_v9 = vld [vmem:[%s3902_s1 + $0xe8] sm:$0xff]  ;;  %2610 = vmatpush3.bf16.msra.mxu0 %v2609_v63 }
  0x40   : > { %v395_v4 = vld [vmem:[%s3902_s1 + $0x58] sm:$0xff]  ;;  %v426_v5 = vld [vmem:[%s3902_s1 + $0x150] sm:$0xff]  ;;  %v2643_v6 = vpack.c.bf16 %v443_v62, %v442_v61  ;;  %v444_v10 = vld [vmem:[%s3902_s1 + $0x1e0] sm:$0xff]  ;;  %2642 = vmatpush3.bf16.msra.mxu1 %v2641_v1  ;;  %v2615_v17 = vpack.c.bf16 %v413_v9, %v412_v8 }
  0x41   : > { %v427_v7 = vld [vmem:[%s3902_s1 + $0x158] sm:$0xff]  ;;  %v445_v11 = vld [vmem:[%s3902_s1 + $0x1e8] sm:$0xff]  ;;  %v2613_v12 = vpack.c.bf16 %v395_v4, %v394_v3  ;;  %v396_v13 = vld [vmem:[%s3902_s1 + $0x60] sm:$0xff]  ;;  %2612 = vmatprep.subr.bf16.mxu0 %v2611_v2 }
  0x42   : > { %v397_v14 = vld [vmem:[%s3902_s1 + $0x68] sm:$0xff]  ;;  %v2645_v16 = vpack.c.bf16 %v427_v7, %v426_v5  ;;  %v428_v18 = vld [vmem:[%s3902_s1 + $0x160] sm:$0xff]  ;;  %2644 = vmatprep.subr.bf16.mxu1 %v2643_v6  ;;  %v2647_v21 = vpack.c.bf16 %v445_v11, %v444_v10  ;;  %v414_v23 = vld [vmem:[%s3902_s1 + $0xf0] sm:$0xff] }
  0x43   : > { %v3273_v19 = vld [vmem:[#allocation2 + $0x8] sm:$0x3]  ;;  %v225_v20 = vld [vmem:[%s3253_s25] sm:$0xff]  ;;  %v415_v24 = vld [vmem:[%s3902_s1 + $0xf8] sm:$0xff]  ;;  %2614 = vmatpush3.bf16.msra.mxu0 %v2613_v12  ;;  %v2617_v28 = vpack.c.bf16 %v397_v14, %v396_v13 }
  0x44   : > { %v429_v22 = vld [vmem:[%s3902_s1 + $0x168] sm:$0xff]  ;;  %v300_v25 = vrot.slane %v3273_v19, 1  ;;  %254 = vst [vmem:[#allocation2 + $0x11] sm:$0xff] %v225_v20  ;;  %v446_v26 = vld [vmem:[%s3902_s1 + $0x1f0] sm:$0xff]  ;;  %v447_v27 = vld [vmem:[%s3902_s1 + $0x1f8] sm:$0xff]  ;;  %2646 = vmatpush3.bf16.msra.mxu1 %v2645_v16  ;;  %2616 = vmatprep.subr.bf16.mxu0 %v2615_v17  ;;  %v2619_v32 = vpack.c.bf16 %v415_v24, %v414_v23  ;;  %v333_v48 = vrot.slane %v3273_v19, 2 }
  0x45   : > { %v226_v30 = vld [vmem:[%s3253_s25 + $0x8] sm:$0xff]  ;;  %v2649_v31 = vpack.c.bf16 %v429_v22, %v428_v18  ;;  %v398_v33 = vld [vmem:[%s3902_s1 + $0x70] sm:$0xff]  ;;  %v399_v34 = vld [vmem:[%s3902_s1 + $0x78] sm:$0xff]  ;;  %2648 = vmatprep.subr.bf16.mxu1 %v2647_v21  ;;  %v2651_v36 = vpack.c.bf16 %v447_v27, %v446_v26 }
  0x46   : > { %v301_v29 = vsel %vm298_vm0, %v3268_v15, %v300_v25  ;;  %v430_v35 = vld [vmem:[%s3902_s1 + $0x170] sm:$0xff]  ;;  %255 = vst [vmem:[#allocation2 + $0x21] sm:$0xff] %v226_v30  ;;  %v431_v37 = vld [vmem:[%s3902_s1 + $0x178] sm:$0xff]  ;;  %v464_v38 = vld [vmem:[%s3902_s1 + $0x280] sm:$0xff]  ;;  %v2621_v43 = vpack.c.bf16 %v399_v34, %v398_v33  ;;  %v334_v2 = vsel %vm331_vm1, %v3326_v47, %v333_v48 }
  0x47   : > { %592 = vmatprep.mubr.f32.mxu0 %v301_v29  ;;  %v465_v39 = vld [vmem:[%s3902_s1 + $0x288] sm:$0xff]  ;;  %v496_v40 = vld [vmem:[%s3902_s1 + $0x380] sm:$0xff]  ;;  %v227_v42 = vld [vmem:[%s3253_s25 + $0x10] sm:$0xff]  ;;  %2618 = vmatpush3.bf16.msra.mxu0 %v2617_v28  ;;  %v2653_v45 = vpack.c.bf16 %v431_v37, %v430_v35 }
  0x48   : > { %v497_v41 = vld [vmem:[%s3902_s1 + $0x388] sm:$0xff]  ;;  %v448_v44 = vld [vmem:[%s3902_s1 + $0x200] sm:$0xff]  ;;  %256 = vst [vmem:[#allocation2 + $0x31] sm:$0xff] %v227_v42  ;;  %2650 = vmatpush3.bf16.msra.mxu1 %v2649_v31  ;;  %2620 = vmatprep.subr.bf16.mxu0 %v2619_v32  ;;  %v2655_v49 = vpack.c.bf16 %v465_v39, %v464_v38  ;;  %v466_v57 = vld [vmem:[%s3902_s1 + $0x290] sm:$0xff] }
  0x49   : > { %v449_v50 = vld [vmem:[%s3902_s1 + $0x208] sm:$0xff]  ;;  %2652 = vmatprep.subr.bf16.mxu1 %v2651_v36  ;;  %v2687_v52 = vpack.c.bf16 %v497_v41, %v496_v40  ;;  %v480_v55 = vld [vmem:[%s3902_s1 + $0x300] sm:$0xff]  ;;  %v467_v58 = vld [vmem:[%s3902_s1 + $0x298] sm:$0xff] }
  0x4a   : > { %v481_v56 = vld [vmem:[%s3902_s1 + $0x308] sm:$0xff]  ;;  %v498_v59 = vld [vmem:[%s3902_s1 + $0x390] sm:$0xff]  ;;  %v228_v60 = vld [vmem:[%s3253_s25 + $0x18] sm:$0xff]  ;;  %v2657_v61 = vpack.c.bf16 %v449_v50, %v448_v44  ;;  %v2659_v10 = vpack.c.bf16 %v467_v58, %v466_v57 }
  0x4b   : > { %v3323_v46 = vld [vmem:[#allocation2 + $0x10] sm:$0xff]  ;;  %v265_v51 = vld [vmem:[#allocation2 + $0x18] sm:$0x3]  ;;  %2622 = vmatpush3.bf16.msra.mxu0 %v2621_v43  ;;  %257 = vst [vmem:[#allocation2 + $0x41] sm:$0xff] %v228_v60  ;;  %v2689_v3 = vpack.c.bf16 %v481_v56, %v480_v55  ;;  %v468_v14 = vld [vmem:[%s3902_s1 + $0x2a0] sm:$0xff] }
  0x4c   : > { %697 = vmatprep.mubr.f32.mxu1 %v3323_v46  ;;  %v302_v53 = vrot.slane %v3323_v46, 1  ;;  %v303_v54 = vrot.slane %v265_v51, 1  ;;  %v499_v63 = vld [vmem:[%s3902_s1 + $0x398] sm:$0xff]  ;;  %2654 = vmatpush3.bf16.msra.mxu1 %v2653_v45  ;;  %v335_v4 = vrot.slane %v3323_v46, 2  ;;  %v336_v5 = vrot.slane %v265_v51, 2  ;;  %v450_v6 = vld [vmem:[%s3902_s1 + $0x210] sm:$0xff] }
  0x4d   : > { %v3350_v62 = vld [vmem:[#allocation2 + $0x20] sm:$0xff]  ;;  %v3355_v1 = vld [vmem:[#allocation2 + $0x28] sm:$0x3]  ;;  %2656 = vmatprep.subr.bf16.mxu0 %v2655_v49  ;;  %v451_v7 = vld [vmem:[%s3902_s1 + $0x218] sm:$0xff]  ;;  %2688 = vmatprep.subr.bf16.mxu1 %v2687_v52  ;;  %v2691_v17 = vpack.c.bf16 %v499_v63, %v498_v59 }
  0x4e   : > { %v482_v8 = vld [vmem:[%s3902_s1 + $0x310] sm:$0xff]  ;;  %v3370_v9 = vsel %vm298_vm0, %v302_v53, %v303_v54  ;;  %v305_v11 = vrot.slane %v3350_v62, 1  ;;  %v306_v12 = vrot.slane %v3355_v1, 1  ;;  %v483_v13 = vld [vmem:[%s3902_s1 + $0x318] sm:$0xff]  ;;  %v469_v16 = vld [vmem:[%s3902_s1 + $0x2a8] sm:$0xff]  ;;  %593 = vmatmul.mubr.f32.vlgmr.msra.gmra.mrb[0].mxu0 %v2978_v0  ;;  %v2661_v21 = vpack.c.bf16 %v451_v7, %v450_v6 }
  0x4f   : > { %v3384_v18 = vld [vmem:[#allocation2 + $0x30] sm:$0xff]  ;;  %v3386_v19 = vld [vmem:[#allocation2 + $0x38] sm:$0x3]  ;;  %v229_v20 = vld [vmem:[%s3253_s25 + $0x20] sm:$0xff]  ;;  %698 = vmatmul.mubr.f32.vlgmr.msra.gmra.mrb[0].mxu1 %v334_v2  ;;  %2658 = vmatpush3.bf16.msra.mxu0 %v2657_v61  ;;  %v3398_v24 = vsel %vm331_vm1, %v335_v4, %v336_v5  ;;  %v2693_v25 = vpack.c.bf16 %v483_v13, %v482_v8  ;;  %v338_v26 = vrot.slane %v3350_v62, 2  ;;  %v339_v27 = vrot.slane %v3355_v1, 2 }
  0x50   : > { %v500_v22 = vld [vmem:[%s3902_s1 + $0x3a0] sm:$0xff]  ;;  %v501_v23 = vld [vmem:[%s3902_s1 + $0x3a8] sm:$0xff]  ;;  %258 = vst [vmem:[#allocation2 + $0x51] sm:$0xff] %v229_v20  ;;  %597 = vmatprep.mubr.f32.mxu0 %v3370_v9  ;;  %702 = vmatprep.mubr.f32.mxu1 %v3350_v62  ;;  %v3412_v31 = vsel %vm298_vm0, %v305_v11, %v306_v12  ;;  %v2663_v32 = vpack.c.bf16 %v469_v16, %v468_v14  ;;  %v308_v33 = vrot.slane %v3384_v18, 1  ;;  %v309_v34 = vrot.slane %v3386_v19, 1  ;;  %v470_v36 = vld [vmem:[%s3902_s1 + $0x2b0] sm:$0xff] }
  0x51   : > { %v452_v28 = vld [vmem:[%s3902_s1 + $0x220] sm:$0xff]  ;;  %v453_v29 = vld [vmem:[%s3902_s1 + $0x228] sm:$0xff]  ;;  %2690 = vmatpush3.bf16.msra.mxu1 %v2689_v3  ;;  %2660 = vmatprep.subr.bf16.mxu0 %v2659_v10  ;;  %v471_v37 = vld [vmem:[%s3902_s1 + $0x2b8] sm:$0xff]  ;;  %v2695_v38 = vpack.c.bf16 %v501_v23, %v500_v22  ;;  %v3441_v45 = vsel %vm331_vm1, %v338_v26, %v339_v27  ;;  %v341_v48 = vrot.slane %v3384_v18, 2  ;;  %v342_v49 = vrot.slane %v3386_v19, 2 }
  0x52   : > { %v484_v30 = vld [vmem:[%s3902_s1 + $0x320] sm:$0xff]  ;;  %v485_v35 = vld [vmem:[%s3902_s1 + $0x328] sm:$0xff]  ;;  %598 = vmatmul.mubr.f32.gmra.mrb[2].mxu0 %v3323_v46  ;;  %2692 = vmatprep.subr.bf16.mxu1 %v2691_v17  ;;  %v2665_v42 = vpack.c.bf16 %v453_v29, %v452_v28  ;;  %v502_v43 = vld [vmem:[%s3902_s1 + $0x3b0] sm:$0xff]  ;;  %v3455_v53 = vsel %vm298_vm0, %v308_v33, %v309_v34  ;;  %v2667_v54 = vpack.c.bf16 %v471_v37, %v470_v36 }
  0x53   : > { %v3426_v39 = vld [vmem:[#allocation2 + $0x40] sm:$0xff]  ;;  %v3428_v40 = vld [vmem:[#allocation2 + $0x48] sm:$0x3]  ;;  %703 = vmatmul.mubr.f32.gmra.mrb[2].mxu1 %v3398_v24  ;;  %2662 = vmatpush3.bf16.msra.mxu0 %v2661_v21  ;;  %v503_v44 = vld [vmem:[%s3902_s1 + $0x3b8] sm:$0xff]  ;;  %v2697_v46 = vpack.c.bf16 %v485_v35, %v484_v30  ;;  %v3484_v5 = vsel %vm331_vm1, %v341_v48, %v342_v49 }
  0x54   : > { %v230_v41 = vld [vmem:[%s3253_s25 + $0x28] sm:$0xff]  ;;  %602 = vmatprep.mubr.f32.mxu0 %v3412_v31  ;;  %707 = vmatprep.mubr.f32.mxu1 %v3384_v18  ;;  %v454_v50 = vld [vmem:[%s3902_s1 + $0x230] sm:$0xff]  ;;  %v455_v51 = vld [vmem:[%s3902_s1 + $0x238] sm:$0xff]  ;;  %v311_v55 = vrot.slane %v3426_v39, 1  ;;  %v312_v56 = vrot.slane %v3428_v40, 1  ;;  %v2699_v60 = vpack.c.bf16 %v503_v44, %v502_v43  ;;  %v344_v7 = vrot.slane %v3426_v39, 2 }
  0x55   : > { %259 = vst [vmem:[#allocation2 + $0x61] sm:$0xff] %v230_v41  ;;  %v486_v52 = vld [vmem:[%s3902_s1 + $0x330] sm:$0xff]  ;;  %2694 = vmatpush3.bf16.msra.mxu1 %v2693_v25  ;;  %2664 = vmatprep.subr.bf16.mxu0 %v2663_v32  ;;  %v487_v57 = vld [vmem:[%s3902_s1 + $0x338] sm:$0xff]  ;;  %v472_v58 = vld [vmem:[%s3902_s1 + $0x2c0] sm:$0xff]  ;;  %v2669_v2 = vpack.c.bf16 %v455_v51, %v454_v50  ;;  %v345_v8 = vrot.slane %v3428_v40, 2 }
  0x56   : > { %v473_v59 = vld [vmem:[%s3902_s1 + $0x2c8] sm:$0xff]  ;;  %603 = vmatmul.mubr.f32.gmra.mrb[4].mxu0 %v3350_v62  ;;  %2696 = vmatprep.subr.bf16.mxu1 %v2695_v38  ;;  %v231_v1 = vld [vmem:[%s3253_s25 + $0x30] sm:$0xff]  ;;  %v504_v3 = vld [vmem:[%s3902_s1 + $0x3c0] sm:$0xff]  ;;  %v2701_v6 = vpack.c.bf16 %v487_v57, %v486_v52  ;;  %v3498_v13 = vsel %vm298_vm0, %v311_v55, %v312_v56 }
  0x57   : > { %v3469_v61 = vld [vmem:[#allocation2 + $0x50] sm:$0xff]  ;;  %v3471_v63 = vld [vmem:[#allocation2 + $0x58] sm:$0x3]  ;;  %708 = vmatmul.mubr.f32.gmra.mrb[4].mxu1 %v3441_v45  ;;  %2666 = vmatpush3.bf16.msra.mxu0 %v2665_v42  ;;  %v505_v4 = vld [vmem:[%s3902_s1 + $0x3c8] sm:$0xff]  ;;  %260 = vst [vmem:[#allocation2 + $0x71] sm:$0xff] %v231_v1  ;;  %v2671_v14 = vpack.c.bf16 %v473_v59, %v472_v58  ;;  %v3527_v30 = vsel %vm331_vm1, %v344_v7, %v345_v8 }
  0x58   : > { %607 = vmatprep.mubr.f32.mxu0 %v3455_v53  ;;  %712 = vmatprep.mubr.f32.mxu1 %v3426_v39  ;;  %v456_v10 = vld [vmem:[%s3902_s1 + $0x240] sm:$0xff]  ;;  %v457_v11 = vld [vmem:[%s3902_s1 + $0x248] sm:$0xff]  ;;  %v314_v16 = vrot.slane %v3469_v61, 1  ;;  %v315_v17 = vrot.slane %v3471_v63, 1  ;;  %v474_v20 = vld [vmem:[%s3902_s1 + $0x2d0] sm:$0xff]  ;;  %v2703_v22 = vpack.c.bf16 %v505_v4, %v504_v3  ;;  %v347_v33 = vrot.slane %v3469_v61, 2 }
  0x59   : > { %v488_v12 = vld [vmem:[%s3902_s1 + $0x340] sm:$0xff]  ;;  %2698 = vmatpush3.bf16.msra.mxu1 %v2697_v46  ;;  %2668 = vmatprep.subr.bf16.mxu0 %v2667_v54  ;;  %v489_v19 = vld [vmem:[%s3902_s1 + $0x348] sm:$0xff]  ;;  %v475_v21 = vld [vmem:[%s3902_s1 + $0x2d8] sm:$0xff]  ;;  %v2673_v27 = vpack.c.bf16 %v457_v11, %v456_v10  ;;  %v348_v34 = vrot.slane %v3471_v63, 2 }
  0x5a   : > { %608 = vmatmul.mubr.f32.gmra.mrb[6].mxu0 %v3384_v18  ;;  %2700 = vmatprep.subr.bf16.mxu1 %v2699_v60  ;;  %v232_v26 = vld [vmem:[%s3253_s25 + $0x38] sm:$0xff]  ;;  %v506_v28 = vld [vmem:[%s3902_s1 + $0x3d0] sm:$0xff]  ;;  %v2705_v32 = vpack.c.bf16 %v489_v19, %v488_v12  ;;  %v3538_v37 = vsel %vm298_vm0, %v314_v16, %v315_v17  ;;  %v2675_v38 = vpack.c.bf16 %v475_v21, %v474_v20  ;;  %v476_v44 = vld [vmem:[%s3902_s1 + $0x2e0] sm:$0xff] }
  0x5b   : > { %713 = vmatmul.mubr.f32.gmra.mrb[6].mxu1 %v3484_v5  ;;  %2670 = vmatpush3.bf16.msra.mxu0 %v2669_v2  ;;  %v507_v29 = vld [vmem:[%s3902_s1 + $0x3d8] sm:$0xff]  ;;  %261 = vst [vmem:[#allocation2 + $0x81] sm:$0xff] %v232_v26  ;;  %v458_v35 = vld [vmem:[%s3902_s1 + $0x250] sm:$0xff]  ;;  %v477_v49 = vld [vmem:[%s3902_s1 + $0x2e8] sm:$0xff]  ;;  %v3567_v55 = vsel %vm331_vm1, %v347_v33, %v348_v34 }
  0x5c   : > { %v3512_v23 = vld [vmem:[#allocation2 + $0x60] sm:$0xff]  ;;  %v3514_v25 = vld [vmem:[#allocation2 + $0x68] sm:$0x3]  ;;  %612 = vmatprep.mubr.f32.mxu0 %v3498_v13  ;;  %717 = vmatprep.mubr.f32.mxu1 %v3469_v61  ;;  %v459_v36 = vld [vmem:[%s3902_s1 + $0x258] sm:$0xff]  ;;  %v2707_v46 = vpack.c.bf16 %v507_v29, %v506_v28  ;;  %v2679_v1 = vpack.c.bf16 %v477_v49, %v476_v44 }
  0x5d   : > { %2702 = vmatpush3.bf16.msra.mxu1 %v2701_v6  ;;  %2672 = vmatprep.subr.bf16.mxu0 %v2671_v14  ;;  %v317_v40 = vrot.slane %v3512_v23, 1  ;;  %v318_v41 = vrot.slane %v3514_v25, 1  ;;  %v490_v42 = vld [vmem:[%s3902_s1 + $0x350] sm:$0xff]  ;;  %v491_v43 = vld [vmem:[%s3902_s1 + $0x358] sm:$0xff]  ;;  %v2677_v51 = vpack.c.bf16 %v459_v36, %v458_v35  ;;  %v508_v52 = vld [vmem:[%s3902_s1 + $0x3e0] sm:$0xff]  ;;  %v350_v57 = vrot.slane %v3512_v23, 2 }
  0x5e   : > { %613 = vmatmul.mubr.f32.gmra.mrb[8].mxu0 %v3426_v39  ;;  %2704 = vmatprep.subr.bf16.mxu1 %v2703_v22  ;;  %v3552_v48 = vld [vmem:[#allocation2 + $0x70] sm:$0xff]  ;;  %v277_v50 = vld [vmem:[#allocation2 + $0x78] sm:$0x3]  ;;  %v509_v54 = vld [vmem:[%s3902_s1 + $0x3e8] sm:$0xff]  ;;  %v2709_v56 = vpack.c.bf16 %v491_v43, %v490_v42  ;;  %v351_v58 = vrot.slane %v3514_v25, 2 }
  0x5f   : > { %718 = vmatmul.mubr.f32.gmra.mrb[8].mxu1 %v3527_v30  ;;  %2674 = vmatpush3.bf16.msra.mxu0 %v2673_v27  ;;  %v460_v59 = vld [vmem:[%s3902_s1 + $0x260] sm:$0xff]  ;;  %v461_v60 = vld [vmem:[%s3902_s1 + $0x268] sm:$0xff]  ;;  %v3578_v63 = vsel %vm298_vm0, %v317_v40, %v318_v41  ;;  %v320_v2 = vrot.slane %v3552_v48, 1  ;;  %v321_v3 = vrot.slane %v277_v50, 1  ;;  %v2711_v6 = vpack.c.bf16 %v509_v54, %v508_v52  ;;  %v478_v8 = vld [vmem:[%s3902_s1 + $0x2f0] sm:$0xff] }
  0x60   : > { %617 = vmatprep.mubr.f32.mxu0 %v3538_v37  ;;  %722 = vmatprep.mubr.f32.mxu1 %v3512_v23  ;;  %v492_v4 = vld [vmem:[%s3902_s1 + $0x360] sm:$0xff]  ;;  %v493_v7 = vld [vmem:[%s3902_s1 + $0x368] sm:$0xff]  ;;  %v479_v10 = vld [vmem:[%s3902_s1 + $0x2f8] sm:$0xff]  ;;  %v2681_v11 = vpack.c.bf16 %v461_v60, %v460_v59  ;;  %v3604_v16 = vsel %vm331_vm1, %v350_v57, %v351_v58  ;;  %v353_v17 = vrot.slane %v3552_v48, 2  ;;  %v354_v19 = vrot.slane %v277_v50, 2 }
  0x61   : > { %2706 = vmatpush3.bf16.msra.mxu1 %v2705_v32  ;;  %2676 = vmatprep.subr.bf16.mxu0 %v2675_v38  ;;  %v510_v12 = vld [vmem:[%s3902_s1 + $0x3f0] sm:$0xff]  ;;  %v511_v14 = vld [vmem:[%s3902_s1 + $0x3f8] sm:$0xff]  ;;  %v3614_v22 = vsel %vm298_vm0, %v320_v2, %v321_v3  ;;  %v2713_v26 = vpack.c.bf16 %v493_v7, %v492_v4  ;;  %v2683_v27 = vpack.c.bf16 %v479_v10, %v478_v8  ;;  %v512_v28 = vld [vmem:[%s3902_s1 + $0x400] sm:$0xff] }
  0x62   : > { %618 = vmatmul.mubr.f32.gmra.mrb[10].mxu0 %v3469_v61  ;;  %2708 = vmatprep.subr.bf16.mxu1 %v2707_v46  ;;  %v462_v20 = vld [vmem:[%s3902_s1 + $0x270] sm:$0xff]  ;;  %v463_v21 = vld [vmem:[%s3902_s1 + $0x278] sm:$0xff]  ;;  %v3616_v25 = vld [vmem:[#allocation2 + $0x80] sm:$0xff]  ;;  %v2715_v32 = vpack.c.bf16 %v511_v14, %v510_v12  ;;  %v3635_v36 = vsel %vm331_vm1, %v353_v17, %v354_v19 }
  0x63   : > { %723 = vmatmul.mubr.f32.gmra.mrb[10].mxu1 %v3567_v55  ;;  %2678 = vmatpush3.bf16.msra.mxu0 %v2677_v51  ;;  %v513_v29 = vld [vmem:[%s3902_s1 + $0x408] sm:$0xff]  ;;  %v494_v33 = vld [vmem:[%s3902_s1 + $0x370] sm:$0xff]  ;;  %v495_v34 = vld [vmem:[%s3902_s1 + $0x378] sm:$0xff]  ;;  %v2685_v35 = vpack.c.bf16 %v463_v21, %v462_v20  ;;  %v370_v59 = vrot.slane %v3616_v25, 2 }
  0x64   : > { %622 = vmatprep.mubr.f32.mxu0 %v3578_v63  ;;  %727 = vmatprep.mubr.f32.mxu1 %v3552_v48  ;;  %v2719_v38 = vpack.c.bf16 %v513_v29, %v512_v28  ;;  %v2717_v40 = vpack.c.bf16 %v495_v34, %v494_v33  ;;  %v514_v41 = vld [vmem:[%s3902_s1 + $0x410] sm:$0xff]  ;;  %v515_v42 = vld [vmem:[%s3902_s1 + $0x418] sm:$0xff]  ;;  %v516_v44 = vld [vmem:[%s3902_s1 + $0x420] sm:$0xff] }
  0x65   : > { %2710 = vmatpush3.bf16.msra.mxu1 %v2709_v56  ;;  %2680 = vmatprep.subr.bf16.mxu0 %v2679_v1  ;;  %v2723_v43 = vpack.c.bf16 %v515_v42, %v514_v41  ;;  %v517_v46 = vld [vmem:[%s3902_s1 + $0x428] sm:$0xff]  ;;  %v518_v49 = vld [vmem:[%s3902_s1 + $0x430] sm:$0xff]  ;;  %v519_v50 = vld [vmem:[%s3902_s1 + $0x438] sm:$0xff] }
  0x66   : > { %623 = vmatmul.mubr.f32.gmra.mrb[12].mxu0 %v3512_v23  ;;  %2712 = vmatprep.subr.bf16.mxu1 %v2711_v6  ;;  %v521_v51 = vld [vmem:[%s3902_s1 + $0x448] sm:$0xff]  ;;  %v523_v52 = vld [vmem:[%s3902_s1 + $0x458] sm:$0xff]  ;;  %v524_v54 = vld [vmem:[%s3902_s1 + $0x460] sm:$0xff] }
  0x67   : > { %728 = vmatmul.mubr.f32.gmra.mrb[12].mxu1 %v3604_v16  ;;  %2682 = vmatpush3.bf16.msra.mxu0 %v2681_v11  ;;  %v525_v56 = vld [vmem:[%s3902_s1 + $0x468] sm:$0xff]  ;;  %v527_v1 = vld [vmem:[%s3902_s1 + $0x478] sm:$0xff]  ;;  %v1288_v10 = vld [vmem:[#allocation4 + $0x180] sm:$0xff] }
  0x68   : > { %627 = vmatprep.mubr.f32.mxu0 %v3614_v22  ;;  %732 = vmatprep.mubr.f32.mxu1 %v3616_v25  ;;  %v2743_v58 = vpack.c.bf16 %v525_v56, %v524_v54  ;;  %v1241_v8 = vld [vmem:[#allocation4 + $0x8] sm:$0xff]  ;;  %v1272_v11 = vld [vmem:[#allocation4 + $0x100] sm:$0xff]  ;;  %v1259_v17 = vld [vmem:[#allocation4 + $0x98] sm:$0xff] }
  0x69   : > { %2714 = vmatpush3.bf16.msra.mxu1 %v2713_v26  ;;  %2684 = vmatprep.subr.bf16.mxu0 %v2683_v27  ;;  %v1273_v12 = vld [vmem:[#allocation4 + $0x108] sm:$0xff]  ;;  %v1243_v20 = vld [vmem:[#allocation4 + $0x18] sm:$0xff]  ;;  %v1274_v27 = vld [vmem:[#allocation4 + $0x110] sm:$0xff] }
  0x6a   : > { %628 = vmatmul.mubr.f32.gmra.mrb[14].mxu0 %v3552_v48  ;;  %2716 = vmatprep.subr.bf16.mxu1 %v2715_v32  ;;  %v2785_v14 = vpack.c.bf16 %v1273_v12, %v1272_v11  ;;  %v1275_v28 = vld [vmem:[#allocation4 + $0x118] sm:$0xff]  ;;  %v1260_v32 = vld [vmem:[#allocation4 + $0xa0] sm:$0xff]  ;;  %v1261_v33 = vld [vmem:[#allocation4 + $0xa8] sm:$0xff] }
  0x6b   : > { %733 = vmatmul.mubr.f32.gmra.mrb[14].mxu1 %v3635_v36  ;;  %2686 = vmatpush3.bf16.msra.mxu0 %v2685_v35  ;;  %v2789_v29 = vpack.c.bf16 %v1275_v28, %v1274_v27  ;;  %v2759_v34 = vpack.c.bf16 %v1261_v33, %v1260_v32  ;;  %v1244_v35 = vld [vmem:[#allocation4 + $0x20] sm:$0xff]  ;;  %v1293_v41 = vld [vmem:[#allocation4 + $0x1a8] sm:$0xff]  ;;  %v1271_v27 = vld [vmem:[#allocation4 + $0xf8] sm:$0xff] }
  0x6c   : > { %802 = vmatprep.mubr.f32.mxu0 %v3398_v24  ;;  %2720 = vmatprep.subr.bf16.mxu0 %v2719_v38  ;;  %v2727_v24 = vpack.c.bf16 %v517_v46, %v516_v44  ;;  %v1277_v44 = vld [vmem:[#allocation4 + $0x128] sm:$0xff]  ;;  %v1264_v56 = vld [vmem:[#allocation4 + $0xc0] sm:$0xff]  ;;  %v1255_v32 = vld [vmem:[#allocation4 + $0x78] sm:$0xff] }
  0x6d   : > { %2718 = vmatpush3.bf16.msra.mxu1 %v2717_v40  ;;  %907 = vmatprep.mubr.f32.mxu1 %v3412_v31  ;;  %v1292_v40 = vld [vmem:[#allocation4 + $0x1a0] sm:$0xff]  ;;  %v1269_v11 = vld [vmem:[#allocation4 + $0xe8] sm:$0xff] }
  0x6e   : > { %803 = vmatmul.mubr.f32.vlgmr.msra.gmra.mrb[16].mxu0 %v3370_v9  ;;  %v520_v9 = vld [vmem:[%s3902_s1 + $0x440] sm:$0xff]  ;;  %v2791_v42 = vpack.c.bf16 %v1293_v41, %v1292_v40  ;;  %v1286_v40 = vld [vmem:[#allocation4 + $0x170] sm:$0xff]  ;;  %v1287_v41 = vld [vmem:[#allocation4 + $0x178] sm:$0xff] }
  0x6f   : > { %2722 = vmatpush3.bf16.msra.mxu0 %v2719_v38  ;;  %807 = vmatprep.mubr.f32.mxu0 %v3441_v45 }
  0x70   : > { %908 = vmatmul.mubr.f32.vlgmr.msra.gmra.mrb[16].mxu1 %v3350_v62  ;;  %2724 = vmatprep.subr.bf16.mxu0 %v2723_v43  ;;  %v2731_v62 = vpack.c.bf16 %v519_v50, %v518_v49  ;;  %v1263_v49 = vld [vmem:[#allocation4 + $0xb8] sm:$0xff] }
  0x71   : > { %912 = vmatprep.mubr.f32.mxu1 %v3455_v53 }
  0x72   : > { %808 = vmatmul.mubr.f32.gmra.mrb[18].mxu0 %v3412_v31  ;;  %v522_v31 = vld [vmem:[%s3902_s1 + $0x450] sm:$0xff] }
  0x73   : > { %2726 = vmatpush3.bf16.msra.mxu0 %v2723_v43  ;;  %812 = vmatprep.mubr.f32.mxu0 %v3484_v5  ;;  %v1276_v43 = vld [vmem:[#allocation4 + $0x120] sm:$0xff] }
  0x74   : > { %913 = vmatmul.mubr.f32.gmra.mrb[18].mxu1 %v3384_v18  ;;  %2728 = vmatprep.subr.bf16.mxu0 %v2727_v24  ;;  %v2735_v18 = vpack.c.bf16 %v521_v51, %v520_v9  ;;  %v2793_v46 = vpack.c.bf16 %v1277_v44, %v1276_v43  ;;  %v1247_v9 = vld [vmem:[#allocation4 + $0x38] sm:$0xff] }
  0x75   : > { %917 = vmatprep.mubr.f32.mxu1 %v3498_v13 }
  0x76   : > { %813 = vmatmul.mubr.f32.gmra.mrb[20].mxu0 %v3455_v53  ;;  %v279_v53 = vld [vmem:[#allocation2 + $0x88] sm:$0x3] }
  0x77   : > { %2730 = vmatpush3.bf16.msra.mxu0 %v2727_v24  ;;  %817 = vmatprep.mubr.f32.mxu0 %v3527_v30  ;;  %v367_v57 = vrot.slane %v279_v53, 1  ;;  %v371_v60 = vrot.slane %v279_v53, 2  ;;  %v1262_v24 = vld [vmem:[#allocation4 + $0xb0] sm:$0xff] }
  0x78   : > { %918 = vmatmul.mubr.f32.gmra.mrb[20].mxu1 %v3426_v39  ;;  %2732 = vmatprep.subr.bf16.mxu0 %v2731_v62  ;;  %v2739_v39 = vpack.c.bf16 %v523_v52, %v522_v31  ;;  %v2763_v50 = vpack.c.bf16 %v1263_v49, %v1262_v24  ;;  %v1295_v31 = vld [vmem:[#allocation4 + $0x1b8] sm:$0xff]  ;;  %v1278_v53 = vld [vmem:[#allocation4 + $0x130] sm:$0xff]  ;;  %v1320_v49 = vld [vmem:[#allocation4 + $0x280] sm:$0xff] }
  0x79   : > { %922 = vmatprep.mubr.f32.mxu1 %v3538_v37  ;;  %v372_v3 = vsel %vm331_vm1, %v370_v59, %v371_v60  ;;  %v1296_v60 = vld [vmem:[#allocation4 + $0x1c0] sm:$0xff] }
  0x7a   : > { %818 = vmatmul.mubr.f32.gmra.mrb[22].mxu0 %v3498_v13  ;;  %v366_v13 = vrot.slane %v3616_v25, 1 }
  0x7b   : > { %2734 = vmatpush3.bf16.msra.mxu0 %v2731_v62  ;;  %822 = vmatprep.mubr.f32.mxu0 %v3567_v55  ;;  %v1246_v62 = vld [vmem:[#allocation4 + $0x30] sm:$0xff] }
  0x7c   : > { %923 = vmatmul.mubr.f32.gmra.mrb[22].mxu1 %v3469_v61  ;;  %2736 = vmatprep.subr.bf16.mxu0 %v2735_v18  ;;  %v281_v61 = vld [vmem:[#allocation2 + $0x98] sm:$0x3]  ;;  %v368_v2 = vsel %vm298_vm0, %v366_v13, %v367_v57  ;;  %v2765_v51 = vpack.c.bf16 %v1247_v9, %v1246_v62  ;;  %v1265_v13 = vld [vmem:[#allocation4 + $0xc8] sm:$0xff]  ;;  %v1304_v9 = vld [vmem:[#allocation4 + $0x200] sm:$0xff] }
  0x7d   : > { %927 = vmatprep.mubr.f32.mxu1 %v3578_v63  ;;  %v2767_v57 = vpack.c.bf16 %v1265_v13, %v1264_v56  ;;  %v1306_v13 = vld [vmem:[#allocation4 + $0x210] sm:$0xff] }
  0x7e   : > { %823 = vmatmul.mubr.f32.gmra.mrb[24].mxu0 %v3538_v37  ;;  %v526_v37 = vld [vmem:[%s3902_s1 + $0x470] sm:$0xff] }
  0x7f   : > { %2738 = vmatpush3.bf16.msra.mxu0 %v2735_v18  ;;  %827 = vmatprep.mubr.f32.mxu0 %v3604_v16  ;;  %v2747_v4 = vpack.c.bf16 %v527_v1, %v526_v37  ;;  %v1294_v18 = vld [vmem:[#allocation4 + $0x1b0] sm:$0xff]  ;;  %v1297_v37 = vld [vmem:[#allocation4 + $0x1c8] sm:$0xff] }
  0x80   : > { %928 = vmatmul.mubr.f32.gmra.mrb[24].mxu1 %v3512_v23  ;;  %2740 = vmatprep.subr.bf16.mxu0 %v2739_v39  ;;  %v377_v23 = vrot.slane %v281_v61, 1  ;;  %v2795_v52 = vpack.c.bf16 %v1295_v31, %v1294_v18  ;;  %v2799_v1 = vpack.c.bf16 %v1297_v37, %v1296_v60  ;;  %v1352_v18 = vld [vmem:[#allocation4 + $0x380] sm:$0xff] }
  0x81   : > { %932 = vmatprep.mubr.f32.mxu1 %v3614_v22  ;;  %v1308_v37 = vld [vmem:[#allocation4 + $0x220] sm:$0xff] }
  0x82   : > { %828 = vmatmul.mubr.f32.gmra.mrb[26].mxu0 %v3578_v63  ;;  %v378_v6 = vsel %vm298_vm0, %v3268_v15, %v377_v23  ;;  %v381_v15 = vrot.slane %v281_v61, 2  ;;  %v1256_v63 = vld [vmem:[#allocation4 + $0x80] sm:$0xff]  ;;  %v1281_v23 = vld [vmem:[#allocation4 + $0x148] sm:$0xff] }
  0x83   : > { %2742 = vmatpush3.bf16.msra.mxu0 %v2739_v39  ;;  %832 = vmatprep.mubr.f32.mxu0 %v3635_v36  ;;  %v1279_v39 = vld [vmem:[#allocation4 + $0x138] sm:$0xff]  ;;  %v1248_v61 = vld [vmem:[#allocation4 + $0x40] sm:$0xff] }
  0x84   : > { %933 = vmatmul.mubr.f32.gmra.mrb[26].mxu1 %v3552_v48  ;;  %2744 = vmatprep.subr.bf16.mxu0 %v2743_v58  ;;  %v382_v48 = vsel %vm331_vm1, %v3326_v47, %v381_v15  ;;  %v1242_v47 = vld [vmem:[#allocation4 + $0x10] sm:$0xff]  ;;  %v2797_v54 = vpack.c.bf16 %v1279_v39, %v1278_v53 }
  0x85   : > { %937 = vmatprep.mubr.f32.mxu1 %v368_v2  ;;  %v2757_v21 = vpack.c.bf16 %v1243_v20, %v1242_v47  ;;  %v1301_v47 = vld [vmem:[#allocation4 + $0x1e8] sm:$0xff]  ;;  %v1322_v39 = vld [vmem:[#allocation4 + $0x290] sm:$0xff] }
  0x86   : > { %833 = vmatmul.mubr.f32.gmra.mrb[28].mxu0 %v3614_v22  ;;  %v1290_v22 = vld [vmem:[#allocation4 + $0x190] sm:$0xff] }
  0x87   : > { %2746 = vmatpush3.bf16.msra.mxu0 %v2743_v58  ;;  %837 = vmatprep.mubr.f32.mxu0 %v372_v3  ;;  %v1249_v58 = vld [vmem:[#allocation4 + $0x48] sm:$0xff] }
  0x88   : > { %938 = vmatmul.mubr.f32.gmra.mrb[28].mxu1 %v3616_v25  ;;  %2748 = vmatprep.subr.bf16.mxu0 %v2747_v4  ;;  %v1291_v25 = vld [vmem:[#allocation4 + $0x198] sm:$0xff]  ;;  %v2769_v59 = vpack.c.bf16 %v1249_v58, %v1248_v61  ;;  %v1324_v58 = vld [vmem:[#allocation4 + $0x2a0] sm:$0xff] }
  0x89   : > { %942 = vmatprep.mubr.f32.mxu1 %v378_v6  ;;  %v2787_v26 = vpack.c.bf16 %v1291_v25, %v1290_v22  ;;  %v1267_v6 = vld [vmem:[#allocation4 + $0xd8] sm:$0xff]  ;;  %v1285_v22 = vld [vmem:[#allocation4 + $0x168] sm:$0xff] }
  0x8a   : > { %838 = vmatmul.mubr.f32.gmra.mrb[30].mxu0 %v368_v2  ;;  %v1280_v2 = vld [vmem:[#allocation4 + $0x140] sm:$0xff] }
  0x8b   : > { %2750 = vmatpush3.bf16.msra.mxu0 %v2747_v4  ;;  %2535 = vmatprep.mubr.f32.mxu0 %v3441_v45  ;;  %v1257_v45 = vld [vmem:[#allocation4 + $0x88] sm:$0xff]  ;;  %v1266_v4 = vld [vmem:[#allocation4 + $0xd0] sm:$0xff] }
  0x8c   : > { %943 = vmatmul.mubr.f32.gmra.mrb[30].mxu1 %v2978_v0  ;;  %v2751_v7 = vpack.c.bf16 %v1257_v45, %v1256_v63  ;;  %v1240_v0 = vld [vmem:[#allocation4] sm:$0xff]  ;;  %v2771_v15 = vpack.c.bf16 %v1267_v6, %v1266_v4  ;;  %v1251_v63 = vld [vmem:[#allocation4 + $0x58] sm:$0xff]  ;;  %v1310_v6 = vld [vmem:[#allocation4 + $0x230] sm:$0xff] }
  0x8e   : > { %2536 = vmatmul.mubr.f32.vlgmr.msra.gmra.mrb[32].mxu0 %v3484_v5  ;;  %v2753_v5 = vpack.c.bf16 %v1241_v8, %v1240_v0  ;;  %2752 = vmatprep.subr.bf16.mxu1 %v2751_v7  ;;  %v1298_v7 = vld [vmem:[#allocation4 + $0x1d0] sm:$0xff]  ;;  %v1299_v0 = vld [vmem:[#allocation4 + $0x1d8] sm:$0xff] }
  0x8f   : > { %2538 = vmatprep.mubr.f32.mxu0 %v3527_v30  ;;  %v1289_v30 = vld [vmem:[#allocation4 + $0x188] sm:$0xff]  ;;  %v2803_v8 = vpack.c.bf16 %v1299_v0, %v1298_v7  ;;  %v1312_v0 = vld [vmem:[#allocation4 + $0x240] sm:$0xff] }
  0x90   : > { %2754 = vmatpush3.bf16.msra.mxu1 %v2753_v5  ;;  %v1282_v5 = vld [vmem:[#allocation4 + $0x150] sm:$0xff] }
  0x92   : > { %2539 = vmatmul.mubr.f32.gmra.mrb[34].mxu0 %v3567_v55  ;;  %v2783_v55 = vpack.c.bf16 %v1289_v30, %v1288_v10  ;;  %v1283_v10 = vld [vmem:[#allocation4 + $0x158] sm:$0xff] }
  0x93   : > { %2541 = vmatprep.mubr.f32.mxu0 %v3604_v16  ;;  %v1258_v16 = vld [vmem:[#allocation4 + $0x90] sm:$0xff]  ;;  %v2805_v30 = vpack.c.bf16 %v1283_v10, %v1282_v5 }
  0x94   : > { %2784 = vmatprep.subr.bf16.mxu0 %v2783_v55  ;;  %v2755_v19 = vpack.c.bf16 %v1259_v17, %v1258_v16  ;;  %v1268_v55 = vld [vmem:[#allocation4 + $0xe0] sm:$0xff]  ;;  %v1253_v16 = vld [vmem:[#allocation4 + $0x68] sm:$0xff]  ;;  %v1330_v10 = vld [vmem:[#allocation4 + $0x2d0] sm:$0xff] }
  0x95   : > { %2786 = vmatpush3.bf16.msra.mxu0 %v2785_v14  ;;  %v2775_v12 = vpack.c.bf16 %v1269_v11, %v1268_v55  ;;  %v1252_v14 = vld [vmem:[#allocation4 + $0x60] sm:$0xff]  ;;  %v1314_v11 = vld [vmem:[#allocation4 + $0x250] sm:$0xff] }
  0x96   : > { %2542 = vmatmul.mubr.f32.gmra.mrb[36].mxu0 %v3635_v36  ;;  %2756 = vmatprep.subr.bf16.mxu1 %v2755_v19  ;;  %v1245_v36 = vld [vmem:[#allocation4 + $0x28] sm:$0xff]  ;;  %v2777_v17 = vpack.c.bf16 %v1253_v16, %v1252_v14  ;;  %v1300_v19 = vld [vmem:[#allocation4 + $0x1e0] sm:$0xff] }
  0x97   : > { %2544 = vmatprep.mubr.f32.mxu0 %v372_v3  ;;  %2758 = vmatpush3.bf16.msra.mxu1 %v2757_v21  ;;  %v2761_v38 = vpack.c.bf16 %v1245_v36, %v1244_v35  ;;  %v2801_v3 = vpack.c.bf16 %v1281_v23, %v1280_v2  ;;  %v2807_v20 = vpack.c.bf16 %v1301_v47, %v1300_v19  ;;  %v1284_v21 = vld [vmem:[#allocation4 + $0x160] sm:$0xff]  ;;  %v1303_v35 = vld [vmem:[#allocation4 + $0x1f8] sm:$0xff]  ;;  %v3723_v36 = vld [vmem:[#allocation3 + $0x8] sm:$0x3] }
  0x98   : > { %2788 = vmatprep.subr.bf16.mxu0 %v2787_v26  ;;  %2760 = vmatprep.subr.bf16.mxu1 %v2759_v34  ;;  %v2809_v25 = vpack.c.bf16 %v1285_v22, %v1284_v21  ;;  %v1270_v26 = vld [vmem:[#allocation4 + $0xf0] sm:$0xff]  ;;  %v1157_v44 = vrot.slane %v3723_v36, 1  ;;  %v1332_v16 = vld [vmem:[#allocation4 + $0x2e0] sm:$0xff] }
  0x99   : > { %2790 = vmatpush3.bf16.msra.mxu0 %v2789_v29  ;;  %v2779_v28 = vpack.c.bf16 %v1271_v27, %v1270_v26  ;;  %v1254_v29 = vld [vmem:[#allocation4 + $0x70] sm:$0xff]  ;;  %v1316_v47 = vld [vmem:[#allocation4 + $0x260] sm:$0xff] }
  0x9a   : > { %2545 = vmatmul.mubr.f32.gmra.mrb[38].mxu0 %v382_v48  ;;  %2792 = vmatprep.subr.bf16.mxu0 %v2791_v42  ;;  %v1250_v48 = vld [vmem:[#allocation4 + $0x50] sm:$0xff]  ;;  %v2781_v33 = vpack.c.bf16 %v1255_v32, %v1254_v29  ;;  %v3725_v42 = vld [vmem:[#allocation2] sm:$0xff] }
  0x9b   : > { %2762 = vmatpush3.bf16.msra.mxu1 %v2761_v38  ;;  %v2773_v45 = vpack.c.bf16 %v1251_v63, %v1250_v48  ;;  %v1302_v34 = vld [vmem:[#allocation4 + $0x1f0] sm:$0xff]  ;;  %v1156_v43 = vrot.slane %v3725_v42, 1  ;;  %v1328_v63 = vld [vmem:[#allocation4 + $0x2c0] sm:$0xff] }
  0x9c   : > { %2764 = vmatprep.subr.bf16.mxu1 %v2763_v50  ;;  %v2811_v38 = vpack.c.bf16 %v1303_v35, %v1302_v34  ;;  %v1321_v50 = vld [vmem:[#allocation4 + $0x288] sm:$0xff]  ;;  %v1326_v23 = vld [vmem:[#allocation4 + $0x2b0] sm:$0xff]  ;;  %v1368_v32 = vld [vmem:[#allocation4 + $0x400] sm:$0xff] }
  0x9d   : > { %2794 = vmatpush3.bf16.msra.mxu0 %v2793_v46  ;;  %v2813_v46 = vpack.c.bf16 %v1287_v41, %v1286_v40  ;;  %v1158_v24 = vsel %vm298_vm0, %v1156_v43, %v1157_v44  ;;  %v2815_v62 = vpack.c.bf16 %v1321_v50, %v1320_v49  ;;  %v1334_v22 = vld [vmem:[#allocation4 + $0x2f0] sm:$0xff] }
  0x9e   : > { %2796 = vmatprep.subr.bf16.mxu0 %v2795_v52  ;;  %1448 = vmatprep.mubr.f32.mxu1 %v1158_v24  ;;  %v1353_v52 = vld [vmem:[#allocation4 + $0x388] sm:$0xff]  ;;  %v1318_v27 = vld [vmem:[#allocation4 + $0x270] sm:$0xff] }
  0x9f   : > { %2766 = vmatpush3.bf16.msra.mxu1 %v2765_v51  ;;  %v1305_v51 = vld [vmem:[#allocation4 + $0x208] sm:$0xff]  ;;  %v2847_v53 = vpack.c.bf16 %v1353_v52, %v1352_v18 }
  0xa0   : > { %2768 = vmatprep.subr.bf16.mxu1 %v2767_v57  ;;  %v2817_v31 = vpack.c.bf16 %v1305_v51, %v1304_v9  ;;  %v1307_v57 = vld [vmem:[#allocation4 + $0x218] sm:$0xff] }
  0xa1   : > { %2798 = vmatpush3.bf16.msra.mxu0 %v2797_v54  ;;  %v1323_v54 = vld [vmem:[#allocation4 + $0x298] sm:$0xff]  ;;  %v2821_v61 = vpack.c.bf16 %v1307_v57, %v1306_v13 }
  0xa2   : > { %2800 = vmatprep.subr.bf16.mxu0 %v2799_v1  ;;  %v2819_v56 = vpack.c.bf16 %v1323_v54, %v1322_v39  ;;  %v1309_v1 = vld [vmem:[#allocation4 + $0x228] sm:$0xff] }
  0xa3   : > { %2770 = vmatpush3.bf16.msra.mxu1 %v2769_v59  ;;  %v1325_v59 = vld [vmem:[#allocation4 + $0x2a8] sm:$0xff]  ;;  %v2825_v2 = vpack.c.bf16 %v1309_v1, %v1308_v37 }
  0xa4   : > { %2772 = vmatprep.subr.bf16.mxu1 %v2771_v15  ;;  %v2823_v60 = vpack.c.bf16 %v1325_v59, %v1324_v58  ;;  %v1311_v15 = vld [vmem:[#allocation4 + $0x238] sm:$0xff] }
  0xa5   : > { %2802 = vmatpush3.bf16.msra.mxu0 %v2801_v3  ;;  %v1327_v3 = vld [vmem:[#allocation4 + $0x2b8] sm:$0xff]  ;;  %v2829_v48 = vpack.c.bf16 %v1311_v15, %v1310_v6 }
  0xa6   : > { %2804 = vmatprep.subr.bf16.mxu0 %v2803_v8  ;;  %v2827_v4 = vpack.c.bf16 %v1327_v3, %v1326_v23  ;;  %v1313_v8 = vld [vmem:[#allocation4 + $0x248] sm:$0xff] }
  0xa7   : > { %2774 = vmatpush3.bf16.msra.mxu1 %v2773_v45  ;;  %v1329_v45 = vld [vmem:[#allocation4 + $0x2c8] sm:$0xff]  ;;  %v2833_v5 = vpack.c.bf16 %v1313_v8, %v1312_v0 }
  0xa8   : > { %2776 = vmatprep.subr.bf16.mxu1 %v2775_v12  ;;  %v2831_v7 = vpack.c.bf16 %v1329_v45, %v1328_v63  ;;  %v1315_v12 = vld [vmem:[#allocation4 + $0x258] sm:$0xff] }
  0xa9   : > { %2806 = vmatpush3.bf16.msra.mxu0 %v2805_v30  ;;  %v1331_v30 = vld [vmem:[#allocation4 + $0x2d8] sm:$0xff]  ;;  %v2837_v14 = vpack.c.bf16 %v1315_v12, %v1314_v11 }
  0xaa   : > { %2808 = vmatprep.subr.bf16.mxu0 %v2807_v20  ;;  %v2835_v55 = vpack.c.bf16 %v1331_v30, %v1330_v10  ;;  %v1317_v20 = vld [vmem:[#allocation4 + $0x268] sm:$0xff] }
  0xab   : > { %2778 = vmatpush3.bf16.msra.mxu1 %v2777_v17  ;;  %v1333_v17 = vld [vmem:[#allocation4 + $0x2e8] sm:$0xff]  ;;  %v2841_v21 = vpack.c.bf16 %v1317_v20, %v1316_v47 }
  0xac   : > { %2780 = vmatprep.subr.bf16.mxu1 %v2779_v28  ;;  %v2839_v19 = vpack.c.bf16 %v1333_v17, %v1332_v16  ;;  %v1319_v28 = vld [vmem:[#allocation4 + $0x278] sm:$0xff] }
  0xad   : > { %2810 = vmatpush3.bf16.msra.mxu0 %v2809_v25  ;;  %v1335_v25 = vld [vmem:[#allocation4 + $0x2f8] sm:$0xff]  ;;  %v2845_v29 = vpack.c.bf16 %v1319_v28, %v1318_v27 }
  0xae   : > { %2812 = vmatprep.subr.bf16.mxu0 %v2811_v38  ;;  %v2843_v26 = vpack.c.bf16 %v1335_v25, %v1334_v22 }
  0xaf   : > { %2782 = vmatpush3.bf16.msra.mxu1 %v2781_v33  ;;  %v1369_v33 = vld [vmem:[#allocation4 + $0x408] sm:$0xff] }
  0xb0   : > { %2816 = vmatprep.subr.bf16.mxu1 %v2815_v62  ;;  %v3733_v34 = vpack.c.bf16 %v1369_v33, %v1368_v32 }
  0xb1   : > { %2814 = vmatpush3.bf16.msra.mxu0 %v2813_v46 }
  0xb2   : > { %1449 = vmatmul.mubr.f32.vlgmr.msra.gmra.mrb[32].mxu1 %v3725_v42  ;;  %2848 = vmatprep.subr.bf16.mxu0 %v2847_v53 }
  0xb3   : > { %2818 = vmatpush3.bf16.msra.mxu1 %v2817_v31 }
  0xb4   : > { %2820 = vmatprep.subr.bf16.mxu1 %v2819_v56 }
  0xb7   : > { %2822 = vmatpush3.bf16.msra.mxu1 %v2821_v61 }
  0xb8   : > { %2824 = vmatprep.subr.bf16.mxu1 %v2823_v60 }
  0xbb   : > { %2826 = vmatpush3.bf16.msra.mxu1 %v2825_v2 }
  0xbc   : > { %2828 = vmatprep.subr.bf16.mxu1 %v2827_v4 }
  0xbf   : > { %2830 = vmatpush3.bf16.msra.mxu1 %v2829_v48 }
  0xc0   : > { %2832 = vmatprep.subr.bf16.mxu1 %v2831_v7 }
  0xc3   : > { %2834 = vmatpush3.bf16.msra.mxu1 %v2833_v5 }
  0xc4   : > { %2836 = vmatprep.subr.bf16.mxu1 %v2835_v55 }
  0xc7   : > { %2838 = vmatpush3.bf16.msra.mxu1 %v2837_v14 }
  0xc8   : > { %2840 = vmatprep.subr.bf16.mxu1 %v2839_v19 }
  0xcb   : > { %2842 = vmatpush3.bf16.msra.mxu1 %v2841_v21 }
  0xcc   : > { %2844 = vmatprep.subr.bf16.mxu1 %v2843_v26 }
  0xcf   : > { %2846 = vmatpush3.bf16.msra.mxu1 %v2845_v29 }
  0xd0   : > { %2880 = vmatprep.subr.bf16.mxu1 %v3733_v34 }
 0x121   : > { %v2039_v35 = vpop.f32.mrb[0].mxu0 }
 0x122   : > { %v2095_v38 = vpop.f32.mrb[0].mxu1  ;;  %v2040_v40 = vpop.f32.mrb[1].mxu0 }
 0x123   : > { %v2041_v41 = vadd.f32 %v2040_v40, %v2039_v35  ;;  %v2096_v44 = vpop.f32.mrb[1].mxu1 }
 0x124   : > { %v2097_v46 = vadd.f32 %v2096_v44, %v2095_v38 }
 0x125   : > { %v2042_v24 = vpop.f32.mrb[2].mxu0 }
 0x126   : > { %v700_v49 = vadd.f32 %v2097_v46, %v2041_v41  ;;  %v2098_v50 = vpop.f32.mrb[2].mxu1  ;;  %v2043_v62 = vpop.f32.mrb[3].mxu0 }
 0x127   : > { %v2044_v9 = vadd.f32 %v2043_v62, %v2042_v24  ;;  %v2099_v51 = vpop.f32.mrb[3].mxu1 }
 0x128   : > { %v2100_v18 = vadd.f32 %v2099_v51, %v2098_v50 }
 0x129   : > { %v2045_v31 = vpop.f32.mrb[4].mxu0 }
 0x12a   : > { %v705_v52 = vadd.f32 %v2100_v18, %v2044_v9  ;;  %v2101_v53 = vpop.f32.mrb[4].mxu1  ;;  %v2046_v39 = vpop.f32.mrb[5].mxu0 }
 0x12b   : > { %v2047_v54 = vadd.f32 %v2046_v39, %v2045_v31  ;;  %v2102_v56 = vpop.f32.mrb[5].mxu1 }
 0x12c   : > { %v2103_v13 = vadd.f32 %v2102_v56, %v2101_v53 }
 0x12d   : > { %v2048_v57 = vpop.f32.mrb[6].mxu0 }
 0x12e   : > { %v710_v61 = vadd.f32 %v2103_v13, %v2047_v54  ;;  %v2104_v58 = vpop.f32.mrb[6].mxu1  ;;  %v2049_v59 = vpop.f32.mrb[7].mxu0 }
 0x12f   : > { %v2050_v60 = vadd.f32 %v2049_v59, %v2048_v57  ;;  %v2105_v37 = vpop.f32.mrb[7].mxu1 }
 0x130   : > { %v2106_v1 = vadd.f32 %v2105_v37, %v2104_v58 }
 0x131   : > { %v2051_v2 = vpop.f32.mrb[8].mxu0 }
 0x132   : > { %v715_v23 = vadd.f32 %v2106_v1, %v2050_v60  ;;  %v2107_v3 = vpop.f32.mrb[8].mxu1  ;;  %v2052_v4 = vpop.f32.mrb[9].mxu0 }
 0x133   : > { %v2053_v6 = vadd.f32 %v2052_v4, %v2051_v2  ;;  %v2108_v15 = vpop.f32.mrb[9].mxu1 }
 0x134   : > { %v2109_v48 = vadd.f32 %v2108_v15, %v2107_v3 }
 0x135   : > { %v2054_v63 = vpop.f32.mrb[10].mxu0 }
 0x136   : > { %v720_v45 = vadd.f32 %v2109_v48, %v2053_v6  ;;  %v2110_v7 = vpop.f32.mrb[10].mxu1  ;;  %v2055_v0 = vpop.f32.mrb[11].mxu0 }
 0x137   : > { %v2056_v8 = vadd.f32 %v2055_v0, %v2054_v63  ;;  %v2111_v5 = vpop.f32.mrb[11].mxu1 }
 0x138   : > { %v2112_v10 = vadd.f32 %v2111_v5, %v2110_v7 }
 0x139   : > { %v2057_v30 = vpop.f32.mrb[12].mxu0 }
 0x13a   : > { %v725_v55 = vadd.f32 %v2112_v10, %v2056_v8  ;;  %v2113_v11 = vpop.f32.mrb[12].mxu1  ;;  %v2058_v12 = vpop.f32.mrb[13].mxu0 }
 0x13b   : > { %v2059_v14 = vadd.f32 %v2058_v12, %v2057_v30  ;;  %v2114_v16 = vpop.f32.mrb[13].mxu1 }
 0x13c   : > { %v2115_v17 = vadd.f32 %v2114_v16, %v2113_v11 }
 0x13d   : > { %v2060_v19 = vpop.f32.mrb[14].mxu0 }
 0x13e   : > { %v730_v47 = vadd.f32 %v2115_v17, %v2059_v14  ;;  %v2116_v20 = vpop.f32.mrb[14].mxu1  ;;  %v2061_v21 = vpop.f32.mrb[15].mxu0 }
 0x13f   : > { %v2062_v22 = vadd.f32 %v2061_v21, %v2060_v19  ;;  %v2117_v25 = vpop.f32.mrb[15].mxu1 }
 0x140   : > { %v2118_v26 = vadd.f32 %v2117_v25, %v2116_v20 }
 0x141   : > { %v2151_v27 = vpop.f32.mrb[16].mxu0 }
 0x142   : > { %v735_v28 = vadd.f32 %v2118_v26, %v2062_v22  ;;  %v2152_v29 = vpop.f32.mrb[17].mxu0 }
 0x143   : > { %v2153_v32 = vadd.f32 %v2152_v29, %v2151_v27  ;;  %v2207_v33 = vpop.f32.mrb[16].mxu1 }
 0x144   : > { %v2208_v35 = vpop.f32.mrb[17].mxu1 }
 0x145   : > { %v805_v38 = vadd.f32 %v2153_v32, %v700_v49  ;;  %v2209_v40 = vadd.f32 %v2208_v35, %v2207_v33  ;;  %v2154_v41 = vpop.f32.mrb[18].mxu0 }
 0x146   : > { %v2155_v44 = vpop.f32.mrb[19].mxu0 }
 0x147   : > { %v2156_v46 = vadd.f32 %v2155_v44, %v2154_v41  ;;  %v2210_v24 = vpop.f32.mrb[18].mxu1  ;;  %v910_v50 = vadd.f32 %v2209_v40, %v805_v38 }
 0x148   : > { %v2211_v62 = vpop.f32.mrb[19].mxu1 }
 0x149   : > { %v810_v9 = vadd.f32 %v2156_v46, %v705_v52  ;;  %v2212_v51 = vadd.f32 %v2211_v62, %v2210_v24  ;;  %v2157_v18 = vpop.f32.mrb[20].mxu0 }
 0x14a   : > { %v2158_v31 = vpop.f32.mrb[21].mxu0 }
 0x14b   : > { %v2159_v53 = vadd.f32 %v2158_v31, %v2157_v18  ;;  %v2213_v39 = vpop.f32.mrb[20].mxu1  ;;  %v915_v54 = vadd.f32 %v2212_v51, %v810_v9 }
 0x14c   : > { %v2214_v56 = vpop.f32.mrb[21].mxu1 }
 0x14d   : > { %v815_v13 = vadd.f32 %v2159_v53, %v710_v61  ;;  %v2215_v57 = vadd.f32 %v2214_v56, %v2213_v39  ;;  %v2160_v58 = vpop.f32.mrb[22].mxu0 }
 0x14e   : > { %v2161_v59 = vpop.f32.mrb[23].mxu0 }
 0x14f   : > { %v2162_v49 = vadd.f32 %v2161_v59, %v2160_v58  ;;  %v2216_v60 = vpop.f32.mrb[22].mxu1  ;;  %v920_v37 = vadd.f32 %v2215_v57, %v815_v13 }
 0x150   : > { %v2217_v1 = vpop.f32.mrb[23].mxu1 }
 0x151   : > { %v820_v2 = vadd.f32 %v2162_v49, %v715_v23  ;;  %v2218_v3 = vadd.f32 %v2217_v1, %v2216_v60  ;;  %v2163_v4 = vpop.f32.mrb[24].mxu0 }
 0x152   : > { %v2164_v6 = vpop.f32.mrb[25].mxu0 }
 0x153   : > { %v2165_v52 = vadd.f32 %v2164_v6, %v2163_v4  ;;  %v2219_v15 = vpop.f32.mrb[24].mxu1  ;;  %v925_v48 = vadd.f32 %v2218_v3, %v820_v2 }
 0x154   : > { %v2220_v63 = vpop.f32.mrb[25].mxu1 }
 0x155   : > { %v825_v7 = vadd.f32 %v2165_v52, %v720_v45  ;;  %v2221_v0 = vadd.f32 %v2220_v63, %v2219_v15  ;;  %v2166_v8 = vpop.f32.mrb[26].mxu0  ;;  %v1189_v15 = vrot.slane %v3723_v36, 2 }
 0x156   : > { %v2167_v5 = vpop.f32.mrb[27].mxu0 }
 0x157   : > { %v2168_v61 = vadd.f32 %v2167_v5, %v2166_v8  ;;  %v2222_v10 = vpop.f32.mrb[26].mxu1  ;;  %v930_v30 = vadd.f32 %v2221_v0, %v825_v7  ;;  %v1336_v0 = vld [vmem:[#allocation4 + $0x300] sm:$0xff]  ;;  %v1337_v8 = vld [vmem:[#allocation4 + $0x308] sm:$0xff] }
 0x158   : > { %v2223_v11 = vpop.f32.mrb[27].mxu1 }
 0x159   : > { %v830_v12 = vadd.f32 %v2168_v61, %v725_v55  ;;  %v2224_v14 = vadd.f32 %v2223_v11, %v2222_v10  ;;  %v2169_v16 = vpop.f32.mrb[28].mxu0  ;;  %v2001_v55 = vld [vmem:[%s3904_s3] ss:$0 sm:$0xff]  ;;  %v1354_v10 = vld [vmem:[#allocation4 + $0x390] sm:$0xff] }
 0x15a   : > { %v2170_v17 = vpop.f32.mrb[29].mxu0 }
 0x15b   : > { %v2171_v23 = vadd.f32 %v2170_v17, %v2169_v16  ;;  %v2225_v19 = vpop.f32.mrb[28].mxu1  ;;  %v935_v20 = vadd.f32 %v2224_v14, %v830_v12 }
 0x15c   : > { %v2226_v21 = vpop.f32.mrb[29].mxu1 }
 0x15d   : > { %v835_v22 = vadd.f32 %v2171_v23, %v730_v47  ;;  %v2227_v25 = vadd.f32 %v2226_v21, %v2225_v19  ;;  %v2172_v26 = vpop.f32.mrb[30].mxu0  ;;  %v2002_v47 = vld [vmem:[%s3905_s4] ss:$0 sm:$0xff]  ;;  %v2849_v23 = vpack.c.bf16 %v1337_v8, %v1336_v0 }
 0x15e   : > { %v2173_v27 = vpop.f32.mrb[31].mxu0 }
 0x15f   : > { %v2174_v45 = vadd.f32 %v2173_v27, %v2172_v26  ;;  %v2228_v29 = vpop.f32.mrb[30].mxu1  ;;  %v940_v32 = vadd.f32 %v2227_v25, %v835_v22 }
 0x160   : > { %v2229_v33 = vpop.f32.mrb[31].mxu1 }
 0x161   : > { %v840_v35 = vadd.f32 %v2174_v45, %v735_v28  ;;  %v2230_v38 = vadd.f32 %v2229_v33, %v2228_v29  ;;  %v2537_v40 = vpop.f32.mrb[32].mxu0  ;;  %v1339_v29 = vld [vmem:[#allocation4 + $0x318] sm:$0xff] }
 0x162   : > { %v1020_v41 = vadd.f32 %v2537_v40, %v915_v54  ;;  %v1014_v44 = vpop.f32.mrb[33].mxu0  ;;  %v1356_v40 = vld [vmem:[#allocation4 + $0x3a0] sm:$0xff] }
 0x163   : > { %v1015_v46 = vadd.f32 %v1014_v44, %v910_v50  ;;  %v945_v24 = vadd.f32 %v2230_v38, %v840_v35 }
 0x164   : > { %v1061_v62 = vmul.f32 %v2001_v55, %v1020_v41 }
 0x165   : > { %v1060_v9 = vmul.f32 %v2001_v55, %v1015_v46  ;;  %v2540_v51 = vpop.f32.mrb[34].mxu0 }
 0x166   : > { %v1076_v18 = vadd.f32 %v2002_v47, %v1061_v62  ;;  %v1030_v31 = vadd.f32 %v2540_v51, %v925_v48  ;;  %v1024_v28 = vpop.f32.mrb[35].mxu0  ;;  %v1341_v51 = vld [vmem:[#allocation4 + $0x328] sm:$0xff] }
 0x167   : > { %v1075_v53 = vadd.f32 %v2002_v47, %v1060_v9  ;;  %v1025_v39 = vadd.f32 %v1024_v28, %v920_v37  ;;  %v1188_v37 = vrot.slane %v3725_v42, 2  ;;  %v1340_v9 = vld [vmem:[#allocation4 + $0x320] sm:$0xff] }
 0x168   : > { %v1084_v56 = vmax.f32 %v1076_v18, 0.0  ;;  %v1063_v13 = vmul.f32 %v2001_v55, %v1030_v31 }
 0x169   : > { %v1083_v57 = vmax.f32 %v1075_v53, 0.0  ;;  %v1062_v58 = vmul.f32 %v2001_v55, %v1025_v39  ;;  %v2543_v54 = vpop.f32.mrb[36].mxu0  ;;  %v1190_v36 = vsel %vm331_vm1, %v1188_v37, %v1189_v15 }
 0x16a   : > { %1113 = vst [vmem:[#allocation3 + $0x21] sm:$0xff] %v1084_v56  ;;  %v1078_v59 = vadd.f32 %v2002_v47, %v1063_v13  ;;  %v1040_v49 = vadd.f32 %v2543_v54, %v935_v20  ;;  %v1034_v60 = vpop.f32.mrb[37].mxu0  ;;  %v1338_v20 = vld [vmem:[#allocation4 + $0x310] sm:$0xff]  ;;  %v1359_v56 = vld [vmem:[#allocation4 + $0x3b8] sm:$0xff] }
 0x16b   : > { %1112 = vst [vmem:[#allocation3 + $0x11] sm:$0xff] %v1083_v57  ;;  %v1077_v50 = vadd.f32 %v2002_v47, %v1062_v58  ;;  %v1035_v1 = vadd.f32 %v1034_v60, %v930_v30  ;;  %v1355_v30 = vld [vmem:[#allocation4 + $0x398] sm:$0xff]  ;;  %v2853_v62 = vpack.c.bf16 %v1339_v29, %v1338_v20  ;;  %v2857_v60 = vpack.c.bf16 %v1341_v51, %v1340_v9  ;;  %v1346_v29 = vld [vmem:[#allocation4 + $0x350] sm:$0xff] }
 0x16c   : > { %v1086_v2 = vmax.f32 %v1078_v59, 0.0  ;;  %v1065_v3 = vmul.f32 %v2001_v55, %v1040_v49  ;;  %v2851_v45 = vpack.c.bf16 %v1355_v30, %v1354_v10 }
 0x16d   : > { %v1085_v4 = vmax.f32 %v1077_v50, 0.0  ;;  %v1064_v6 = vmul.f32 %v2001_v55, %v1035_v1  ;;  %v2546_v52 = vpop.f32.mrb[38].mxu0 }
 0x16e   : > { %1115 = vst [vmem:[#allocation3 + $0x41] sm:$0xff] %v1086_v2  ;;  %v1080_v48 = vadd.f32 %v2002_v47, %v1065_v3  ;;  %v1050_v63 = vadd.f32 %v2546_v52, %v945_v24  ;;  %v1044_v7 = vpop.f32.mrb[39].mxu0  ;;  %v1342_v3 = vld [vmem:[#allocation4 + $0x330] sm:$0xff] }
 0x16f   : > { %1114 = vst [vmem:[#allocation3 + $0x31] sm:$0xff] %v1085_v4  ;;  %v1079_v5 = vadd.f32 %v2002_v47, %v1064_v6  ;;  %v1045_v61 = vadd.f32 %v1044_v7, %v940_v32  ;;  %v1343_v4 = vld [vmem:[#allocation4 + $0x338] sm:$0xff]  ;;  %v1361_v7 = vld [vmem:[#allocation4 + $0x3c8] sm:$0xff] }
 0x170   : > { %v1088_v11 = vmax.f32 %v1080_v48, 0.0  ;;  %v1067_v12 = vmul.f32 %v2001_v55, %v1050_v63  ;;  %v1360_v63 = vld [vmem:[#allocation4 + $0x3c0] sm:$0xff] }
 0x171   : > { %v1087_v14 = vmax.f32 %v1079_v5, 0.0  ;;  %v1066_v16 = vmul.f32 %v2001_v55, %v1045_v61  ;;  %v3747_v17 = vld [vmem:[#allocation3 + $0x20] sm:$0xff]  ;;  %v1125_v19 = vld [vmem:[#allocation3 + $0x28] sm:$0x3]  ;;  %v2861_v5 = vpack.c.bf16 %v1343_v4, %v1342_v3 }
 0x172   : > { %1117 = vst [vmem:[#allocation3 + $0x61] sm:$0xff] %v1088_v11  ;;  %v1082_v21 = vadd.f32 %v2002_v47, %v1067_v12  ;;  %v1122_v22 = vld [vmem:[#allocation3 + $0x10] sm:$0xff]  ;;  %v1123_v25 = vld [vmem:[#allocation3 + $0x18] sm:$0x3]  ;;  %v1162_v26 = vrot.slane %v3747_v17, 1  ;;  %v1163_v27 = vrot.slane %v1125_v19, 1  ;;  %v2863_v11 = vpack.c.bf16 %v1361_v7, %v1360_v63 }
 0x173   : > { %1116 = vst [vmem:[#allocation3 + $0x51] sm:$0xff] %v1087_v14  ;;  %v1081_v32 = vadd.f32 %v2002_v47, %v1066_v16  ;;  %1553 = vmatprep.mubr.f32.mxu0 %v1122_v22  ;;  %v1159_v33 = vrot.slane %v1122_v22, 1  ;;  %v1160_v35 = vrot.slane %v1123_v25, 1  ;;  %v1191_v38 = vrot.slane %v1122_v22, 2  ;;  %v1357_v55 = vld [vmem:[#allocation4 + $0x3a8] sm:$0xff]  ;;  %v1358_v47 = vld [vmem:[#allocation4 + $0x3b0] sm:$0xff] }
 0x174   : > { %v1090_v41 = vmax.f32 %v1082_v21, 0.0  ;;  %1554 = vmatmul.mubr.f32.vlgmr.msra.gmra.mrb[40].mxu0 %v1190_v36  ;;  %v1192_v44 = vrot.slane %v1123_v25, 2  ;;  %v3756_v18 = vsel %vm298_vm0, %v1162_v26, %v1163_v27  ;;  %v1194_v53 = vrot.slane %v3747_v17, 2  ;;  %v1344_v61 = vld [vmem:[#allocation4 + $0x340] sm:$0xff]  ;;  %v1345_v12 = vld [vmem:[#allocation4 + $0x348] sm:$0xff]  ;;  %v1362_v14 = vld [vmem:[#allocation4 + $0x3d0] sm:$0xff] }
 0x175   : > { %v1089_v46 = vmax.f32 %v1081_v32, 0.0  ;;  %1558 = vmatprep.mubr.f32.mxu0 %v3747_v17  ;;  %2850 = vmatpush3.bf16.msra.mxu0 %v2849_v23  ;;  %v3752_v24 = vsel %vm298_vm0, %v1159_v33, %v1160_v35  ;;  %v2855_v39 = vpack.c.bf16 %v1357_v55, %v1356_v40  ;;  %v1195_v54 = vrot.slane %v1125_v19, 2  ;;  %v3765_v59 = vld [vmem:[#allocation3 + $0x40] sm:$0xff]  ;;  %v1129_v49 = vld [vmem:[#allocation3 + $0x48] sm:$0x3]  ;;  %v1363_v16 = vld [vmem:[#allocation4 + $0x3d8] sm:$0xff] }
 0x176   : > { %1119 = vst [vmem:[#allocation3 + $0x81] sm:$0xff] %v1090_v41  ;;  %1453 = vmatprep.mubr.f32.mxu1 %v3752_v24  ;;  %2852 = vmatprep.subr.bf16.mxu0 %v2851_v45  ;;  %v3758_v31 = vld [vmem:[#allocation3 + $0x30] sm:$0xff]  ;;  %v1127_v28 = vld [vmem:[#allocation3 + $0x38] sm:$0x3]  ;;  %v3762_v13 = vsel %vm331_vm1, %v1191_v38, %v1192_v44  ;;  %v1168_v50 = vrot.slane %v3765_v59, 1  ;;  %v1169_v1 = vrot.slane %v1129_v49, 1  ;;  %v2859_v2 = vpack.c.bf16 %v1359_v56, %v1358_v47 }
 0x177   : > { %1118 = vst [vmem:[#allocation3 + $0x71] sm:$0xff] %v1089_v46  ;;  %1454 = vmatmul.mubr.f32.gmra.mrb[34].mxu1 %v1122_v22  ;;  %v1165_v57 = vrot.slane %v3758_v31, 1  ;;  %v1166_v58 = vrot.slane %v1127_v28, 1  ;;  %v3776_v52 = vsel %vm331_vm1, %v1194_v53, %v1195_v54  ;;  %v1197_v15 = vrot.slane %v3758_v31, 2  ;;  %v1347_v32 = vld [vmem:[#allocation4 + $0x358] sm:$0xff]  ;;  %v1364_v55 = vld [vmem:[#allocation4 + $0x3e0] sm:$0xff] }
 0x178   : > { %1458 = vmatprep.mubr.f32.mxu1 %v3756_v18  ;;  %1559 = vmatmul.mubr.f32.gmra.mrb[42].mxu0 %v3762_v13  ;;  %v1198_v48 = vrot.slane %v1127_v28, 2  ;;  %v3785_v10 = vsel %vm298_vm0, %v1168_v50, %v1169_v1  ;;  %v1200_v30 = vrot.slane %v3765_v59, 2  ;;  %v1201_v20 = vrot.slane %v1129_v49, 2  ;;  %v1365_v41 = vld [vmem:[#allocation4 + $0x3e8] sm:$0xff]  ;;  %v1348_v28 = vld [vmem:[#allocation4 + $0x360] sm:$0xff]  ;;  %v1366_v54 = vld [vmem:[#allocation4 + $0x3f0] sm:$0xff] }
 0x179   : > { %1563 = vmatprep.mubr.f32.mxu0 %v3758_v31  ;;  %2854 = vmatpush3.bf16.msra.mxu0 %v2853_v62  ;;  %v3773_v6 = vsel %vm298_vm0, %v1165_v57, %v1166_v58  ;;  %v3793_v21 = vld [vmem:[#allocation3 + $0x60] sm:$0xff]  ;;  %v1133_v22 = vld [vmem:[#allocation3 + $0x68] sm:$0x3]  ;;  %v2865_v25 = vpack.c.bf16 %v1345_v12, %v1344_v61  ;;  %v2867_v45 = vpack.c.bf16 %v1363_v16, %v1362_v14  ;;  %v1367_v49 = vld [vmem:[#allocation4 + $0x3f8] sm:$0xff] }
 0x17a   : > { %2856 = vmatprep.subr.bf16.mxu0 %v2855_v39  ;;  %v3781_v0 = vld [vmem:[#allocation3 + $0x50] sm:$0xff]  ;;  %v1131_v8 = vld [vmem:[#allocation3 + $0x58] sm:$0x3]  ;;  %v3790_v36 = vsel %vm331_vm1, %v1197_v15, %v1198_v48  ;;  %v1174_v26 = vrot.slane %v3793_v21, 1  ;;  %v1175_v27 = vrot.slane %v1133_v22, 1  ;;  %v3804_v35 = vsel %vm331_vm1, %v1200_v30, %v1201_v20  ;;  %v1349_v53 = vld [vmem:[#allocation4 + $0x368] sm:$0xff] }
 0x17b   : > { %1459 = vmatmul.mubr.f32.gmra.mrb[36].mxu1 %v3747_v17  ;;  %v1171_v23 = vrot.slane %v3781_v0, 1  ;;  %v1172_v19 = vrot.slane %v1131_v8, 1  ;;  %v1203_v38 = vrot.slane %v3781_v0, 2  ;;  %v1204_v40 = vrot.slane %v1131_v8, 2  ;;  %v1350_v1 = vld [vmem:[#allocation4 + $0x370] sm:$0xff]  ;;  %v1371_v61 = vld [vmem:[#allocation4 + $0x418] sm:$0xff] }
 0x17c   : > { %1463 = vmatprep.mubr.f32.mxu1 %v3773_v6  ;;  %1564 = vmatmul.mubr.f32.gmra.mrb[44].mxu0 %v3776_v52  ;;  %v2869_v62 = vpack.c.bf16 %v1347_v32, %v1346_v29  ;;  %v3813_v9 = vsel %vm298_vm0, %v1174_v26, %v1175_v27  ;;  %v1206_v51 = vrot.slane %v3793_v21, 2  ;;  %v2871_v47 = vpack.c.bf16 %v1365_v41, %v1364_v55  ;;  %v1373_v12 = vld [vmem:[#allocation4 + $0x428] sm:$0xff]  ;;  %v1375_v16 = vld [vmem:[#allocation4 + $0x438] sm:$0xff]  ;;  %v1382_v29 = vld [vmem:[#allocation4 + $0x470] sm:$0xff] }
 0x17d   : > { %1568 = vmatprep.mubr.f32.mxu0 %v3765_v59  ;;  %2858 = vmatpush3.bf16.msra.mxu0 %v2857_v60  ;;  %v3801_v33 = vsel %vm298_vm0, %v1171_v23, %v1172_v19  ;;  %v3818_v39 = vsel %vm331_vm1, %v1203_v38, %v1204_v40  ;;  %v1207_v58 = vrot.slane %v1133_v22, 2  ;;  %v2873_v60 = vpack.c.bf16 %v1349_v53, %v1348_v28  ;;  %v3834_v63 = vld [vmem:[#allocation3 + $0x80] sm:$0xff]  ;;  %v1379_v23 = vld [vmem:[#allocation4 + $0x458] sm:$0xff]  ;;  %v1381_v20 = vld [vmem:[#allocation4 + $0x468] sm:$0xff] }
 0x17e   : > { %2860 = vmatprep.subr.bf16.mxu0 %v2859_v2  ;;  %v3809_v44 = vld [vmem:[#allocation3 + $0x70] sm:$0xff]  ;;  %v1135_v46 = vld [vmem:[#allocation3 + $0x78] sm:$0x3]  ;;  %v2875_v50 = vpack.c.bf16 %v1367_v49, %v1366_v54  ;;  %v1226_v27 = vrot.slane %v3834_v63, 2 }
 0x17f   : > { %1464 = vmatmul.mubr.f32.gmra.mrb[38].mxu1 %v3758_v31  ;;  %v1177_v56 = vrot.slane %v3809_v44, 1  ;;  %v1178_v57 = vrot.slane %v1135_v46, 1  ;;  %v1351_v2 = vld [vmem:[#allocation4 + $0x378] sm:$0xff]  ;;  %v3829_v4 = vsel %vm331_vm1, %v1206_v51, %v1207_v58  ;;  %v1209_v15 = vrot.slane %v3809_v44, 2 }
 0x180   : > { %1468 = vmatprep.mubr.f32.mxu1 %v3785_v10  ;;  %1569 = vmatmul.mubr.f32.gmra.mrb[46].mxu0 %v3790_v36  ;;  %v1210_v48 = vrot.slane %v1135_v46, 2  ;;  %v2877_v7 = vpack.c.bf16 %v1351_v2, %v1350_v1  ;;  %v1139_v22 = vld [vmem:[#allocation3 + $0x98] sm:$0x3] }
 0x181   : > { %1573 = vmatprep.mubr.f32.mxu0 %v3781_v0  ;;  %2862 = vmatpush3.bf16.msra.mxu0 %v2861_v5  ;;  %v3826_v3 = vsel %vm298_vm0, %v1177_v56, %v1178_v57  ;;  %v1370_v5 = vld [vmem:[#allocation4 + $0x410] sm:$0xff]  ;;  %v1233_v26 = vrot.slane %v1139_v22, 1  ;;  %v1383_v32 = vld [vmem:[#allocation4 + $0x478] sm:$0xff] }
 0x182   : > { %2864 = vmatprep.subr.bf16.mxu0 %v2863_v11  ;;  %v3839_v8 = vsel %vm331_vm1, %v1209_v15, %v1210_v48  ;;  %v2883_v30 = vpack.c.bf16 %v1371_v61, %v1370_v5  ;;  %v1372_v11 = vld [vmem:[#allocation4 + $0x420] sm:$0xff] }
 0x183   : > { %1469 = vmatmul.mubr.f32.gmra.mrb[40].mxu1 %v3765_v59  ;;  %v2887_v14 = vpack.c.bf16 %v1373_v12, %v1372_v11  ;;  %v1234_v38 = vsel %vm298_vm0, %v1156_v43, %v1233_v26  ;;  %v1237_v43 = vrot.slane %v1139_v22, 2 }
 0x184   : > { %1473 = vmatprep.mubr.f32.mxu1 %v3801_v33  ;;  %1574 = vmatmul.mubr.f32.gmra.mrb[48].mxu0 %v3804_v35 }
 0x185   : > { %1578 = vmatprep.mubr.f32.mxu0 %v3793_v21  ;;  %2866 = vmatpush3.bf16.msra.mxu0 %v2865_v25  ;;  %v1238_v55 = vsel %vm331_vm1, %v1188_v37, %v1237_v43 }
 0x186   : > { %2868 = vmatprep.subr.bf16.mxu0 %v2867_v45 }
 0x187   : > { %1474 = vmatmul.mubr.f32.gmra.mrb[42].mxu1 %v3781_v0 }
 0x188   : > { %1478 = vmatprep.mubr.f32.mxu1 %v3813_v9  ;;  %1579 = vmatmul.mubr.f32.gmra.mrb[50].mxu0 %v3818_v39 }
 0x189   : > { %1583 = vmatprep.mubr.f32.mxu0 %v3809_v44  ;;  %2870 = vmatpush3.bf16.msra.mxu0 %v2869_v62 }
 0x18a   : > { %2872 = vmatprep.subr.bf16.mxu0 %v2871_v47 }
 0x18b   : > { %1479 = vmatmul.mubr.f32.gmra.mrb[44].mxu1 %v3793_v21 }
 0x18c   : > { %1483 = vmatprep.mubr.f32.mxu1 %v3826_v3  ;;  %1584 = vmatmul.mubr.f32.gmra.mrb[52].mxu0 %v3829_v4 }
 0x18d   : > { %1588 = vmatprep.mubr.f32.mxu0 %v3834_v63  ;;  %2874 = vmatpush3.bf16.msra.mxu0 %v2873_v60 }
 0x18e   : > { %2876 = vmatprep.subr.bf16.mxu0 %v2875_v50 }
 0x18f   : > { %1484 = vmatmul.mubr.f32.gmra.mrb[46].mxu1 %v3809_v44 }
 0x190   : > { %1589 = vmatmul.mubr.f32.gmra.mrb[54].mxu0 %v3839_v8  ;;  %1658 = vmatprep.mubr.f32.mxu1 %v3762_v13  ;;  %v1374_v13 = vld [vmem:[#allocation4 + $0x430] sm:$0xff] }
 0x191   : > { %2878 = vmatpush3.bf16.msra.mxu0 %v2877_v7  ;;  %1763 = vmatprep.mubr.f32.mxu0 %v3756_v18 }
 0x193   : > { %1659 = vmatmul.mubr.f32.vlgmr.msra.gmra.mrb[48].mxu1 %v3752_v24  ;;  %v2891_v24 = vpack.c.bf16 %v1375_v16, %v1374_v13 }
 0x194   : > { %1663 = vmatprep.mubr.f32.mxu1 %v3776_v52  ;;  %1764 = vmatmul.mubr.f32.vlgmr.msra.gmra.mrb[56].mxu0 %v3747_v17  ;;  %v1377_v17 = vld [vmem:[#allocation4 + $0x448] sm:$0xff] }
 0x195   : > { %2882 = vmatpush3.bf16.msra.mxu1 %v3733_v34  ;;  %1768 = vmatprep.mubr.f32.mxu0 %v3773_v6  ;;  %v1376_v34 = vld [vmem:[#allocation4 + $0x440] sm:$0xff] }
 0x196   : > { %2884 = vmatprep.subr.bf16.mxu1 %v2883_v30 }
 0x197   : > { %1664 = vmatmul.mubr.f32.gmra.mrb[50].mxu1 %v3756_v18  ;;  %v2895_v18 = vpack.c.bf16 %v1377_v17, %v1376_v34 }
 0x198   : > { %1668 = vmatprep.mubr.f32.mxu1 %v3790_v36  ;;  %1769 = vmatmul.mubr.f32.gmra.mrb[58].mxu0 %v3758_v31  ;;  %v1378_v31 = vld [vmem:[#allocation4 + $0x450] sm:$0xff] }
 0x199   : > { %2886 = vmatpush3.bf16.msra.mxu1 %v2883_v30  ;;  %1773 = vmatprep.mubr.f32.mxu0 %v3785_v10  ;;  %v2899_v19 = vpack.c.bf16 %v1379_v23, %v1378_v31 }
 0x19a   : > { %2888 = vmatprep.subr.bf16.mxu1 %v2887_v14 }
 0x19b   : > { %1669 = vmatmul.mubr.f32.gmra.mrb[52].mxu1 %v3773_v6  ;;  %v1137_v6 = vld [vmem:[#allocation3 + $0x88] sm:$0x3] }
 0x19c   : > { %1673 = vmatprep.mubr.f32.mxu1 %v3804_v35  ;;  %1774 = vmatmul.mubr.f32.gmra.mrb[60].mxu0 %v3765_v59  ;;  %v1380_v59 = vld [vmem:[#allocation4 + $0x460] sm:$0xff]  ;;  %v1223_v25 = vrot.slane %v1137_v6, 1  ;;  %v1227_v45 = vrot.slane %v1137_v6, 2 }
 0x19d   : > { %2890 = vmatpush3.bf16.msra.mxu1 %v2887_v14  ;;  %1778 = vmatprep.mubr.f32.mxu0 %v3801_v33 }
 0x19e   : > { %2892 = vmatprep.subr.bf16.mxu1 %v2891_v24  ;;  %v1228_v40 = vsel %vm331_vm1, %v1226_v27, %v1227_v45 }
 0x19f   : > { %1674 = vmatmul.mubr.f32.gmra.mrb[54].mxu1 %v3785_v10  ;;  %v1222_v10 = vrot.slane %v3834_v63, 1 }
 0x1a0   : > { %1678 = vmatprep.mubr.f32.mxu1 %v3818_v39  ;;  %1779 = vmatmul.mubr.f32.gmra.mrb[62].mxu0 %v3781_v0  ;;  %v2903_v0 = vpack.c.bf16 %v1381_v20, %v1380_v59 }
 0x1a1   : > { %2894 = vmatpush3.bf16.msra.mxu1 %v2891_v24  ;;  %1783 = vmatprep.mubr.f32.mxu0 %v3813_v9 }
 0x1a2   : > { %2896 = vmatprep.subr.bf16.mxu1 %v2895_v18 }
 0x1a3   : > { %1679 = vmatmul.mubr.f32.gmra.mrb[56].mxu1 %v3801_v33  ;;  %v2907_v33 = vpack.c.bf16 %v1383_v32, %v1382_v29 }
 0x1a4   : > { %1683 = vmatprep.mubr.f32.mxu1 %v3829_v4  ;;  %1784 = vmatmul.mubr.f32.gmra.mrb[64].mxu0 %v3793_v21  ;;  %v1224_v21 = vsel %vm298_vm0, %v1222_v10, %v1223_v25 }
 0x1a5   : > { %2898 = vmatpush3.bf16.msra.mxu1 %v2895_v18  ;;  %1788 = vmatprep.mubr.f32.mxu0 %v3826_v3 }
 0x1a6   : > { %2900 = vmatprep.subr.bf16.mxu1 %v2899_v19 }
 0x1a7   : > { %1684 = vmatmul.mubr.f32.gmra.mrb[58].mxu1 %v3813_v9 }
 0x1a8   : > { %1688 = vmatprep.mubr.f32.mxu1 %v3839_v8  ;;  %1789 = vmatmul.mubr.f32.gmra.mrb[66].mxu0 %v3809_v44 }
 0x1a9   : > { %2902 = vmatpush3.bf16.msra.mxu1 %v2899_v19  ;;  %1793 = vmatprep.mubr.f32.mxu0 %v1224_v21 }
 0x1aa   : > { %2904 = vmatprep.subr.bf16.mxu1 %v2903_v0 }
 0x1ab   : > { %1689 = vmatmul.mubr.f32.gmra.mrb[60].mxu1 %v3826_v3 }
 0x1ac   : > { %1693 = vmatprep.mubr.f32.mxu1 %v1228_v40  ;;  %1794 = vmatmul.mubr.f32.gmra.mrb[68].mxu0 %v3834_v63 }
 0x1ad   : > { %2906 = vmatpush3.bf16.msra.mxu1 %v2903_v0  ;;  %1798 = vmatprep.mubr.f32.mxu0 %v1234_v38 }
 0x1ae   : > { %2908 = vmatprep.subr.bf16.mxu1 %v2907_v33 }
 0x1af   : > { %1694 = vmatmul.mubr.f32.gmra.mrb[62].mxu1 %v1224_v21 }
 0x1b0   : > { %2579 = vmatprep.mubr.f32.mxu1 %v3776_v52  ;;  %1799 = vmatmul.mubr.f32.gmra.mrb[70].mxu0 %v3725_v42  ;;  %v2287_v52 = vpop.f32.mrb[32].mxu1 }
 0x1b1   : > { %2910 = vmatpush3.bf16.msra.mxu1 %v2907_v33  ;;  %v2288_v41 = vpop.f32.mrb[33].mxu1 }
 0x1b2   : > { %v2289_v44 = vadd.f32 %v2288_v41, %v2287_v52 }
 0x1b4   : > { %2580 = vmatmul.mubr.f32.vlgmr.msra.gmra.mrb[64].mxu1 %v3790_v36 }
 0x1b5   : > { %2582 = vmatprep.mubr.f32.mxu1 %v3804_v35 }
 0x1b8   : > { %2583 = vmatmul.mubr.f32.gmra.mrb[66].mxu1 %v3818_v39 }
 0x1b9   : > { %2585 = vmatprep.mubr.f32.mxu1 %v3829_v4 }
 0x1bc   : > { %2586 = vmatmul.mubr.f32.gmra.mrb[68].mxu1 %v3839_v8 }
 0x1bd   : > { %2588 = vmatprep.mubr.f32.mxu1 %v1228_v40 }
 0x1c0   : > { %2589 = vmatmul.mubr.f32.gmra.mrb[70].mxu1 %v1238_v55 }
 0x247   : > { %v2343_v46 = vpop.f32.mrb[40].mxu0 }
 0x248   : > { %v2344_v36 = vpop.f32.mrb[41].mxu0 }
 0x249   : > { %v2345_v62 = vadd.f32 %v2344_v36, %v2343_v46 }
 0x24a   : > { %v2290_v35 = vpop.f32.mrb[34].mxu1 }
 0x24b   : > { %v1556_v9 = vadd.f32 %v2345_v62, %v2289_v44  ;;  %v2291_v51 = vpop.f32.mrb[35].mxu1  ;;  %v2346_v47 = vpop.f32.mrb[42].mxu0 }
 0x24c   : > { %v2292_v28 = vadd.f32 %v2291_v51, %v2290_v35  ;;  %v2347_v53 = vpop.f32.mrb[43].mxu0 }
 0x24d   : > { %v2348_v39 = vadd.f32 %v2347_v53, %v2346_v47 }
 0x24e   : > { %v2293_v56 = vpop.f32.mrb[36].mxu1 }
 0x24f   : > { %v1561_v57 = vadd.f32 %v2348_v39, %v2292_v28  ;;  %v2294_v58 = vpop.f32.mrb[37].mxu1  ;;  %v2349_v42 = vpop.f32.mrb[44].mxu0 }
 0x250   : > { %v2295_v54 = vadd.f32 %v2294_v58, %v2293_v56  ;;  %v2350_v37 = vpop.f32.mrb[45].mxu0 }
 0x251   : > { %v2351_v49 = vadd.f32 %v2350_v37, %v2349_v42 }
 0x252   : > { %v2296_v60 = vpop.f32.mrb[38].mxu1 }
 0x253   : > { %v1566_v50 = vadd.f32 %v2351_v49, %v2295_v54  ;;  %v2297_v1 = vpop.f32.mrb[39].mxu1  ;;  %v2352_v2 = vpop.f32.mrb[46].mxu0 }
 0x254   : > { %v2298_v3 = vadd.f32 %v2297_v1, %v2296_v60  ;;  %v2353_v4 = vpop.f32.mrb[47].mxu0 }
 0x255   : > { %v2354_v15 = vadd.f32 %v2353_v4, %v2352_v2 }
 0x256   : > { %v2299_v48 = vpop.f32.mrb[40].mxu1 }
 0x257   : > { %v1571_v63 = vadd.f32 %v2354_v15, %v2298_v3  ;;  %v2300_v7 = vpop.f32.mrb[41].mxu1  ;;  %v2355_v8 = vpop.f32.mrb[48].mxu0 }
 0x258   : > { %v2301_v5 = vadd.f32 %v2300_v7, %v2299_v48  ;;  %v2356_v61 = vpop.f32.mrb[49].mxu0 }
 0x259   : > { %v2357_v30 = vadd.f32 %v2356_v61, %v2355_v8 }
 0x25a   : > { %v2302_v11 = vpop.f32.mrb[42].mxu1 }
 0x25b   : > { %v1576_v12 = vadd.f32 %v2357_v30, %v2301_v5  ;;  %v2303_v14 = vpop.f32.mrb[43].mxu1  ;;  %v2358_v13 = vpop.f32.mrb[50].mxu0 }
 0x25c   : > { %v2304_v16 = vadd.f32 %v2303_v14, %v2302_v11  ;;  %v2359_v24 = vpop.f32.mrb[51].mxu0 }
 0x25d   : > { %v2360_v34 = vadd.f32 %v2359_v24, %v2358_v13 }
 0x25e   : > { %v2305_v17 = vpop.f32.mrb[44].mxu1 }
 0x25f   : > { %v1581_v18 = vadd.f32 %v2360_v34, %v2304_v16  ;;  %v2306_v31 = vpop.f32.mrb[45].mxu1  ;;  %v2361_v23 = vpop.f32.mrb[52].mxu0 }
 0x260   : > { %v2307_v6 = vadd.f32 %v2306_v31, %v2305_v17  ;;  %v2362_v19 = vpop.f32.mrb[53].mxu0 }
 0x261   : > { %v2363_v59 = vadd.f32 %v2362_v19, %v2361_v23 }
 0x262   : > { %v2308_v20 = vpop.f32.mrb[46].mxu1 }
 0x263   : > { %v1586_v22 = vadd.f32 %v2363_v59, %v2307_v6  ;;  %v2309_v10 = vpop.f32.mrb[47].mxu1  ;;  %v2364_v25 = vpop.f32.mrb[54].mxu0 }
 0x264   : > { %v2310_v0 = vadd.f32 %v2309_v10, %v2308_v20  ;;  %v2365_v26 = vpop.f32.mrb[55].mxu0 }
 0x265   : > { %v2366_v27 = vadd.f32 %v2365_v26, %v2364_v25 }
 0x266   : > { %v2399_v45 = vpop.f32.mrb[48].mxu1 }
 0x267   : > { %v1591_v29 = vadd.f32 %v2366_v27, %v2310_v0  ;;  %v2400_v32 = vpop.f32.mrb[49].mxu1  ;;  %v2455_v21 = vpop.f32.mrb[56].mxu0 }
 0x268   : > { %v2401_v33 = vadd.f32 %v2400_v32, %v2399_v45  ;;  %v2456_v38 = vpop.f32.mrb[57].mxu0 }
 0x269   : > { %v2457_v40 = vadd.f32 %v2456_v38, %v2455_v21 }
 0x26a   : > { %v1661_v43 = vadd.f32 %v2401_v33, %v1556_v9  ;;  %v2402_v55 = vpop.f32.mrb[50].mxu1 }
 0x26b   : > { %v2403_v52 = vpop.f32.mrb[51].mxu1  ;;  %v2458_v41 = vpop.f32.mrb[58].mxu0 }
 0x26c   : > { %v2404_v44 = vadd.f32 %v2403_v52, %v2402_v55  ;;  %v2459_v46 = vpop.f32.mrb[59].mxu0  ;;  %v1766_v36 = vadd.f32 %v2457_v40, %v1661_v43 }
 0x26d   : > { %v2460_v62 = vadd.f32 %v2459_v46, %v2458_v41 }
 0x26e   : > { %v1666_v35 = vadd.f32 %v2404_v44, %v1561_v57  ;;  %v2405_v51 = vpop.f32.mrb[52].mxu1 }
 0x26f   : > { %v2406_v47 = vpop.f32.mrb[53].mxu1  ;;  %v2461_v28 = vpop.f32.mrb[60].mxu0 }
 0x270   : > { %v2407_v53 = vadd.f32 %v2406_v47, %v2405_v51  ;;  %v2462_v39 = vpop.f32.mrb[61].mxu0  ;;  %v1771_v56 = vadd.f32 %v2460_v62, %v1666_v35 }
 0x271   : > { %v2463_v58 = vadd.f32 %v2462_v39, %v2461_v28 }
 0x272   : > { %v1671_v42 = vadd.f32 %v2407_v53, %v1566_v50  ;;  %v2408_v54 = vpop.f32.mrb[54].mxu1 }
 0x273   : > { %v2409_v37 = vpop.f32.mrb[55].mxu1  ;;  %v2464_v49 = vpop.f32.mrb[62].mxu0 }
 0x274   : > { %v2410_v9 = vadd.f32 %v2409_v37, %v2408_v54  ;;  %v2465_v60 = vpop.f32.mrb[63].mxu0  ;;  %v1776_v1 = vadd.f32 %v2463_v58, %v1671_v42 }
 0x275   : > { %v2466_v2 = vadd.f32 %v2465_v60, %v2464_v49 }
 0x276   : > { %v1676_v3 = vadd.f32 %v2410_v9, %v1571_v63  ;;  %v2411_v4 = vpop.f32.mrb[56].mxu1 }
 0x277   : > { %v2412_v15 = vpop.f32.mrb[57].mxu1  ;;  %v2467_v48 = vpop.f32.mrb[64].mxu0 }
 0x278   : > { %v2413_v57 = vadd.f32 %v2412_v15, %v2411_v4  ;;  %v2468_v7 = vpop.f32.mrb[65].mxu0  ;;  %v1781_v8 = vadd.f32 %v2466_v2, %v1676_v3 }
 0x279   : > { %v2469_v5 = vadd.f32 %v2468_v7, %v2467_v48 }
 0x27a   : > { %v1681_v61 = vadd.f32 %v2413_v57, %v1576_v12  ;;  %v2414_v30 = vpop.f32.mrb[58].mxu1 }
 0x27b   : > { %v2415_v11 = vpop.f32.mrb[59].mxu1  ;;  %v2470_v14 = vpop.f32.mrb[66].mxu0 }
 0x27c   : > { %v2416_v50 = vadd.f32 %v2415_v11, %v2414_v30  ;;  %v2471_v13 = vpop.f32.mrb[67].mxu0  ;;  %v1786_v16 = vadd.f32 %v2469_v5, %v1681_v61 }
 0x27d   : > { %v2472_v24 = vadd.f32 %v2471_v13, %v2470_v14 }
 0x27e   : > { %v1686_v34 = vadd.f32 %v2416_v50, %v1581_v18  ;;  %v2417_v17 = vpop.f32.mrb[60].mxu1 }
 0x27f   : > { %v2418_v31 = vpop.f32.mrb[61].mxu1  ;;  %v2473_v23 = vpop.f32.mrb[68].mxu0 }
 0x280   : > { %v2419_v63 = vadd.f32 %v2418_v31, %v2417_v17  ;;  %v2474_v6 = vpop.f32.mrb[69].mxu0  ;;  %v1791_v19 = vadd.f32 %v2472_v24, %v1686_v34 }
 0x281   : > { %v2475_v59 = vadd.f32 %v2474_v6, %v2473_v23  ;;  %v2979_v6 = vmov (!%p3914_p3), 0.0  }
 0x282   : > { %v1691_v20 = vadd.f32 %v2419_v63, %v1586_v22  ;;  %v2420_v10 = vpop.f32.mrb[62].mxu1  ;;  %1949 = vst [vmem:[%s3906_s5] sm:$0x3] (!%p3914_p3), %v2979_v6 }
 0x283   : > { %v2421_v25 = vpop.f32.mrb[63].mxu1  ;;  %v2476_v0 = vpop.f32.mrb[70].mxu0 }
 0x284   : > { %v2422_v12 = vadd.f32 %v2421_v25, %v2420_v10  ;;  %v2477_v26 = vpop.f32.mrb[71].mxu0  ;;  %v1796_v27 = vadd.f32 %v2475_v59, %v1691_v20 }
 0x285   : > { %v2478_v45 = vadd.f32 %v2477_v26, %v2476_v0 }
 0x286   : > { %v1696_v32 = vadd.f32 %v2422_v12, %v1591_v29 }
 0x287   : > { %v2581_v21 = vpop.f32.mrb[64].mxu1 }
 0x288   : > { %v1876_v33 = vadd.f32 %v2581_v21, %v1771_v56  ;;  %v1870_v38 = vpop.f32.mrb[65].mxu1  ;;  %v1801_v18 = vadd.f32 %v2478_v45, %v1696_v32 }
 0x289   : > { %v1871_v40 = vadd.f32 %v1870_v38, %v1766_v36 }
 0x28a   : > { %v1923_v43 = vmul.f32 %v1876_v33, %v1876_v33 }
 0x28b   : > { %v1909_v55 = vadd.f32 %v1876_v33, %v1871_v40  ;;  %v1922_v52 = vmul.f32 %v1871_v40, %v1871_v40  ;;  %v2584_v41 = vpop.f32.mrb[66].mxu1 }
 0x28c   : > { %v1886_v44 = vadd.f32 %v2584_v41, %v1781_v8  ;;  %v1880_v46 = vpop.f32.mrb[67].mxu1 }
 0x28d   : > { %v1930_v22 = vadd.f32 %v1923_v43, %v1922_v52  ;;  %v1881_v62 = vadd.f32 %v1880_v46, %v1776_v1 }
 0x28e   : > { %v1925_v39 = vmul.f32 %v1886_v44, %v1886_v44 }
 0x28f   : > { %v1910_v35 = vadd.f32 %v1909_v55, %v1881_v62  ;;  %v1924_v51 = vmul.f32 %v1881_v62, %v1881_v62  ;;  %v2587_v47 = vpop.f32.mrb[68].mxu1 }
 0x290   : > { %v1896_v28 = vadd.f32 %v2587_v47, %v1791_v19  ;;  %v1890_v53 = vpop.f32.mrb[69].mxu1 }
 0x291   : > { %v1931_v29 = vadd.f32 %v1930_v22, %v1924_v51  ;;  %v1891_v58 = vadd.f32 %v1890_v53, %v1786_v16  ;;  %v1911_v56 = vadd.f32 %v1910_v35, %v1886_v44 }
 0x292   : > { %v1927_v60 = vmul.f32 %v1896_v28, %v1896_v28 }
 0x293   : > { %v1912_v42 = vadd.f32 %v1911_v56, %v1891_v58  ;;  %v1926_v54 = vmul.f32 %v1891_v58, %v1891_v58  ;;  %v1932_v36 = vadd.f32 %v1931_v29, %v1925_v39  ;;  %v2590_v37 = vpop.f32.mrb[70].mxu1 }
 0x294   : > { %v1906_v49 = vadd.f32 %v2590_v37, %v1801_v18  ;;  %v1900_v9 = vpop.f32.mrb[71].mxu1 }
 0x295   : > { %v1933_v2 = vadd.f32 %v1932_v36, %v1926_v54  ;;  %v1901_v3 = vadd.f32 %v1900_v9, %v1796_v27  ;;  %v1913_v4 = vadd.f32 %v1912_v42, %v1896_v28 }
 0x296   : > { %v1929_v57 = vmul.f32 %v1906_v49, %v1906_v49 }
 0x297   : > { %v1914_v1 = vadd.f32 %v1913_v4, %v1901_v3  ;;  %v1928_v15 = vmul.f32 %v1901_v3, %v1901_v3  ;;  %v1934_v48 = vadd.f32 %v1933_v2, %v1927_v60 }
 0x299   : > { %v1915_v7 = vadd.f32 %v1914_v1, %v1906_v49  ;;  %v1935_v8 = vadd.f32 %v1934_v48, %v1928_v15 }
 0x29b   : > { %v1916_v5 = vrot.slane %v1915_v7, 4  ;;  %v1936_v61 = vadd.f32 %v1935_v8, %v1929_v57 }
 0x29d   : > { %v1917_v30 = vadd.f32 %v1916_v5, %v1915_v7  ;;  %v1937_v11 = vrot.slane %v1936_v61, 4 }
 0x29f   : > { %v1918_v14 = vrot.slane %v1917_v30, 2  ;;  %v1938_v50 = vadd.f32 %v1937_v11, %v1936_v61 }
 0x2a1   : > { %v1919_v13 = vadd.f32 %v1918_v14, %v1917_v30  ;;  %v1939_v16 = vrot.slane %v1938_v50, 2 }
 0x2a3   : > { %v1920_v24 = vrot.slane %v1919_v13, 1  ;;  %v1940_v34 = vadd.f32 %v1939_v16, %v1938_v50  ;;  %1948 = sbr.rel (%p3914_p3) target bundleno = 682 (0x2aa), region = 48 }
 0x2a5   : > { %v1941_v17 = vrot.slane %v1940_v34, 1  ;;  %v1921_v31 = vadd.f32 %v1920_v24, %v1919_v13 }
 0x2a7   : > { %v1942_v23 = vadd.f32 %v1941_v17, %v1940_v34 }
 0x2a9   : > { %v1944_v63 = vsel %vm1943_vm2, %v1921_v31, %v1942_v23 }
 0x2aa PF: > { %v1950_v19 = vld [vmem:[%s3906_s5] sm:$0x3] }
 0x2ab   : > { %v1951_v59 = vadd.f32 %v1950_v19, %v1944_v63 }
 0x2ad   : > { %1952 = vst [vmem:[%s3906_s5] sm:$0x3] %v1951_v59 }
 0x2ae PF: > { %s16_s18 = sadd.s32 1, %s2973_s18  }
 0x2af   : > { %p13_p4 = scmp.ge.s32.totalorder %s16_s18, 4  }
 0x2b1   :  { %15 = sbr.rel (!%p13_p4) target bundleno = 1 (0x1), region = 77 }
 0x2b8   :  { %1964 = vsyncpa [#allocation5], 1 }
 0x2b9   :  { %1966 = vsyncpa [#allocation5 + $0x1], 1 }

</bundles_post_ra>
